<compile_context>
chip_gen: v6e
topology: v6e:2x2x1
jax: 0.10.0
libtpu: 0.0.40
codegen_flags: <defaults>
</compile_context>

<pallas_src>
import functools

import jax
import jax.numpy as jnp
from jax.experimental import pallas as pl
from jax.experimental.pallas import tpu as pltpu


def _round_up(v, m):
    return ((v + m - 1) // m) * m


def _fused_sigma_kernel(x_ref, mask_ref, *rest, K, dims, Wp, SLACK_P, LIVE_P,
                        MFLAT, CHUNK, act_dtype):
    """Whole Sigma_n_Net forward for one batch element (one grid step).

    rest = (w_0, b_0, ..., w_{L-1}, b_{L-1}, out_ref, act_a, act_b)

    Activation layout (channel-major, spatially FLAT; lane axis = padded pixels):
        buf[c, SLACK_P + p] = zero-padded image value at flat padded position p,
        p in [0, LIVE_P);  the SAME-padding ring and the LIVE..LIVE_P tail are 0.
    SLACK_P (>= pad*Wp+pad, multiple of 128) zero columns on both ends let every
    conv tap (kh, kw) be ONE contiguous lane window at a static offset, and keep
    all intermediate stores 128-lane aligned.
    """
    L = len(dims)
    w_refs = rest[0:2 * L:2]
    b_refs = rest[1:2 * L:2]
    o_ref = rest[2 * L]
    acts = (rest[2 * L + 1], rest[2 * L + 2])
    pad = (K - 1) // 2

    if L > 1:
        # Taps read [SLACK_P - SLACK, SLACK_P + LIVE_P + SLACK) but layer stores
        # only cover [SLACK_P, SLACK_P + LIVE_P), so the slack columns must be
        # zero.  This is ~2*Cscr*2*SLACK_P elements -- NOT a full-buffer memset.
        for buf in acts:
            rows = buf.shape[0]
            buf[:, 0:SLACK_P] = jnp.zeros((rows, SLACK_P), buf.dtype)
            buf[:, SLACK_P + LIVE_P:MFLAT] = jnp.zeros(
                (rows, MFLAT - SLACK_P - LIVE_P), buf.dtype)
        # Channel rows a layer reads beyond what its producer wrote would be
        # uninitialised VMEM (possibly NaN bits; 0 * NaN = NaN even though the
        # packed weights zero-pad those columns), so zero them once.  Empty when
        # all channel counts are multiples of 8 (the common case).
        zero_rows = [None, None]
        for l in range(1, L):
            rbuf = (l - 1) % 2
            need, have = dims[l][0], dims[l - 1][1]
            if need > have:
                lo, hi = zero_rows[rbuf] or (have, need)
                zero_rows[rbuf] = (min(lo, have), max(hi, need))
        for bi, zr in enumerate(zero_rows):
            if zr is not None:
                lo, hi = zr
                acts[bi][lo:hi, :] = jnp.zeros((hi - lo, MFLAT), acts[bi].dtype)

    interior = mask_ref[...]            # (1, LIVE_P) f32: 1 interior, 0 ring/tail

    for l, (cin_p, cout, relu) in enumerate(dims):
        w_all = w_refs[l][...]          # (K*K, cout, cin_p), compute dtype
        bias = b_refs[l][...]           # (cout, 1) float32
        src, dst = (l - 1) % 2, l % 2
        for s in range(0, LIVE_P, CHUNK):
            cw = min(CHUNK, LIVE_P - s)
            # K*K per-tap accumulating matmuls: no im2col concat is materialised;
            # the only f32 intermediate is the (cout, cw) accumulator.
            acc = None
            t = 0
            for kh in range(K):
                for kw in range(K):
                    boff = SLACK_P + s + (kh - pad) * Wp + (kw - pad)
                    if l == 0:
                        xs = x_ref[0, :, boff:boff + cw]
                    else:
                        xs = acts[src][0:cin_p, boff:boff + cw]
                    part = jnp.dot(w_all[t], xs,
                                   preferred_element_type=jnp.float32)
                    acc = part if acc is None else acc + part
                    t += 1
            acc = acc + bias
            if relu:
                acc = jnp.maximum(acc, 0.0)
            if l == L - 1:
                # Lane-dense, 128-aligned HBM output store (tail cropped in wrapper).
                o_ref[0, :, s:s + cw] = (acc + jnp.float32(3e-4)).astype(o_ref.dtype)
            else:
                # Next layer's zero-padded input: interior <- act, ring/tail <- 0.
                acts[dst][0:cout, SLACK_P + s:SLACK_P + s + cw] = (
                    acc * interior[:, s:s + cw]).astype(act_dtype)


def sigma_net_forward(x_nchw, packed, kdims, *, K, out_ch,
                      compute_dtype=jnp.bfloat16, lane_chunk=512):
    N, in_ch, H, W = x_nchw.shape
    pad = (K - 1) // 2
    Hp, Wp = H + 2 * pad, W + 2 * pad
    LIVE = Hp * Wp
    LIVE_P = _round_up(LIVE, 128)       # lane-dense (x128) compute / output width
    SLACK = pad * Wp + pad
    SLACK_P = _round_up(SLACK, 128)     # keeps intermediate stores lane-aligned
    MFLAT = LIVE_P + 2 * SLACK_P
    CHUNK = min(LIVE_P, _round_up(lane_chunk, 128))

    L = len(kdims)
    cin_p0 = kdims[0][0]
    if L > 1:
        Cscr = _round_up(
            max(max(kdims[l][1], kdims[l + 1][0]) for l in range(L - 1)), 8)
    else:
        Cscr = 8

    # Pre-padded, channel-padded, flat input (zeros in ring / slack / channel pad),
    # already in the compute dtype: layer-0 taps read it directly from x_ref --
    # no in-kernel scatter and no input-buffer memset.
    xp = jnp.pad(x_nchw, ((0, 0), (0, cin_p0 - in_ch), (pad, pad), (pad, pad)))
    xf = jnp.pad(xp.reshape(N, cin_p0, LIVE),
                 ((0, 0), (0, 0), (SLACK_P, SLACK_P + LIVE_P - LIVE)))
    xf = xf.astype(compute_dtype)

    # Interior mask over the flat lane-padded domain: 1 inside the image, 0 on the
    # SAME-padding ring and the LIVE..LIVE_P tail.  (1, LIVE_P) f32, ~1.5 KiB;
    # its block index never changes so it is not re-fetched across grid steps.
    lane = jnp.arange(LIVE_P)
    r, c = lane // Wp, lane % Wp
    mask = (((r >= pad) & (r < pad + H) & (c >= pad) & (c < pad + W))
            .astype(jnp.float32).reshape(1, LIVE_P))

    kernel = functools.partial(
        _fused_sigma_kernel, K=K, dims=tuple(kdims), Wp=Wp, SLACK_P=SLACK_P,
        LIVE_P=LIVE_P, MFLAT=MFLAT, CHUNK=CHUNK, act_dtype=compute_dtype)

    in_specs = [pl.BlockSpec((1, cin_p0, MFLAT), lambda n: (n, 0, 0)),
                pl.BlockSpec((1, LIVE_P), lambda n: (0, 0))]
    args = [xf, mask]
    for (wm, bm) in packed:
        in_specs.append(pl.BlockSpec(wm.shape, lambda n: (0, 0, 0)))
        in_specs.append(pl.BlockSpec(bm.shape, lambda n: (0, 0)))
        args.extend([wm, bm])

    # Explicit VMEM budget (portable to v7x's 64 MiB/TC): scratch + (double
    # buffered) blocks, with 2x headroom, floored at 32 MiB and capped at 64 MiB.
    isz = jnp.dtype(compute_dtype).itemsize
    need = (2 * Cscr * MFLAT * isz                               # ping-pong activations
            + 2 * (cin_p0 * MFLAT * isz                          # input block
                   + out_ch * LIVE_P * 4                         # output block
                   + LIVE_P * 4                                  # mask
                   + sum(K * K * co * ci * isz + co * 4 for (ci, co, _) in kdims)))
    vmem_limit = int(min(max(2 * need, 32 * 1024 * 1024), 64 * 1024 * 1024))

    out_flat = pl.pallas_call(
        kernel,
        out_shape=jax.ShapeDtypeStruct((N, out_ch, LIVE_P), x_nchw.dtype),
        grid=(N,),
        in_specs=in_specs,
        out_specs=pl.BlockSpec((1, out_ch, LIVE_P), lambda n: (n, 0, 0)),
        scratch_shapes=[pltpu.VMEM((Cscr, MFLAT), compute_dtype),
                        pltpu.VMEM((Cscr, MFLAT), compute_dtype)],
        compiler_params=pltpu.CompilerParams(
            dimension_semantics=("parallel",),
            vmem_limit_bytes=vmem_limit),
    )(*args)

    # (N, out_ch, LIVE_P): drop the lane-pad tail, then crop the SAME-padding ring.
    return (out_flat[:, :, :LIVE].reshape(N, out_ch, Hp, Wp)
            [:, :, pad:pad + H, pad:pad + W])


class SigmaNNetPallas:
    """Pallas re-implementation of Sigma_n_Net.  Parameters are synthesized
    deterministically in-script (intermediate convs: scaled uniform init;
    conv_final: zeros, matching nn.init.zeros_ in the reference).

    compute_dtype=bfloat16 (default) is the perf build: bf16 weights/activations,
    f32 accumulation.  compute_dtype=float32 gives PyTorch-exact numerics."""

    def __init__(self, in_ch, out_ch, mid_ch, layers, kernel_size, bias, key,
                 compute_dtype=jnp.bfloat16):
        assert bias, "reference module zero-inits conv_final.bias -> bias=True"
        assert kernel_size % 2 == 1, \
            "even kernel_size needs asymmetric SAME padding (diverges from PyTorch)"
        self.in_ch, self.out_ch, self.mid_ch = in_ch, out_ch, mid_ch
        self.layers = layers
        self.K = kernel_size
        self.compute_dtype = compute_dtype

        self.raw = []        # [(w_hwio, b)] for every conv, final conv last
        self.layer_cfg = []  # [(cin, cout, apply_relu)]
        if layers > 1:
            chans = [in_ch] + [mid_ch] * (layers - 1)
            for l in range(layers - 1):
                cin, cout = chans[l], chans[l + 1]
                key, kw_, kb_ = jax.random.split(key, 3)
                fan_in = cin * kernel_size * kernel_size
                bound = (6.0 / fan_in) ** 0.5
                w = jax.random.uniform(kw_, (kernel_size, kernel_size, cin, cout),
                                       jnp.float32, -bound, bound)
                b = jax.random.uniform(kb_, (cout,), jnp.float32, -bound, bound)
                self.raw.append((w, b))
                self.layer_cfg.append((cin, cout, True))
            # TODO(synk): init_weights(self.conv) is not defined in the reference
            # snippet; a deterministic kaiming-uniform-style init is used instead.

        cin_f = in_ch if layers == 1 else mid_ch
        self.raw.append((jnp.zeros((kernel_size, kernel_size, cin_f, out_ch),
                                   jnp.float32),
                         jnp.zeros((out_ch,), jnp.float32)))
        self.layer_cfg.append((cin_f, out_ch, False))
        self._pack()

    def _pack(self):
        K = self.K
        cd = self.compute_dtype
        self.packed = []   # [(w_taps (K*K, Cout, Cin_p) in compute dtype, b (Cout,1) f32)]
        self.kdims = []    # [(Cin_p, Cout, relu)]
        for (w, b), (cin, cout, relu) in zip(self.raw, self.layer_cfg):
            cin_p = _round_up(cin, 8)
            # NOTE: zero-padding the Cin columns is what makes ping-pong scratch
            # row reuse safe (stale finite activations hit zero weights).
            w_p = jnp.pad(w, ((0, 0), (0, 0), (0, cin_p - cin), (0, 0)))
            w_taps = w_p.reshape(K * K, cin_p, cout).transpose(0, 2, 1).astype(cd)
            self.packed.append((w_taps, b.reshape(cout, 1).astype(jnp.float32)))
            self.kdims.append((cin_p, cout, relu))

    def set_final_weights(self, w_hwio, b):
        self.raw[-1] = (w_hwio, b)
        self._pack()

    def __call__(self, x_nchw):
        return sigma_net_forward(x_nchw, self.packed, self.kdims,
                                 K=self.K, out_ch=self.out_ch,
                                 compute_dtype=self.compute_dtype)


def _reference_forward(net, x_nchw):
    """Pure-JAX reference (lax.conv, fp32) for correctness checking."""
    x = jnp.transpose(x_nchw, (0, 2, 3, 1))
    dn = ('NHWC', 'HWIO', 'NHWC')
    for (w, b), (_, _, relu) in zip(net.raw, net.layer_cfg):
        x = jax.lax.conv_general_dilated(x, w, (1, 1), 'SAME',
                                         dimension_numbers=dn,
                                         precision=jax.lax.Precision.HIGHEST)
        x = x + b[None, None, None, :]
        if relu:
            x = jax.nn.relu(x)
    x = x + 3e-4
    return jnp.transpose(x, (0, 3, 1, 2))


if __name__ == "__main__":
    key = jax.random.PRNGKey(0)
    k_x, k_net, k_wf, k_bf = jax.random.split(key, 4)

    # Small shapes consistent with the module: N=2, in_ch=4, H=W=16.
    in_ch, out_ch, mid_ch, layers, ksize = 4, 4, 32, 3, 3
    x = jax.random.normal(k_x, (2, in_ch, 16, 16), jnp.float32)

    # 1) fp32 parity build, module-faithful init (conv_final zero-initialised).
    net = SigmaNNetPallas(in_ch, out_ch, mid_ch, layers, ksize, bias=True,
                          key=k_net, compute_dtype=jnp.float32)
    out = jax.block_until_ready(net(x))
    ref = jax.block_until_ready(_reference_forward(net, x))
    assert out.shape == (2, out_ch, 16, 16)
    assert jnp.allclose(out, ref, atol=1e-4, rtol=1e-4)

    # 2) stronger check: non-zero final-conv weights exercise the last matmul path.
    wf = 0.05 * jax.random.normal(k_wf, (ksize, ksize, mid_ch, out_ch), jnp.float32)
    bf = 0.05 * jax.random.normal(k_bf, (out_ch,), jnp.float32)
    net.set_final_weights(wf, bf)
    out2 = jax.block_until_ready(net(x))
    ref2 = jax.block_until_ready(_reference_forward(net, x))
    assert jnp.allclose(out2, ref2, atol=1e-4, rtol=1e-4)

    # 3) bf16 perf build (the default): bf16 weights/activations, f32 accumulation.
    net_bf16 = SigmaNNetPallas(in_ch, out_ch, mid_ch, layers, ksize, bias=True,
                               key=k_net)
    net_bf16.set_final_weights(wf, bf)
    out3 = jax.block_until_ready(net_bf16(x))
    ref3 = jax.block_until_ready(_reference_forward(net_bf16, x))
    assert jnp.allclose(out3, ref3, atol=1e-1, rtol=1e-1)

    print("KERNEL_OK")
</pallas_src>

<mosaic_0001>
module attributes {stable_mosaic.version = 11 : i64} {
  func.func @_fused_sigma_kernel(%arg0: i32, %arg1: memref<1x8x640xf32, #tpu.memory_space<vmem>>, %arg2: memref<1x384xf32, #tpu.memory_space<vmem>>, %arg3: memref<9x32x8xf32, #tpu.memory_space<vmem>>, %arg4: memref<32x1xf32, #tpu.memory_space<vmem>>, %arg5: memref<9x32x32xf32, #tpu.memory_space<vmem>>, %arg6: memref<32x1xf32, #tpu.memory_space<vmem>>, %arg7: memref<9x4x32xf32, #tpu.memory_space<vmem>>, %arg8: memref<4x1xf32, #tpu.memory_space<vmem>>, %arg9: memref<1x4x384xf32, #tpu.memory_space<vmem>>, %arg10: memref<32x640xf32, #tpu.memory_space<vmem>>, %arg11: memref<32x640xf32, #tpu.memory_space<vmem>>) attributes {dimension_semantics = [#tpu.dimension_semantics<parallel>], iteration_bounds = array<i64: 2>, scalar_prefetch = 0 : i64, scratch_operands = 2 : i64, tpu.core_type = #tpu.core_type<tc>, window_params = [{transform_indices = @transform_0, window_bounds = array<i64: 1, 8, 640>}, {pipeline_mode = #tpu.pipeline_mode<synchronous>, transform_indices = @transform_1, window_bounds = array<i64: 1, 384>}, {pipeline_mode = #tpu.pipeline_mode<synchronous>, transform_indices = @transform_2, window_bounds = array<i64: 9, 32, 8>}, {pipeline_mode = #tpu.pipeline_mode<synchronous>, transform_indices = @transform_3, window_bounds = array<i64: 32, 1>}, {pipeline_mode = #tpu.pipeline_mode<synchronous>, transform_indices = @transform_4, window_bounds = array<i64: 9, 32, 32>}, {pipeline_mode = #tpu.pipeline_mode<synchronous>, transform_indices = @transform_5, window_bounds = array<i64: 32, 1>}, {pipeline_mode = #tpu.pipeline_mode<synchronous>, transform_indices = @transform_6, window_bounds = array<i64: 9, 4, 32>}, {pipeline_mode = #tpu.pipeline_mode<synchronous>, transform_indices = @transform_7, window_bounds = array<i64: 4, 1>}, {transform_indices = @transform_8, window_bounds = array<i64: 1, 4, 384>}]} {
    %cst = arith.constant 0.000000e+00 : f32
    %0 = vector.broadcast %cst : f32 to vector<32x128xf32>
    %c0 = arith.constant 0 : index
    %c0_0 = arith.constant 0 : index
    %1 = vector.load %arg10[%c0, %c0_0] : memref<32x640xf32, #tpu.memory_space<vmem>>, vector<32x128xf32>
    tpu.vector_store %arg10[%c0, %c0_0], %0 {strides = array<i32>} : memref<32x640xf32, #tpu.memory_space<vmem>>, vector<32x128xf32>,
    %cst_1 = arith.constant 0.000000e+00 : f32
    %2 = vector.broadcast %cst_1 : f32 to vector<32x128xf32>
    %c0_2 = arith.constant 0 : index
    %c512 = arith.constant 512 : index
    %3 = vector.load %arg10[%c0_2, %c512] : memref<32x640xf32, #tpu.memory_space<vmem>>, vector<32x128xf32>
    tpu.vector_store %arg10[%c0_2, %c512], %2 {strides = array<i32>} : memref<32x640xf32, #tpu.memory_space<vmem>>, vector<32x128xf32>,
    %cst_3 = arith.constant 0.000000e+00 : f32
    %4 = vector.broadcast %cst_3 : f32 to vector<32x128xf32>
    %c0_4 = arith.constant 0 : index
    %c0_5 = arith.constant 0 : index
    %5 = vector.load %arg11[%c0_4, %c0_5] : memref<32x640xf32, #tpu.memory_space<vmem>>, vector<32x128xf32>
    tpu.vector_store %arg11[%c0_4, %c0_5], %4 {strides = array<i32>} : memref<32x640xf32, #tpu.memory_space<vmem>>, vector<32x128xf32>,
    %cst_6 = arith.constant 0.000000e+00 : f32
    %6 = vector.broadcast %cst_6 : f32 to vector<32x128xf32>
    %c0_7 = arith.constant 0 : index
    %c512_8 = arith.constant 512 : index
    %7 = vector.load %arg11[%c0_7, %c512_8] : memref<32x640xf32, #tpu.memory_space<vmem>>, vector<32x128xf32>
    tpu.vector_store %arg11[%c0_7, %c512_8], %6 {strides = array<i32>} : memref<32x640xf32, #tpu.memory_space<vmem>>, vector<32x128xf32>,
    %c0_9 = arith.constant 0 : index
    %c0_10 = arith.constant 0 : index
    %8 = vector.load %arg2[%c0_9, %c0_10] : memref<1x384xf32, #tpu.memory_space<vmem>>, vector<1x384xf32>
    %c0_11 = arith.constant 0 : index
    %c0_12 = arith.constant 0 : index
    %c0_13 = arith.constant 0 : index
    %9 = vector.load %arg3[%c0_11, %c0_12, %c0_13] : memref<9x32x8xf32, #tpu.memory_space<vmem>>, vector<9x32x8xf32>
    %c0_14 = arith.constant 0 : index
    %c0_15 = arith.constant 0 : index
    %10 = vector.load %arg4[%c0_14, %c0_15] : memref<32x1xf32, #tpu.memory_space<vmem>>, vector<32x1xf32>
    %c0_16 = arith.constant 0 : index
    %c0_17 = arith.constant 0 : index
    %c109 = arith.constant 109 : index
    %11 = vector.load %arg1[%c0_16, %c0_17, %c109] : memref<1x8x640xf32, #tpu.memory_space<vmem>>, vector<1x8x384xf32>
    %12 = vector.shape_cast %11 : vector<1x8x384xf32> to vector<8x384xf32>
    %13 = vector.extract_strided_slice %9 {offsets = [0, 0, 0], sizes = [1, 32, 8], strides = [1, 1, 1]} : vector<9x32x8xf32> to vector<1x32x8xf32>
    %14 = vector.shape_cast %13 : vector<1x32x8xf32> to vector<32x8xf32>
    %cst_18 = arith.constant dense<0.000000e+00> : vector<32x384xf32>
    %15 = tpu.matmul %14, %12, %cst_18 {dimension_numbers = #tpu.dot_dimension_numbers<[1], [0], [0], [1], [0, 0, 1, 1], [], []>} : vector<32x8xf32>, vector<8x384xf32>, vector<32x384xf32> -> vector<32x384xf32>
    %c0_19 = arith.constant 0 : index
    %c0_20 = arith.constant 0 : index
    %c110 = arith.constant 110 : index
    %16 = vector.load %arg1[%c0_19, %c0_20, %c110] : memref<1x8x640xf32, #tpu.memory_space<vmem>>, vector<1x8x384xf32>
    %17 = vector.shape_cast %16 : vector<1x8x384xf32> to vector<8x384xf32>
    %18 = vector.extract_strided_slice %9 {offsets = [1, 0, 0], sizes = [1, 32, 8], strides = [1, 1, 1]} : vector<9x32x8xf32> to vector<1x32x8xf32>
    %19 = vector.shape_cast %18 : vector<1x32x8xf32> to vector<32x8xf32>
    %cst_21 = arith.constant dense<0.000000e+00> : vector<32x384xf32>
    %20 = tpu.matmul %19, %17, %cst_21 {dimension_numbers = #tpu.dot_dimension_numbers<[1], [0], [0], [1], [0, 0, 1, 1], [], []>} : vector<32x8xf32>, vector<8x384xf32>, vector<32x384xf32> -> vector<32x384xf32>
    %21 = arith.addf %15, %20 : vector<32x384xf32>
    %c0_22 = arith.constant 0 : index
    %c0_23 = arith.constant 0 : index
    %c111 = arith.constant 111 : index
    %22 = vector.load %arg1[%c0_22, %c0_23, %c111] : memref<1x8x640xf32, #tpu.memory_space<vmem>>, vector<1x8x384xf32>
    %23 = vector.shape_cast %22 : vector<1x8x384xf32> to vector<8x384xf32>
    %24 = vector.extract_strided_slice %9 {offsets = [2, 0, 0], sizes = [1, 32, 8], strides = [1, 1, 1]} : vector<9x32x8xf32> to vector<1x32x8xf32>
    %25 = vector.shape_cast %24 : vector<1x32x8xf32> to vector<32x8xf32>
    %cst_24 = arith.constant dense<0.000000e+00> : vector<32x384xf32>
    %26 = tpu.matmul %25, %23, %cst_24 {dimension_numbers = #tpu.dot_dimension_numbers<[1], [0], [0], [1], [0, 0, 1, 1], [], []>} : vector<32x8xf32>, vector<8x384xf32>, vector<32x384xf32> -> vector<32x384xf32>
    %27 = arith.addf %21, %26 : vector<32x384xf32>
    %c0_25 = arith.constant 0 : index
    %c0_26 = arith.constant 0 : index
    %c127 = arith.constant 127 : index
    %28 = vector.load %arg1[%c0_25, %c0_26, %c127] : memref<1x8x640xf32, #tpu.memory_space<vmem>>, vector<1x8x384xf32>
    %29 = vector.shape_cast %28 : vector<1x8x384xf32> to vector<8x384xf32>
    %30 = vector.extract_strided_slice %9 {offsets = [3, 0, 0], sizes = [1, 32, 8], strides = [1, 1, 1]} : vector<9x32x8xf32> to vector<1x32x8xf32>
    %31 = vector.shape_cast %30 : vector<1x32x8xf32> to vector<32x8xf32>
    %cst_27 = arith.constant dense<0.000000e+00> : vector<32x384xf32>
    %32 = tpu.matmul %31, %29, %cst_27 {dimension_numbers = #tpu.dot_dimension_numbers<[1], [0], [0], [1], [0, 0, 1, 1], [], []>} : vector<32x8xf32>, vector<8x384xf32>, vector<32x384xf32> -> vector<32x384xf32>
    %33 = arith.addf %27, %32 : vector<32x384xf32>
    %c0_28 = arith.constant 0 : index
    %c0_29 = arith.constant 0 : index
    %c128 = arith.constant 128 : index
    %34 = vector.load %arg1[%c0_28, %c0_29, %c128] : memref<1x8x640xf32, #tpu.memory_space<vmem>>, vector<1x8x384xf32>
    %35 = vector.shape_cast %34 : vector<1x8x384xf32> to vector<8x384xf32>
    %36 = vector.extract_strided_slice %9 {offsets = [4, 0, 0], sizes = [1, 32, 8], strides = [1, 1, 1]} : vector<9x32x8xf32> to vector<1x32x8xf32>
    %37 = vector.shape_cast %36 : vector<1x32x8xf32> to vector<32x8xf32>
    %cst_30 = arith.constant dense<0.000000e+00> : vector<32x384xf32>
    %38 = tpu.matmul %37, %35, %cst_30 {dimension_numbers = #tpu.dot_dimension_numbers<[1], [0], [0], [1], [0, 0, 1, 1], [], []>} : vector<32x8xf32>, vector<8x384xf32>, vector<32x384xf32> -> vector<32x384xf32>
    %39 = arith.addf %33, %38 : vector<32x384xf32>
    %c0_31 = arith.constant 0 : index
    %c0_32 = arith.constant 0 : index
    %c129 = arith.constant 129 : index
    %40 = vector.load %arg1[%c0_31, %c0_32, %c129] : memref<1x8x640xf32, #tpu.memory_space<vmem>>, vector<1x8x384xf32>
    %41 = vector.shape_cast %40 : vector<1x8x384xf32> to vector<8x384xf32>
    %42 = vector.extract_strided_slice %9 {offsets = [5, 0, 0], sizes = [1, 32, 8], strides = [1, 1, 1]} : vector<9x32x8xf32> to vector<1x32x8xf32>
    %43 = vector.shape_cast %42 : vector<1x32x8xf32> to vector<32x8xf32>
    %cst_33 = arith.constant dense<0.000000e+00> : vector<32x384xf32>
    %44 = tpu.matmul %43, %41, %cst_33 {dimension_numbers = #tpu.dot_dimension_numbers<[1], [0], [0], [1], [0, 0, 1, 1], [], []>} : vector<32x8xf32>, vector<8x384xf32>, vector<32x384xf32> -> vector<32x384xf32>
    %45 = arith.addf %39, %44 : vector<32x384xf32>
    %c0_34 = arith.constant 0 : index
    %c0_35 = arith.constant 0 : index
    %c145 = arith.constant 145 : index
    %46 = vector.load %arg1[%c0_34, %c0_35, %c145] : memref<1x8x640xf32, #tpu.memory_space<vmem>>, vector<1x8x384xf32>
    %47 = vector.shape_cast %46 : vector<1x8x384xf32> to vector<8x384xf32>
    %48 = vector.extract_strided_slice %9 {offsets = [6, 0, 0], sizes = [1, 32, 8], strides = [1, 1, 1]} : vector<9x32x8xf32> to vector<1x32x8xf32>
    %49 = vector.shape_cast %48 : vector<1x32x8xf32> to vector<32x8xf32>
    %cst_36 = arith.constant dense<0.000000e+00> : vector<32x384xf32>
    %50 = tpu.matmul %49, %47, %cst_36 {dimension_numbers = #tpu.dot_dimension_numbers<[1], [0], [0], [1], [0, 0, 1, 1], [], []>} : vector<32x8xf32>, vector<8x384xf32>, vector<32x384xf32> -> vector<32x384xf32>
    %51 = arith.addf %45, %50 : vector<32x384xf32>
    %c0_37 = arith.constant 0 : index
    %c0_38 = arith.constant 0 : index
    %c146 = arith.constant 146 : index
    %52 = vector.load %arg1[%c0_37, %c0_38, %c146] : memref<1x8x640xf32, #tpu.memory_space<vmem>>, vector<1x8x384xf32>
    %53 = vector.shape_cast %52 : vector<1x8x384xf32> to vector<8x384xf32>
    %54 = vector.extract_strided_slice %9 {offsets = [7, 0, 0], sizes = [1, 32, 8], strides = [1, 1, 1]} : vector<9x32x8xf32> to vector<1x32x8xf32>
    %55 = vector.shape_cast %54 : vector<1x32x8xf32> to vector<32x8xf32>
    %cst_39 = arith.constant dense<0.000000e+00> : vector<32x384xf32>
    %56 = tpu.matmul %55, %53, %cst_39 {dimension_numbers = #tpu.dot_dimension_numbers<[1], [0], [0], [1], [0, 0, 1, 1], [], []>} : vector<32x8xf32>, vector<8x384xf32>, vector<32x384xf32> -> vector<32x384xf32>
    %57 = arith.addf %51, %56 : vector<32x384xf32>
    %c0_40 = arith.constant 0 : index
    %c0_41 = arith.constant 0 : index
    %c147 = arith.constant 147 : index
    %58 = vector.load %arg1[%c0_40, %c0_41, %c147] : memref<1x8x640xf32, #tpu.memory_space<vmem>>, vector<1x8x384xf32>
    %59 = vector.shape_cast %58 : vector<1x8x384xf32> to vector<8x384xf32>
    %60 = vector.extract_strided_slice %9 {offsets = [8, 0, 0], sizes = [1, 32, 8], strides = [1, 1, 1]} : vector<9x32x8xf32> to vector<1x32x8xf32>
    %61 = vector.shape_cast %60 : vector<1x32x8xf32> to vector<32x8xf32>
    %cst_42 = arith.constant dense<0.000000e+00> : vector<32x384xf32>
    %62 = tpu.matmul %61, %59, %cst_42 {dimension_numbers = #tpu.dot_dimension_numbers<[1], [0], [0], [1], [0, 0, 1, 1], [], []>} : vector<32x8xf32>, vector<8x384xf32>, vector<32x384xf32> -> vector<32x384xf32>
    %63 = arith.addf %57, %62 : vector<32x384xf32>
    %64 = vector.broadcast %10 : vector<32x1xf32> to vector<32x384xf32>
    %65 = arith.addf %63, %64 : vector<32x384xf32>
    %cst_43 = arith.constant 0.000000e+00 : f32
    %66 = vector.broadcast %cst_43 : f32 to vector<32x384xf32>
    %67 = arith.maximumf %65, %66 : vector<32x384xf32>
    %68 = vector.broadcast %8 : vector<1x384xf32> to vector<32x384xf32>
    %69 = arith.mulf %67, %68 : vector<32x384xf32>
    %c0_44 = arith.constant 0 : index
    %c128_45 = arith.constant 128 : index
    %70 = vector.load %arg10[%c0_44, %c128_45] : memref<32x640xf32, #tpu.memory_space<vmem>>, vector<32x384xf32>
    tpu.vector_store %arg10[%c0_44, %c128_45], %69 {strides = array<i32>} : memref<32x640xf32, #tpu.memory_space<vmem>>, vector<32x384xf32>,
    %c0_46 = arith.constant 0 : index
    %c0_47 = arith.constant 0 : index
    %c0_48 = arith.constant 0 : index
    %71 = vector.load %arg5[%c0_46, %c0_47, %c0_48] : memref<9x32x32xf32, #tpu.memory_space<vmem>>, vector<9x32x32xf32>
    %c0_49 = arith.constant 0 : index
    %c0_50 = arith.constant 0 : index
    %72 = vector.load %arg6[%c0_49, %c0_50] : memref<32x1xf32, #tpu.memory_space<vmem>>, vector<32x1xf32>
    %c0_51 = arith.constant 0 : index
    %c109_52 = arith.constant 109 : index
    %73 = vector.load %arg10[%c0_51, %c109_52] : memref<32x640xf32, #tpu.memory_space<vmem>>, vector<32x384xf32>
    %74 = vector.extract_strided_slice %71 {offsets = [0, 0, 0], sizes = [1, 32, 32], strides = [1, 1, 1]} : vector<9x32x32xf32> to vector<1x32x32xf32>
    %75 = vector.shape_cast %74 : vector<1x32x32xf32> to vector<32x32xf32>
    %cst_53 = arith.constant dense<0.000000e+00> : vector<32x384xf32>
    %76 = tpu.matmul %75, %73, %cst_53 {dimension_numbers = #tpu.dot_dimension_numbers<[1], [0], [0], [1], [0, 0, 1, 1], [], []>} : vector<32x32xf32>, vector<32x384xf32>, vector<32x384xf32> -> vector<32x384xf32>
    %c0_54 = arith.constant 0 : index
    %c110_55 = arith.constant 110 : index
    %77 = vector.load %arg10[%c0_54, %c110_55] : memref<32x640xf32, #tpu.memory_space<vmem>>, vector<32x384xf32>
    %78 = vector.extract_strided_slice %71 {offsets = [1, 0, 0], sizes = [1, 32, 32], strides = [1, 1, 1]} : vector<9x32x32xf32> to vector<1x32x32xf32>
    %79 = vector.shape_cast %78 : vector<1x32x32xf32> to vector<32x32xf32>
    %cst_56 = arith.constant dense<0.000000e+00> : vector<32x384xf32>
    %80 = tpu.matmul %79, %77, %cst_56 {dimension_numbers = #tpu.dot_dimension_numbers<[1], [0], [0], [1], [0, 0, 1, 1], [], []>} : vector<32x32xf32>, vector<32x384xf32>, vector<32x384xf32> -> vector<32x384xf32>
    %81 = arith.addf %76, %80 : vector<32x384xf32>
    %c0_57 = arith.constant 0 : index
    %c111_58 = arith.constant 111 : index
    %82 = vector.load %arg10[%c0_57, %c111_58] : memref<32x640xf32, #tpu.memory_space<vmem>>, vector<32x384xf32>
    %83 = vector.extract_strided_slice %71 {offsets = [2, 0, 0], sizes = [1, 32, 32], strides = [1, 1, 1]} : vector<9x32x32xf32> to vector<1x32x32xf32>
    %84 = vector.shape_cast %83 : vector<1x32x32xf32> to vector<32x32xf32>
    %cst_59 = arith.constant dense<0.000000e+00> : vector<32x384xf32>
    %85 = tpu.matmul %84, %82, %cst_59 {dimension_numbers = #tpu.dot_dimension_numbers<[1], [0], [0], [1], [0, 0, 1, 1], [], []>} : vector<32x32xf32>, vector<32x384xf32>, vector<32x384xf32> -> vector<32x384xf32>
    %86 = arith.addf %81, %85 : vector<32x384xf32>
    %c0_60 = arith.constant 0 : index
    %c127_61 = arith.constant 127 : index
    %87 = vector.load %arg10[%c0_60, %c127_61] : memref<32x640xf32, #tpu.memory_space<vmem>>, vector<32x384xf32>
    %88 = vector.extract_strided_slice %71 {offsets = [3, 0, 0], sizes = [1, 32, 32], strides = [1, 1, 1]} : vector<9x32x32xf32> to vector<1x32x32xf32>
    %89 = vector.shape_cast %88 : vector<1x32x32xf32> to vector<32x32xf32>
    %cst_62 = arith.constant dense<0.000000e+00> : vector<32x384xf32>
    %90 = tpu.matmul %89, %87, %cst_62 {dimension_numbers = #tpu.dot_dimension_numbers<[1], [0], [0], [1], [0, 0, 1, 1], [], []>} : vector<32x32xf32>, vector<32x384xf32>, vector<32x384xf32> -> vector<32x384xf32>
    %91 = arith.addf %86, %90 : vector<32x384xf32>
    %c0_63 = arith.constant 0 : index
    %c128_64 = arith.constant 128 : index
    %92 = vector.load %arg10[%c0_63, %c128_64] : memref<32x640xf32, #tpu.memory_space<vmem>>, vector<32x384xf32>
    %93 = vector.extract_strided_slice %71 {offsets = [4, 0, 0], sizes = [1, 32, 32], strides = [1, 1, 1]} : vector<9x32x32xf32> to vector<1x32x32xf32>
    %94 = vector.shape_cast %93 : vector<1x32x32xf32> to vector<32x32xf32>
    %cst_65 = arith.constant dense<0.000000e+00> : vector<32x384xf32>
    %95 = tpu.matmul %94, %92, %cst_65 {dimension_numbers = #tpu.dot_dimension_numbers<[1], [0], [0], [1], [0, 0, 1, 1], [], []>} : vector<32x32xf32>, vector<32x384xf32>, vector<32x384xf32> -> vector<32x384xf32>
    %96 = arith.addf %91, %95 : vector<32x384xf32>
    %c0_66 = arith.constant 0 : index
    %c129_67 = arith.constant 129 : index
    %97 = vector.load %arg10[%c0_66, %c129_67] : memref<32x640xf32, #tpu.memory_space<vmem>>, vector<32x384xf32>
    %98 = vector.extract_strided_slice %71 {offsets = [5, 0, 0], sizes = [1, 32, 32], strides = [1, 1, 1]} : vector<9x32x32xf32> to vector<1x32x32xf32>
    %99 = vector.shape_cast %98 : vector<1x32x32xf32> to vector<32x32xf32>
    %cst_68 = arith.constant dense<0.000000e+00> : vector<32x384xf32>
    %100 = tpu.matmul %99, %97, %cst_68 {dimension_numbers = #tpu.dot_dimension_numbers<[1], [0], [0], [1], [0, 0, 1, 1], [], []>} : vector<32x32xf32>, vector<32x384xf32>, vector<32x384xf32> -> vector<32x384xf32>
    %101 = arith.addf %96, %100 : vector<32x384xf32>
    %c0_69 = arith.constant 0 : index
    %c145_70 = arith.constant 145 : index
    %102 = vector.load %arg10[%c0_69, %c145_70] : memref<32x640xf32, #tpu.memory_space<vmem>>, vector<32x384xf32>
    %103 = vector.extract_strided_slice %71 {offsets = [6, 0, 0], sizes = [1, 32, 32], strides = [1, 1, 1]} : vector<9x32x32xf32> to vector<1x32x32xf32>
    %104 = vector.shape_cast %103 : vector<1x32x32xf32> to vector<32x32xf32>
    %cst_71 = arith.constant dense<0.000000e+00> : vector<32x384xf32>
    %105 = tpu.matmul %104, %102, %cst_71 {dimension_numbers = #tpu.dot_dimension_numbers<[1], [0], [0], [1], [0, 0, 1, 1], [], []>} : vector<32x32xf32>, vector<32x384xf32>, vector<32x384xf32> -> vector<32x384xf32>
    %106 = arith.addf %101, %105 : vector<32x384xf32>
    %c0_72 = arith.constant 0 : index
    %c146_73 = arith.constant 146 : index
    %107 = vector.load %arg10[%c0_72, %c146_73] : memref<32x640xf32, #tpu.memory_space<vmem>>, vector<32x384xf32>
    %108 = vector.extract_strided_slice %71 {offsets = [7, 0, 0], sizes = [1, 32, 32], strides = [1, 1, 1]} : vector<9x32x32xf32> to vector<1x32x32xf32>
    %109 = vector.shape_cast %108 : vector<1x32x32xf32> to vector<32x32xf32>
    %cst_74 = arith.constant dense<0.000000e+00> : vector<32x384xf32>
    %110 = tpu.matmul %109, %107, %cst_74 {dimension_numbers = #tpu.dot_dimension_numbers<[1], [0], [0], [1], [0, 0, 1, 1], [], []>} : vector<32x32xf32>, vector<32x384xf32>, vector<32x384xf32> -> vector<32x384xf32>
    %111 = arith.addf %106, %110 : vector<32x384xf32>
    %c0_75 = arith.constant 0 : index
    %c147_76 = arith.constant 147 : index
    %112 = vector.load %arg10[%c0_75, %c147_76] : memref<32x640xf32, #tpu.memory_space<vmem>>, vector<32x384xf32>
    %113 = vector.extract_strided_slice %71 {offsets = [8, 0, 0], sizes = [1, 32, 32], strides = [1, 1, 1]} : vector<9x32x32xf32> to vector<1x32x32xf32>
    %114 = vector.shape_cast %113 : vector<1x32x32xf32> to vector<32x32xf32>
    %cst_77 = arith.constant dense<0.000000e+00> : vector<32x384xf32>
    %115 = tpu.matmul %114, %112, %cst_77 {dimension_numbers = #tpu.dot_dimension_numbers<[1], [0], [0], [1], [0, 0, 1, 1], [], []>} : vector<32x32xf32>, vector<32x384xf32>, vector<32x384xf32> -> vector<32x384xf32>
    %116 = arith.addf %111, %115 : vector<32x384xf32>
    %117 = vector.broadcast %72 : vector<32x1xf32> to vector<32x384xf32>
    %118 = arith.addf %116, %117 : vector<32x384xf32>
    %cst_78 = arith.constant 0.000000e+00 : f32
    %119 = vector.broadcast %cst_78 : f32 to vector<32x384xf32>
    %120 = arith.maximumf %118, %119 : vector<32x384xf32>
    %121 = vector.broadcast %8 : vector<1x384xf32> to vector<32x384xf32>
    %122 = arith.mulf %120, %121 : vector<32x384xf32>
    %c0_79 = arith.constant 0 : index
    %c128_80 = arith.constant 128 : index
    %123 = vector.load %arg11[%c0_79, %c128_80] : memref<32x640xf32, #tpu.memory_space<vmem>>, vector<32x384xf32>
    tpu.vector_store %arg11[%c0_79, %c128_80], %122 {strides = array<i32>} : memref<32x640xf32, #tpu.memory_space<vmem>>, vector<32x384xf32>,
    %c0_81 = arith.constant 0 : index
    %c0_82 = arith.constant 0 : index
    %c0_83 = arith.constant 0 : index
    %124 = vector.load %arg7[%c0_81, %c0_82, %c0_83] : memref<9x4x32xf32, #tpu.memory_space<vmem>>, vector<9x4x32xf32>
    %c0_84 = arith.constant 0 : index
    %c0_85 = arith.constant 0 : index
    %125 = vector.load %arg8[%c0_84, %c0_85] : memref<4x1xf32, #tpu.memory_space<vmem>>, vector<4x1xf32>
    %c0_86 = arith.constant 0 : index
    %c109_87 = arith.constant 109 : index
    %126 = vector.load %arg11[%c0_86, %c109_87] : memref<32x640xf32, #tpu.memory_space<vmem>>, vector<32x384xf32>
    %127 = vector.extract_strided_slice %124 {offsets = [0, 0, 0], sizes = [1, 4, 32], strides = [1, 1, 1]} : vector<9x4x32xf32> to vector<1x4x32xf32>
    %128 = vector.shape_cast %127 : vector<1x4x32xf32> to vector<4x32xf32>
    %cst_88 = arith.constant dense<0.000000e+00> : vector<4x384xf32>
    %129 = tpu.matmul %128, %126, %cst_88 {dimension_numbers = #tpu.dot_dimension_numbers<[1], [0], [0], [1], [0, 0, 1, 1], [], []>} : vector<4x32xf32>, vector<32x384xf32>, vector<4x384xf32> -> vector<4x384xf32>
    %c0_89 = arith.constant 0 : index
    %c110_90 = arith.constant 110 : index
    %130 = vector.load %arg11[%c0_89, %c110_90] : memref<32x640xf32, #tpu.memory_space<vmem>>, vector<32x384xf32>
    %131 = vector.extract_strided_slice %124 {offsets = [1, 0, 0], sizes = [1, 4, 32], strides = [1, 1, 1]} : vector<9x4x32xf32> to vector<1x4x32xf32>
    %132 = vector.shape_cast %131 : vector<1x4x32xf32> to vector<4x32xf32>
    %cst_91 = arith.constant dense<0.000000e+00> : vector<4x384xf32>
    %133 = tpu.matmul %132, %130, %cst_91 {dimension_numbers = #tpu.dot_dimension_numbers<[1], [0], [0], [1], [0, 0, 1, 1], [], []>} : vector<4x32xf32>, vector<32x384xf32>, vector<4x384xf32> -> vector<4x384xf32>
    %134 = arith.addf %129, %133 : vector<4x384xf32>
    %c0_92 = arith.constant 0 : index
    %c111_93 = arith.constant 111 : index
    %135 = vector.load %arg11[%c0_92, %c111_93] : memref<32x640xf32, #tpu.memory_space<vmem>>, vector<32x384xf32>
    %136 = vector.extract_strided_slice %124 {offsets = [2, 0, 0], sizes = [1, 4, 32], strides = [1, 1, 1]} : vector<9x4x32xf32> to vector<1x4x32xf32>
    %137 = vector.shape_cast %136 : vector<1x4x32xf32> to vector<4x32xf32>
    %cst_94 = arith.constant dense<0.000000e+00> : vector<4x384xf32>
    %138 = tpu.matmul %137, %135, %cst_94 {dimension_numbers = #tpu.dot_dimension_numbers<[1], [0], [0], [1], [0, 0, 1, 1], [], []>} : vector<4x32xf32>, vector<32x384xf32>, vector<4x384xf32> -> vector<4x384xf32>
    %139 = arith.addf %134, %138 : vector<4x384xf32>
    %c0_95 = arith.constant 0 : index
    %c127_96 = arith.constant 127 : index
    %140 = vector.load %arg11[%c0_95, %c127_96] : memref<32x640xf32, #tpu.memory_space<vmem>>, vector<32x384xf32>
    %141 = vector.extract_strided_slice %124 {offsets = [3, 0, 0], sizes = [1, 4, 32], strides = [1, 1, 1]} : vector<9x4x32xf32> to vector<1x4x32xf32>
    %142 = vector.shape_cast %141 : vector<1x4x32xf32> to vector<4x32xf32>
    %cst_97 = arith.constant dense<0.000000e+00> : vector<4x384xf32>
    %143 = tpu.matmul %142, %140, %cst_97 {dimension_numbers = #tpu.dot_dimension_numbers<[1], [0], [0], [1], [0, 0, 1, 1], [], []>} : vector<4x32xf32>, vector<32x384xf32>, vector<4x384xf32> -> vector<4x384xf32>
    %144 = arith.addf %139, %143 : vector<4x384xf32>
    %c0_98 = arith.constant 0 : index
    %c128_99 = arith.constant 128 : index
    %145 = vector.load %arg11[%c0_98, %c128_99] : memref<32x640xf32, #tpu.memory_space<vmem>>, vector<32x384xf32>
    %146 = vector.extract_strided_slice %124 {offsets = [4, 0, 0], sizes = [1, 4, 32], strides = [1, 1, 1]} : vector<9x4x32xf32> to vector<1x4x32xf32>
    %147 = vector.shape_cast %146 : vector<1x4x32xf32> to vector<4x32xf32>
    %cst_100 = arith.constant dense<0.000000e+00> : vector<4x384xf32>
    %148 = tpu.matmul %147, %145, %cst_100 {dimension_numbers = #tpu.dot_dimension_numbers<[1], [0], [0], [1], [0, 0, 1, 1], [], []>} : vector<4x32xf32>, vector<32x384xf32>, vector<4x384xf32> -> vector<4x384xf32>
    %149 = arith.addf %144, %148 : vector<4x384xf32>
    %c0_101 = arith.constant 0 : index
    %c129_102 = arith.constant 129 : index
    %150 = vector.load %arg11[%c0_101, %c129_102] : memref<32x640xf32, #tpu.memory_space<vmem>>, vector<32x384xf32>
    %151 = vector.extract_strided_slice %124 {offsets = [5, 0, 0], sizes = [1, 4, 32], strides = [1, 1, 1]} : vector<9x4x32xf32> to vector<1x4x32xf32>
    %152 = vector.shape_cast %151 : vector<1x4x32xf32> to vector<4x32xf32>
    %cst_103 = arith.constant dense<0.000000e+00> : vector<4x384xf32>
    %153 = tpu.matmul %152, %150, %cst_103 {dimension_numbers = #tpu.dot_dimension_numbers<[1], [0], [0], [1], [0, 0, 1, 1], [], []>} : vector<4x32xf32>, vector<32x384xf32>, vector<4x384xf32> -> vector<4x384xf32>
    %154 = arith.addf %149, %153 : vector<4x384xf32>
    %c0_104 = arith.constant 0 : index
    %c145_105 = arith.constant 145 : index
    %155 = vector.load %arg11[%c0_104, %c145_105] : memref<32x640xf32, #tpu.memory_space<vmem>>, vector<32x384xf32>
    %156 = vector.extract_strided_slice %124 {offsets = [6, 0, 0], sizes = [1, 4, 32], strides = [1, 1, 1]} : vector<9x4x32xf32> to vector<1x4x32xf32>
    %157 = vector.shape_cast %156 : vector<1x4x32xf32> to vector<4x32xf32>
    %cst_106 = arith.constant dense<0.000000e+00> : vector<4x384xf32>
    %158 = tpu.matmul %157, %155, %cst_106 {dimension_numbers = #tpu.dot_dimension_numbers<[1], [0], [0], [1], [0, 0, 1, 1], [], []>} : vector<4x32xf32>, vector<32x384xf32>, vector<4x384xf32> -> vector<4x384xf32>
    %159 = arith.addf %154, %158 : vector<4x384xf32>
    %c0_107 = arith.constant 0 : index
    %c146_108 = arith.constant 146 : index
    %160 = vector.load %arg11[%c0_107, %c146_108] : memref<32x640xf32, #tpu.memory_space<vmem>>, vector<32x384xf32>
    %161 = vector.extract_strided_slice %124 {offsets = [7, 0, 0], sizes = [1, 4, 32], strides = [1, 1, 1]} : vector<9x4x32xf32> to vector<1x4x32xf32>
    %162 = vector.shape_cast %161 : vector<1x4x32xf32> to vector<4x32xf32>
    %cst_109 = arith.constant dense<0.000000e+00> : vector<4x384xf32>
    %163 = tpu.matmul %162, %160, %cst_109 {dimension_numbers = #tpu.dot_dimension_numbers<[1], [0], [0], [1], [0, 0, 1, 1], [], []>} : vector<4x32xf32>, vector<32x384xf32>, vector<4x384xf32> -> vector<4x384xf32>
    %164 = arith.addf %159, %163 : vector<4x384xf32>
    %c0_110 = arith.constant 0 : index
    %c147_111 = arith.constant 147 : index
    %165 = vector.load %arg11[%c0_110, %c147_111] : memref<32x640xf32, #tpu.memory_space<vmem>>, vector<32x384xf32>
    %166 = vector.extract_strided_slice %124 {offsets = [8, 0, 0], sizes = [1, 4, 32], strides = [1, 1, 1]} : vector<9x4x32xf32> to vector<1x4x32xf32>
    %167 = vector.shape_cast %166 : vector<1x4x32xf32> to vector<4x32xf32>
    %cst_112 = arith.constant dense<0.000000e+00> : vector<4x384xf32>
    %168 = tpu.matmul %167, %165, %cst_112 {dimension_numbers = #tpu.dot_dimension_numbers<[1], [0], [0], [1], [0, 0, 1, 1], [], []>} : vector<4x32xf32>, vector<32x384xf32>, vector<4x384xf32> -> vector<4x384xf32>
    %169 = arith.addf %164, %168 : vector<4x384xf32>
    %170 = vector.broadcast %125 : vector<4x1xf32> to vector<4x384xf32>
    %171 = arith.addf %169, %170 : vector<4x384xf32>
    %cst_113 = arith.constant 3.000000e-04 : f32
    %172 = vector.broadcast %cst_113 : f32 to vector<4x384xf32>
    %173 = arith.addf %171, %172 : vector<4x384xf32>
    %c0_114 = arith.constant 0 : index
    %c0_115 = arith.constant 0 : index
    %c0_116 = arith.constant 0 : index
    %174 = vector.load %arg9[%c0_114, %c0_115, %c0_116] : memref<1x4x384xf32, #tpu.memory_space<vmem>>, vector<1x4x384xf32>
    %175 = vector.shape_cast %174 : vector<1x4x384xf32> to vector<4x384xf32>
    %176 = vector.shape_cast %173 : vector<4x384xf32> to vector<1x4x384xf32>
    tpu.vector_store %arg9[%c0_114, %c0_115, %c0_116], %176 {strides = array<i32>} : memref<1x4x384xf32, #tpu.memory_space<vmem>>, vector<1x4x384xf32>,
    return
  }
  func.func @transform_0(%arg0: i32) -> (i32, i32, i32) {
    %c0_i32 = arith.constant 0 : i32
    %c0_i32_0 = arith.constant 0 : i32
    %c0_i32_1 = arith.constant 0 : i32
    return %arg0, %c0_i32, %c0_i32_0 : i32, i32, i32
  }
  func.func @transform_1(%arg0: i32) -> (i32, i32) {
    %c0_i32 = arith.constant 0 : i32
    %c0_i32_0 = arith.constant 0 : i32
    %c0_i32_1 = arith.constant 0 : i32
    return %c0_i32, %c0_i32_0 : i32, i32
  }
  func.func @transform_2(%arg0: i32) -> (i32, i32, i32) {
    %c0_i32 = arith.constant 0 : i32
    %c0_i32_0 = arith.constant 0 : i32
    %c0_i32_1 = arith.constant 0 : i32
    %c0_i32_2 = arith.constant 0 : i32
    return %c0_i32, %c0_i32_0, %c0_i32_1 : i32, i32, i32
  }
  func.func @transform_3(%arg0: i32) -> (i32, i32) {
    %c0_i32 = arith.constant 0 : i32
    %c0_i32_0 = arith.constant 0 : i32
    %c0_i32_1 = arith.constant 0 : i32
    return %c0_i32, %c0_i32_0 : i32, i32
  }
  func.func @transform_4(%arg0: i32) -> (i32, i32, i32) {
    %c0_i32 = arith.constant 0 : i32
    %c0_i32_0 = arith.constant 0 : i32
    %c0_i32_1 = arith.constant 0 : i32
    %c0_i32_2 = arith.constant 0 : i32
    return %c0_i32, %c0_i32_0, %c0_i32_1 : i32, i32, i32
  }
  func.func @transform_5(%arg0: i32) -> (i32, i32) {
    %c0_i32 = arith.constant 0 : i32
    %c0_i32_0 = arith.constant 0 : i32
    %c0_i32_1 = arith.constant 0 : i32
    return %c0_i32, %c0_i32_0 : i32, i32
  }
  func.func @transform_6(%arg0: i32) -> (i32, i32, i32) {
    %c0_i32 = arith.constant 0 : i32
    %c0_i32_0 = arith.constant 0 : i32
    %c0_i32_1 = arith.constant 0 : i32
    %c0_i32_2 = arith.constant 0 : i32
    return %c0_i32, %c0_i32_0, %c0_i32_1 : i32, i32, i32
  }
  func.func @transform_7(%arg0: i32) -> (i32, i32) {
    %c0_i32 = arith.constant 0 : i32
    %c0_i32_0 = arith.constant 0 : i32
    %c0_i32_1 = arith.constant 0 : i32
    return %c0_i32, %c0_i32_0 : i32, i32
  }
  func.func @transform_8(%arg0: i32) -> (i32, i32, i32) {
    %c0_i32 = arith.constant 0 : i32
    %c0_i32_0 = arith.constant 0 : i32
    %c0_i32_1 = arith.constant 0 : i32
    return %arg0, %c0_i32, %c0_i32_0 : i32, i32, i32
  }
}

</mosaic_0001>

<bundles_post_ra>
// kernel: tpu_custom_call.1
= control target key start
LH: loop header
LB: loop body
LE: loop exit
PB: predicated region body
PF: predicated region fallthrough
CT: control target
= control target key end

     0   :  { %13 = vsyncpa [#allocation5], 0  ;;  %s10073_s0 = inlined_call_operand.vmem [shape: f32[2,8,640], index: 0, kind: input, shape index: {}]   ;;  %s10074_s1 = inlined_call_operand.vmem [shape: f32[1,384], index: 1, kind: input, shape index: {}]   ;;  %s10075_s2 = inlined_call_operand.vmem [shape: f32[9,32,8], index: 2, kind: input, shape index: {}]   ;;  %s10076_s3 = inlined_call_operand.vmem [shape: f32[32,1], index: 3, kind: input, shape index: {}]   ;;  %s10077_s4 = inlined_call_operand.vmem [shape: f32[9,32,32], index: 4, kind: input, shape index: {}]   ;;  %s10078_s5 = inlined_call_operand.vmem [shape: f32[32,1], index: 5, kind: input, shape index: {}]   ;;  %s10079_s6 = inlined_call_operand.vmem [shape: f32[9,4,32], index: 6, kind: input, shape index: {}]   ;;  %s10080_s7 = inlined_call_operand.vmem [shape: f32[4,1], index: 7, kind: input, shape index: {}]   ;;  %s10081_s8 = inlined_call_operand.hbm [shape: f32[2,4,384], index: 8, kind: output, shape index: {}]  }
   0x1   :  { %15 = vsyncpa [#allocation5 + $0x1], 0  ;;  %s7592_s27 = smov 0   ;;  %s7594_s28 = smov 0  }
   0x2   :  { %s7596_s29 = smov 0   ;;  %s7598_s30 = smov 0  }
   0x3 LB: > { %s7613_s9 = sadd.s32 4294967295, %s7533_s30   ;;  %s6649_s10 = sadd.s32 4294967294, %s7533_s30   ;;  %s7533_s30 = sphi %s7598_s30, %s10258_s30   ;;  %s7529_s29 = sphi %s7596_s29, %s10257_s29   ;;  %s7525_s28 = sphi %s7594_s28, %s10256_s28   ;;  %s7521_s27 = sphi %s7592_s27, %s10255_s27  }
   0x4   : > { %s7617_s11 = sadd.s32 1, %s7533_s30   ;;  %s201_s12 = sadd.s32 1, %s7529_s29 }
   0x5   : > { %s198_s13 = ssub.s32 %s7533_s30, %s7617_s11  ;;  %p211_p0 = scmp.ne.s32.totalorder %s7529_s29, %s7525_s28 }
   0x6   : > { %p199_p1 = scmp.eq.s32.totalorder %s198_s13, 0  ;;  %p212_p2 = scmp.eq.s32.totalorder %s7613_s9, 1 }
   0x7   : > { %p217_p3 = scmp.ne.s32.totalorder %s7525_s28, %s7521_s27  ;;  %p218_p4 = scmp.eq.s32.totalorder %s6649_s10, 1 }
   0x8   : > { %s7628_s14 = scalar_select %p199_p1, %s7529_s29, %s201_s12  }
   0x9   : > { %p7630_p5 = por %p212_p2, %p211_p0  ;;  %p7634_p6 = por %p218_p4, %p217_p3 }
   0xa   : > { %p6652_p7 = scmp.ge.s32.totalorder %s7533_s30, 1  ;;  %p265_p8 = scmp.lt.s32.totalorder %s7533_s30, 3 }
   0xc   : > { %p266_p9 = pnand %p6652_p7, %p265_p8 }
   0xe   : > { %269 = sbr.rel (%p266_p9) target bundleno = 1563 (0x61b), region = 52 }
  0x13   : > { %p299_p10 = scmp.lt.s32.totalorder %s7613_s9, 1  ;;  %v7644_v0 = vld [vmem:[%s10075_s2 + $0x20] sm:$0xff]  ;;  %vm384_vm0 = vcmask 64512   ;;  %v10088_v1 = vmov 0.0   ;;  %s7536_s24 = smov 18   ;;  %v360_v7 = vld [vmem:[%s10076_s3 + $0x18] sm:$0xff] }
  0x14   : > { %461 = vmatprep.mubr.f32.mxu0 %v10088_v1  ;;  %6983 = vmatprep.mubr.msk.f32.mxu1 %vm384_vm0, %v7644_v0  ;;  %s7537_s25 = smov 19   ;;  %s7538_s26 = smov 17   ;;  %v359_v8 = vld [vmem:[%s10076_s3 + $0x10] sm:$0xff]  ;;  %v7544_v9 = vmov 0   ;;  %v357_v10 = vld [vmem:[%s10076_s3] sm:$0xff]  ;;  %v358_v11 = vld [vmem:[%s10076_s3 + $0x8] sm:$0xff] }
  0x15   : > { %s300_s19 = scalar_select %p299_p10, %s7613_s9, 1  ;;  %7331 = vset.pattern.permute.xlu0 %v7544_v9  ;;  %7332 = vset.pattern.permute.xlu1 %v7544_v9  ;;  %vm377_vm1 = vcmask 146432   ;;  %v326_v18 = vld [vmem:[%s10075_s2 + $0x28] sm:$0xff]  ;;  %v327_v20 = vld [vmem:[%s10075_s2 + $0x30] sm:$0xff]  ;;  %vm579_vm2 = vcmask 154624   ;;  %v328_v24 = vld [vmem:[%s10075_s2 + $0x38] sm:$0xff] }
  0x16   : > { %s7539_s10 = smov 1   ;;  %s10086_s12 = smov 127   ;;  %v321_v29 = vld [vmem:[%s10075_s2] sm:$0xff]  ;;  %vm780_vm3 = vcmask 138240   ;;  %v322_v32 = vld [vmem:[%s10075_s2 + $0x8] sm:$0xff]  ;;  %v323_v37 = vld [vmem:[%s10075_s2 + $0x10] sm:$0xff] }
  0x17   : > { %s7279_s20 = smul.u32 40, %s300_s19  ;;  %s10084_s13 = smov 111   ;;  %vm993_vm4 = vcmask 7168   ;;  %v324_v41 = vld [vmem:[%s10075_s2 + $0x18] sm:$0xff]  ;;  %v329_v43 = vld [vmem:[%s10075_s2 + $0x40] sm:$0xff]  ;;  %v330_v46 = vld [vmem:[%s10075_s2 + $0x48] sm:$0xff] }
  0x18   : > { %s10082_s17 = smov 110   ;;  %s10112_s18 = smov 109   ;;  %v331_v48 = vld [vmem:[%s10075_s2 + $0x50] sm:$0xff]  ;;  %v332_v51 = vld [vmem:[%s10075_s2 + $0x58] sm:$0xff]  ;;  %v333_v52 = vld [vmem:[%s10075_s2 + $0x60] sm:$0xff]  ;;  %vm1412_vm5 = vcmask 1039360  }
  0x19   : > { %s303_s23 = scalar_lea.vmem %s10073_s0, %s7279_s20  ;;  %v334_v56 = vld [vmem:[%s10075_s2 + $0x68] sm:$0xff]  ;;  %v335_v58 = vld [vmem:[%s10075_s2 + $0x70] sm:$0xff]  ;;  %v336_v62 = vld [vmem:[%s10075_s2 + $0x78] sm:$0xff]  ;;  %vm1625_vm6 = vcmask 908288   ;;  %vm1838_vm7 = vcmask 900096   ;;  %vm2051_vm8 = vcmask 891904  }
  0x1a   : > { %v7653_v2 = vld [vmem:[%s303_s23 + $0x8] sm:$0xff]  ;;  %v361_v3 = vld [vmem:[%s303_s23] sm:$0xff]  ;;  %v7658_v4 = vld [vmem:[%s303_s23 + $0x10] sm:$0xff]  ;;  %s10140_s22 = smov 127   ;;  %vm2468_vm9 = vcmask 261120   ;;  %vm7545_vm10 = vmmov 0  }
  0x1b   : > { %371 = vrot.lane.b32.xlu0 %v7653_v2, %s7536_s24  ;;  %369 = vrot.lane.b32.xlu1 %v361_v3, %s7536_s24  ;;  %v7660_v5 = vld [vmem:[%s303_s23 + $0x18] sm:$0xff]  ;;  %v1399_v6 = vld [vmem:[%s303_s23 + $0x20] sm:$0xff]  ;;  %s296_s21 = sand.u32 1, %s7525_s28   ;;  %s7280_s20 = smul.u32 192, %s7613_s9 }
  0x1c   : > { %v337_v63 = vld [vmem:[%s10075_s2 + $0x80] sm:$0xff]  ;;  %v340_v9 = vld [vmem:[%s10075_s2 + $0x98] sm:$0xff]  ;;  %s7278_s23 = smul.u32 12, %s296_s21 }
  0x1e   : > { %s298_s19 = scalar_lea.vmem [#allocation4], %s7278_s23 }
  0x1f   : > { %373 = vrot.lane.b32.xlu0 %v7658_v4, %s7536_s24  ;;  %375 = vrot.lane.b32.xlu1 %v7660_v5, %s7536_s24 }
  0x23   : > { %575 = vrot.lane.b32.xlu0 %v7658_v4, %s7537_s25  ;;  %577 = vrot.lane.b32.xlu1 %v7660_v5, %s7537_s25 }
  0x27   : > { %573 = vrot.lane.b32.xlu0 %v7653_v2, %s7537_s25  ;;  %571 = vrot.lane.b32.xlu1 %v361_v3, %s7537_s25 }
  0x2b   : > { %776 = vrot.lane.b32.xlu1 %v7658_v4, %s7538_s26  ;;  %774 = vrot.lane.b32.xlu0 %v7653_v2, %s7538_s26 }
  0x2f   : > { %778 = vrot.lane.b32.xlu1 %v7660_v5, %s7538_s26  ;;  %772 = vrot.lane.b32.xlu0 %v361_v3, %s7538_s26 }
  0x33   : > { %989 = vrot.lane.b32.xlu0 %v7658_v4, %s7539_s10  ;;  %991 = vrot.lane.b32.xlu1 %v7660_v5, %s7539_s10 }
  0x37   : > { %987 = vrot.lane.b32.xlu0 %v7653_v2, %s7539_s10  ;;  %985 = vrot.lane.b32.xlu1 %v361_v3, %s7539_s10  ;;  %v338_v3 = vld [vmem:[%s10075_s2 + $0x88] sm:$0xff] }
  0x3b   : > { %1410 = vrot.lane.b32.xlu1 %v1399_v6, %s10086_s12  ;;  %1408 = vrot.lane.b32.xlu0 %v7660_v5, %s10086_s12 }
  0x3f   : > { %1404 = vrot.lane.b32.xlu1 %v7653_v2, %s10086_s12  ;;  %1406 = vrot.lane.b32.xlu0 %v7658_v4, %s10086_s12  ;;  %s6590_s12 = sshll.u32 %s298_s19, 4  ;;  %s6591_s12 = int_to_ptr.vmem [resolvable:$true] %s6590_s12 }
  0x43   : > { %1621 = vrot.lane.b32.xlu1 %v7660_v5, %s10084_s13  ;;  %1619 = vrot.lane.b32.xlu0 %v7658_v4, %s10084_s13 }
  0x47   : > { %1623 = vrot.lane.b32.xlu1 %v1399_v6, %s10084_s13  ;;  %1617 = vrot.lane.b32.xlu0 %v7653_v2, %s10084_s13  ;;  %s10152_s13 = smov 111  }
  0x4b   : > { %1836 = vrot.lane.b32.xlu1 %v1399_v6, %s10082_s17  ;;  %1834 = vrot.lane.b32.xlu0 %v7660_v5, %s10082_s17 }
  0x4f   : > { %1830 = vrot.lane.b32.xlu1 %v7653_v2, %s10082_s17  ;;  %1832 = vrot.lane.b32.xlu0 %v7658_v4, %s10082_s17  ;;  %s10154_s17 = smov 110  }
  0x53   : > { %2047 = vrot.lane.b32.xlu1 %v7660_v5, %s10112_s18  ;;  %2045 = vrot.lane.b32.xlu0 %v7658_v4, %s10112_s18 }
  0x57   : > { %2049 = vrot.lane.b32.xlu1 %v1399_v6, %s10112_s18  ;;  %2043 = vrot.lane.b32.xlu0 %v7653_v2, %s10112_s18 }
  0x5b   : > { %2273 = vperm.xlu0 %7331, %v360_v7   ;;  %2268 = vperm.xlu1 %7332, %v359_v8  }
  0x5f   : > { %2258 = vperm.xlu0 %7331, %v357_v10   ;;  %2263 = vperm.xlu1 %7332, %v358_v11   ;;  %v341_v10 = vld [vmem:[%s10075_s2 + $0xa0] sm:$0xff] }
  0x63   : > { %7339 = vrot.lane.b32.xlu0 %v10088_v1, %s7536_s24  ;;  %7334 = vrot.lane.b32.xlu1 %v10088_v1, %s7536_s24 }
  0x67   : > { %7344 = vrot.lane.b32.xlu0 %v10088_v1, %s7537_s25  ;;  %7369 = vrot.lane.b32.xlu1 %v10088_v1, %s7539_s10 }
  0x6b   : > { %7349 = vrot.lane.b32.xlu0 %v10088_v1, %s7538_s26 }
  0x6f   : > { %7354 = vrot.lane.b32.xlu0 %v10088_v1, %s7537_s25 }
  0x73   : > { %7359 = vrot.lane.b32.xlu0 %v10088_v1, %s7538_s26 }
  0x77   : > { %7364 = vrot.lane.b32.xlu0 %v10088_v1, %s7539_s10 }
  0x7b   : > { %7374 = vrot.lane.b32.xlu0 %v10088_v1, %s10140_s22 }
  0x8d   : > { %v372_v12 = vpop.permute.xlu0 %371  ;;  %v370_v13 = vpop.permute.xlu1 %369 }
  0x8e   : > { %v378_v19 = vsel %vm377_vm1, %v370_v13, %v372_v12 }
  0x91   : > { %v374_v14 = vpop.permute.xlu0 %373  ;;  %v376_v15 = vpop.permute.xlu1 %375 }
  0x92   : > { %v379_v16 = vsel %vm377_vm1, %v372_v12, %v374_v14  ;;  %v380_v17 = vsel %vm377_vm1, %v374_v14, %v376_v15  ;;  %v342_v14 = vld [vmem:[%s10075_s2 + $0xa8] sm:$0xff] }
  0x93   : > { %427 = vmatprep.subr.mxu0 %v379_v16  ;;  %6981 = vmatprep.subr.mxu1 %v380_v17  ;;  %v343_v16 = vld [vmem:[%s10075_s2 + $0xb0] sm:$0xff] }
  0x94   : > { %428 = vmatpush1.msra.mxu0 %v378_v19  ;;  %6982 = vmatpush3.msra.mxu1 %v380_v17 }
  0x95   : > { %v576_v21 = vpop.permute.xlu0 %575  ;;  %6654 = vmatmul.mubr.msk.f32.vlgmr.msra.gmra.mxu0 %vm384_vm0, %v7644_v0  ;;  %6984 = vmatmul.mubr.msk.f32.vlgmr.msra.gmra.mxu1 %vm384_vm0, %v326_v18  ;;  %v578_v22 = vpop.permute.xlu1 %577 }
  0x96   : > { %467 = vmatprep.mubr.f32.mxu0 %v10088_v1  ;;  %6986 = vmatprep.mubr.msk.f32.mxu1 %vm384_vm0, %v327_v20  ;;  %v582_v23 = vsel %vm579_vm2, %v576_v21, %v578_v22  ;;  %v346_v22 = vld [vmem:[%s10075_s2 + $0xc8] sm:$0xff] }
  0x97   : > { %6989 = vmatprep.subr.mxu0 %v582_v23 }
  0x98   : > { %6990 = vmatpush3.msra.mxu0 %v582_v23 }
  0x99   : > { %v574_v25 = vpop.permute.xlu0 %573  ;;  %6655 = vmatmul.mubr.msk.f32.gmra.mxu0 %vm384_vm0, %v326_v18  ;;  %6987 = vmatmul.mubr.msk.f32.gmra.mxu1 %vm384_vm0, %v328_v24  ;;  %v572_v26 = vpop.permute.xlu1 %571 }
  0x9a   : > { %v580_v27 = vsel %vm579_vm2, %v572_v26, %v574_v25  ;;  %v581_v28 = vsel %vm579_vm2, %v574_v25, %v576_v21  ;;  %473 = vmatprep.mubr.f32.mxu0 %v10088_v1  ;;  %662 = vmatprep.mubr.f32.mxu1 %v10088_v1  ;;  %v345_v21 = vld [vmem:[%s10075_s2 + $0xc0] sm:$0xff] }
  0x9b   : > { %628 = vmatprep.subr.mxu1 %v581_v28 }
  0x9c   : > { %629 = vmatpush1.msra.mxu1 %v580_v27 }
  0x9d   : > { %6656 = vmatmul.mubr.msk.f32.gmra.mxu0 %vm384_vm0, %v327_v20  ;;  %6662 = vmatmul.mubr.msk.f32.vlgmr.msra.gmra.mxu1 %vm384_vm0, %v321_v29  ;;  %v777_v30 = vpop.permute.xlu1 %776  ;;  %v775_v31 = vpop.permute.xlu0 %774  ;;  %v344_v20 = vld [vmem:[%s10075_s2 + $0xb8] sm:$0xff] }
  0x9e   : > { %479 = vmatprep.mubr.f32.mxu0 %v10088_v1  ;;  %668 = vmatprep.mubr.f32.mxu1 %v10088_v1  ;;  %v782_v33 = vsel %vm780_vm3, %v775_v31, %v777_v30 }
  0x9f   : > { %829 = vmatprep.subr.mxu0 %v782_v33  ;;  %v351_v33 = vld [vmem:[%s10075_s2 + $0xf0] sm:$0xff] }
  0xa1   : > { %6657 = vmatmul.mubr.msk.f32.gmra.mxu0 %vm384_vm0, %v328_v24  ;;  %6663 = vmatmul.mubr.msk.f32.gmra.mxu1 %vm384_vm0, %v322_v32  ;;  %v779_v34 = vpop.permute.xlu1 %778  ;;  %v773_v35 = vpop.permute.xlu0 %772  ;;  %v347_v24 = vld [vmem:[%s10075_s2 + $0xd0] sm:$0xff] }
  0xa2   : > { %v783_v36 = vsel %vm780_vm3, %v777_v30, %v779_v34  ;;  %674 = vmatprep.mubr.f32.mxu1 %v10088_v1  ;;  %6991 = vmatprep.mubr.msk.f32.mxu0 %vm384_vm0, %v321_v29  ;;  %v781_v38 = vsel %vm780_vm3, %v773_v35, %v775_v31  ;;  %v348_v29 = vld [vmem:[%s10075_s2 + $0xd8] sm:$0xff]  ;;  %v349_v30 = vld [vmem:[%s10075_s2 + $0xe0] sm:$0xff]  ;;  %v350_v31 = vld [vmem:[%s10075_s2 + $0xe8] sm:$0xff] }
  0xa3   : > { %6997 = vmatprep.subr.mxu1 %v783_v36  ;;  %v352_v35 = vld [vmem:[%s10075_s2 + $0xf8] sm:$0xff] }
  0xa4   : > { %6998 = vmatpush3.msra.mxu1 %v783_v36  ;;  %v353_v36 = vld [vmem:[%s10075_s2 + $0x100] sm:$0xff] }
  0xa5   : > { %6664 = vmatmul.mubr.msk.f32.gmra.mxu1 %vm384_vm0, %v323_v37  ;;  %6992 = vmatmul.mubr.msk.f32.vlgmr.msra.gmra.mxu0 %vm384_vm0, %v322_v32  ;;  %v990_v39 = vpop.permute.xlu0 %989  ;;  %v992_v40 = vpop.permute.xlu1 %991 }
  0xa6   : > { %830 = vmatpush1.msra.mxu0 %v781_v38  ;;  %680 = vmatprep.mubr.f32.mxu1 %v10088_v1  ;;  %v996_v42 = vsel %vm993_vm4, %v990_v39, %v992_v40  ;;  %v355_v38 = vld [vmem:[%s10075_s2 + $0x110] sm:$0xff] }
  0xa7   : > { %6994 = vmatprep.mubr.msk.f32.mxu0 %vm384_vm0, %v323_v37  ;;  %7005 = vmatprep.subr.mxu0 %v996_v42  ;;  %v354_v37 = vld [vmem:[%s10075_s2 + $0x108] sm:$0xff] }
  0xa9   : > { %6665 = vmatmul.mubr.msk.f32.gmra.mxu1 %vm384_vm0, %v324_v41  ;;  %6995 = vmatmul.mubr.msk.f32.gmra.mxu0 %vm384_vm0, %v324_v41  ;;  %v988_v44 = vpop.permute.xlu0 %987  ;;  %v986_v45 = vpop.permute.xlu1 %985 }
  0xaa   : > { %863 = vmatprep.mubr.f32.mxu0 %v10088_v1  ;;  %6999 = vmatprep.mubr.msk.f32.mxu1 %vm384_vm0, %v329_v43  ;;  %v995_v47 = vsel %vm993_vm4, %v988_v44, %v990_v39  ;;  %v994_v49 = vsel %vm993_vm4, %v986_v45, %v988_v44  ;;  %v356_v39 = vld [vmem:[%s10075_s2 + $0x118] sm:$0xff] }
  0xab   : > { %1042 = vmatprep.subr.mxu1 %v995_v47 }
  0xad   : > { %6670 = vmatmul.mubr.msk.f32.vlgmr.msra.gmra.mxu0 %vm384_vm0, %v329_v43  ;;  %7000 = vmatmul.mubr.msk.f32.vlgmr.msra.gmra.mxu1 %vm384_vm0, %v330_v46  ;;  %v1409_v50 = vpop.permute.xlu0 %1408  ;;  %v1411_v53 = vpop.permute.xlu1 %1410 }
  0xae   : > { %869 = vmatprep.mubr.f32.mxu0 %v10088_v1  ;;  %7002 = vmatprep.mubr.msk.f32.mxu1 %vm384_vm0, %v331_v48  ;;  %v1415_v61 = vsel %vm1412_vm5, %v1409_v50, %v1411_v53 }
  0xaf   : > { %7006 = vmatpush3.msra.mxu0 %v996_v42  ;;  %1043 = vmatpush1.msra.mxu1 %v994_v49 }
  0xb0   : > { %7013 = vmatprep.subr.mxu1 %v7660_v5  ;;  %1240 = vmatprep.subr.mxu0 %v7658_v4 }
  0xb1   : > { %6671 = vmatmul.mubr.msk.f32.gmra.mxu0 %vm384_vm0, %v330_v46  ;;  %7003 = vmatmul.mubr.msk.f32.gmra.mxu1 %vm384_vm0, %v332_v51  ;;  %v1407_v54 = vpop.permute.xlu0 %1406  ;;  %v1405_v57 = vpop.permute.xlu1 %1404 }
  0xb2   : > { %875 = vmatprep.mubr.f32.mxu0 %v10088_v1  ;;  %1076 = vmatprep.mubr.f32.mxu1 %v10088_v1  ;;  %v1414_v55 = vsel %vm1412_vm5, %v1407_v54, %v1409_v50 }
  0xb5   : > { %6672 = vmatmul.mubr.msk.f32.gmra.mxu0 %vm384_vm0, %v331_v48  ;;  %6678 = vmatmul.mubr.msk.f32.vlgmr.msra.gmra.mxu1 %vm384_vm0, %v333_v52  ;;  %v1620_v59 = vpop.permute.xlu0 %1619  ;;  %v1622_v60 = vpop.permute.xlu1 %1621 }
  0xb6   : > { %881 = vmatprep.mubr.f32.mxu0 %v10088_v1  ;;  %1082 = vmatprep.mubr.f32.mxu1 %v10088_v1  ;;  %v1627_v8 = vsel %vm1625_vm6, %v1620_v59, %v1622_v60 }
  0xb7   : > { %7014 = vmatpush3.msra.mxu1 %v7660_v5  ;;  %v1413_v5 = vsel %vm1412_vm5, %v1405_v57, %v1407_v54 }
  0xb8   : > { %1461 = vmatprep.subr.mxu1 %v1414_v55 }
  0xb9   : > { %6673 = vmatmul.mubr.msk.f32.gmra.mxu0 %vm384_vm0, %v332_v51  ;;  %6679 = vmatmul.mubr.msk.f32.gmra.mxu1 %vm384_vm0, %v334_v56  ;;  %v1618_v0 = vpop.permute.xlu0 %1617  ;;  %v1624_v4 = vpop.permute.xlu1 %1623 }
  0xba   : > { %1088 = vmatprep.mubr.f32.mxu1 %v10088_v1  ;;  %7007 = vmatprep.mubr.msk.f32.mxu0 %vm384_vm0, %v333_v52  ;;  %v1628_v7 = vsel %vm1625_vm6, %v1622_v60, %v1624_v4  ;;  %v1626_v17 = vsel %vm1625_vm6, %v1618_v0, %v1620_v59 }
  0xbd   : > { %6680 = vmatmul.mubr.msk.f32.gmra.mxu1 %vm384_vm0, %v335_v58  ;;  %7008 = vmatmul.mubr.msk.f32.vlgmr.msra.gmra.mxu0 %vm384_vm0, %v334_v56  ;;  %v1835_v6 = vpop.permute.xlu0 %1834  ;;  %v1837_v11 = vpop.permute.xlu1 %1836 }
  0xbe   : > { %1094 = vmatprep.mubr.f32.mxu1 %v10088_v1  ;;  %7010 = vmatprep.mubr.msk.f32.mxu0 %vm384_vm0, %v335_v58  ;;  %v1841_v18 = vsel %vm1838_vm7, %v1835_v6, %v1837_v11 }
  0xbf   : > { %1241 = vmatpush1.msra.mxu0 %v7653_v2  ;;  %v339_v2 = vld [vmem:[%s10075_s2 + $0x90] sm:$0xff] }
  0xc0   : > { %7021 = vmatprep.subr.mxu0 %v1415_v61 }
  0xc1   : > { %6681 = vmatmul.mubr.msk.f32.gmra.mxu1 %vm384_vm0, %v336_v62  ;;  %7011 = vmatmul.mubr.msk.f32.gmra.mxu0 %vm384_vm0, %v336_v62  ;;  %v1833_v12 = vpop.permute.xlu0 %1832  ;;  %v1831_v15 = vpop.permute.xlu1 %1830 }
  0xc2   : > { %1274 = vmatprep.mubr.f32.mxu0 %v10088_v1  ;;  %7015 = vmatprep.mubr.msk.f32.mxu1 %vm384_vm0, %v337_v63  ;;  %v1840_v13 = vsel %vm1838_vm7, %v1833_v12, %v1835_v6  ;;  %v1839_v25 = vsel %vm1838_vm7, %v1831_v15, %v1833_v12 }
  0xc5   : > { %6686 = vmatmul.mubr.msk.f32.vlgmr.msra.gmra.mxu0 %vm384_vm0, %v337_v63  ;;  %7016 = vmatmul.mubr.msk.f32.vlgmr.msra.gmra.mxu1 %vm384_vm0, %v338_v3  ;;  %v2048_v19 = vpop.permute.xlu1 %2047  ;;  %v2046_v26 = vpop.permute.xlu0 %2045 }
  0xc6   : > { %1280 = vmatprep.mubr.f32.mxu0 %v10088_v1  ;;  %7018 = vmatprep.mubr.msk.f32.mxu1 %vm384_vm0, %v339_v2  ;;  %v2053_v28 = vsel %vm2051_vm8, %v2046_v26, %v2048_v19 }
  0xc7   : > { %7022 = vmatpush3.msra.mxu0 %v1415_v61  ;;  %1462 = vmatpush1.msra.mxu1 %v1413_v5 }
  0xc8   : > { %7029 = vmatprep.subr.mxu1 %v1628_v7  ;;  %1674 = vmatprep.subr.mxu0 %v1627_v8 }
  0xc9   : > { %6687 = vmatmul.mubr.msk.f32.gmra.mxu0 %vm384_vm0, %v338_v3  ;;  %7019 = vmatmul.mubr.msk.f32.gmra.mxu1 %vm384_vm0, %v340_v9  ;;  %v2050_v23 = vpop.permute.xlu1 %2049  ;;  %v2044_v32 = vpop.permute.xlu0 %2043 }
  0xca   : > { %1286 = vmatprep.mubr.f32.mxu0 %v10088_v1  ;;  %1495 = vmatprep.mubr.f32.mxu1 %v10088_v1  ;;  %v2054_v27 = vsel %vm2051_vm8, %v2048_v19, %v2050_v23  ;;  %v2052_v34 = vsel %vm2051_vm8, %v2044_v32, %v2046_v26 }
  0xcd   : > { %6688 = vmatmul.mubr.msk.f32.gmra.mxu0 %vm384_vm0, %v339_v2  ;;  %6694 = vmatmul.mubr.msk.f32.vlgmr.msra.gmra.mxu1 %vm384_vm0, %v341_v10 }
  0xce   : > { %1292 = vmatprep.mubr.f32.mxu0 %v10088_v1  ;;  %1501 = vmatprep.mubr.f32.mxu1 %v10088_v1 }
  0xcf   : > { %7030 = vmatpush3.msra.mxu1 %v1628_v7 }
  0xd0   : > { %1887 = vmatprep.subr.mxu1 %v1840_v13 }
  0xd1   : > { %6689 = vmatmul.mubr.msk.f32.gmra.mxu0 %vm384_vm0, %v340_v9  ;;  %6695 = vmatmul.mubr.msk.f32.gmra.mxu1 %vm384_vm0, %v342_v14 }
  0xd2   : > { %1507 = vmatprep.mubr.f32.mxu1 %v10088_v1  ;;  %7023 = vmatprep.mubr.msk.f32.mxu0 %vm384_vm0, %v341_v10 }
  0xd5   : > { %6696 = vmatmul.mubr.msk.f32.gmra.mxu1 %vm384_vm0, %v343_v16  ;;  %7024 = vmatmul.mubr.msk.f32.vlgmr.msra.gmra.mxu0 %vm384_vm0, %v342_v14 }
  0xd6   : > { %1675 = vmatpush1.msra.mxu0 %v1626_v17  ;;  %1513 = vmatprep.mubr.f32.mxu1 %v10088_v1 }
  0xd7   : > { %7026 = vmatprep.mubr.msk.f32.mxu0 %vm384_vm0, %v343_v16  ;;  %7037 = vmatprep.subr.mxu0 %v1841_v18 }
  0xd9   : > { %6697 = vmatmul.mubr.msk.f32.gmra.mxu1 %vm384_vm0, %v344_v20  ;;  %7027 = vmatmul.mubr.msk.f32.gmra.mxu0 %vm384_vm0, %v344_v20 }
  0xda   : > { %1708 = vmatprep.mubr.f32.mxu0 %v10088_v1  ;;  %7031 = vmatprep.mubr.msk.f32.mxu1 %vm384_vm0, %v345_v21 }
  0xdd   : > { %6702 = vmatmul.mubr.msk.f32.vlgmr.msra.gmra.mxu0 %vm384_vm0, %v345_v21  ;;  %7032 = vmatmul.mubr.msk.f32.vlgmr.msra.gmra.mxu1 %vm384_vm0, %v346_v22 }
  0xde   : > { %1714 = vmatprep.mubr.f32.mxu0 %v10088_v1  ;;  %7034 = vmatprep.mubr.msk.f32.mxu1 %vm384_vm0, %v347_v24 }
  0xdf   : > { %7038 = vmatpush3.msra.mxu0 %v1841_v18  ;;  %1888 = vmatpush1.msra.mxu1 %v1839_v25 }
  0xe0   : > { %7045 = vmatprep.subr.mxu1 %v2054_v27  ;;  %2100 = vmatprep.subr.mxu0 %v2053_v28 }
  0xe1   : > { %6703 = vmatmul.mubr.msk.f32.gmra.mxu0 %vm384_vm0, %v346_v22  ;;  %7035 = vmatmul.mubr.msk.f32.gmra.mxu1 %vm384_vm0, %v348_v29 }
  0xe2   : > { %1720 = vmatprep.mubr.f32.mxu0 %v10088_v1  ;;  %1921 = vmatprep.mubr.f32.mxu1 %v10088_v1 }
  0xe5   : > { %6704 = vmatmul.mubr.msk.f32.gmra.mxu0 %vm384_vm0, %v347_v24  ;;  %6710 = vmatmul.mubr.msk.f32.vlgmr.msra.gmra.mxu1 %vm384_vm0, %v349_v30 }
  0xe6   : > { %1726 = vmatprep.mubr.f32.mxu0 %v10088_v1  ;;  %1927 = vmatprep.mubr.f32.mxu1 %v10088_v1 }
  0xe7   : > { %7046 = vmatpush3.msra.mxu1 %v2054_v27 }
  0xe9   : > { %6705 = vmatmul.mubr.msk.f32.gmra.mxu0 %vm384_vm0, %v348_v29  ;;  %6711 = vmatmul.mubr.msk.f32.gmra.mxu1 %vm384_vm0, %v350_v31 }
  0xea   : > { %1933 = vmatprep.mubr.f32.mxu1 %v10088_v1  ;;  %7039 = vmatprep.mubr.msk.f32.mxu0 %vm384_vm0, %v349_v30 }
  0xed   : > { %6712 = vmatmul.mubr.msk.f32.gmra.mxu1 %vm384_vm0, %v351_v33  ;;  %7040 = vmatmul.mubr.msk.f32.vlgmr.msra.gmra.mxu0 %vm384_vm0, %v350_v31 }
  0xee   : > { %2101 = vmatpush1.msra.mxu0 %v2052_v34  ;;  %1939 = vmatprep.mubr.f32.mxu1 %v10088_v1 }
  0xef   : > { %7042 = vmatprep.mubr.msk.f32.mxu0 %vm384_vm0, %v351_v33 }
  0xf1   : > { %6713 = vmatmul.mubr.msk.f32.gmra.mxu1 %vm384_vm0, %v352_v35  ;;  %7043 = vmatmul.mubr.msk.f32.gmra.mxu0 %vm384_vm0, %v352_v35 }
  0xf2   : > { %2134 = vmatprep.mubr.f32.mxu0 %v10088_v1  ;;  %7047 = vmatprep.mubr.msk.f32.mxu1 %vm384_vm0, %v353_v36 }
  0xf5   : > { %6718 = vmatmul.mubr.msk.f32.vlgmr.msra.gmra.mxu0 %vm384_vm0, %v353_v36  ;;  %7048 = vmatmul.mubr.msk.f32.vlgmr.msra.gmra.mxu1 %vm384_vm0, %v354_v37 }
  0xf6   : > { %2140 = vmatprep.mubr.f32.mxu0 %v10088_v1  ;;  %7050 = vmatprep.mubr.msk.f32.mxu1 %vm384_vm0, %v355_v38 }
  0xf9   : > { %6719 = vmatmul.mubr.msk.f32.gmra.mxu0 %vm384_vm0, %v354_v37  ;;  %7051 = vmatmul.mubr.msk.f32.gmra.mxu1 %vm384_vm0, %v356_v39 }
  0xfa   : > { %2146 = vmatprep.mubr.f32.mxu0 %v10088_v1  ;;  %2545 = vmatprep.mubr.f32.mxu1 %v10088_v1 }
  0xfd   : > { %6720 = vmatmul.mubr.msk.f32.gmra.mxu0 %vm384_vm0, %v355_v38 }
  0xfe   : > { %2152 = vmatprep.mubr.f32.mxu0 %v10088_v1 }
 0x101   : > { %6721 = vmatmul.mubr.msk.f32.gmra.mxu0 %vm384_vm0, %v356_v39 }
 0x155   : > { %v463_v40 = vpop.f32.mrf.mxu0  ;;  %v6985_v41 = vpop.f32.mrf.mxu1 }
 0x157   : > { %v7986_v42 = vpop.f32.mrf.mxu0  ;;  %v7988_v43 = vpop.f32.mrf.mxu1 }
 0x159   : > { %v469_v44 = vpop.f32.mrf.mxu0  ;;  %v6988_v45 = vpop.f32.mrf.mxu1 }
 0x15b   : > { %v471_v46 = vpop.f32.mrf.mxu0  ;;  %v562_v47 = vpop.f32.mrf.mxu1 }
 0x15d   : > { %v475_v48 = vpop.f32.mrf.mxu0  ;;  %v664_v49 = vpop.f32.mrf.mxu1 }
 0x15e   : > { %v7990_v50 = vadd.f32 %v664_v49, %v463_v40 }
 0x15f   : > { %v477_v51 = vpop.f32.mrf.mxu0  ;;  %v7992_v52 = vpop.f32.mrf.mxu1 }
 0x161   : > { %v481_v53 = vpop.f32.mrf.mxu0  ;;  %v670_v54 = vpop.f32.mrf.mxu1 }
 0x162   : > { %v671_v55 = vadd.f32 %v670_v54, %v469_v44 }
 0x163   : > { %v483_v56 = vpop.f32.mrf.mxu0  ;;  %v672_v57 = vpop.f32.mrf.mxu1 }
 0x164   : > { %v673_v22 = vadd.f32 %v672_v57, %v471_v46 }
 0x165   : > { %v676_v58 = vpop.f32.mrf.mxu1  ;;  %v6993_v59 = vpop.f32.mrf.mxu0 }
 0x166   : > { %v677_v60 = vadd.f32 %v676_v58, %v475_v48  ;;  %v7994_v61 = vadd.f32 %v6993_v59, %v6985_v41 }
 0x167   : > { %v678_v62 = vpop.f32.mrf.mxu1  ;;  %v7996_v63 = vpop.f32.mrf.mxu0 }
 0x168   : > { %v679_v30 = vadd.f32 %v678_v62, %v477_v51 }
 0x169   : > { %v682_v0 = vpop.f32.mrf.mxu1  ;;  %v6996_v3 = vpop.f32.mrf.mxu0 }
 0x16a   : > { %v683_v4 = vadd.f32 %v682_v0, %v481_v53  ;;  %v769_v2 = vadd.f32 %v6996_v3, %v6988_v45 }
 0x16b   : > { %v684_v5 = vpop.f32.mrf.mxu1  ;;  %v763_v6 = vpop.f32.mrf.mxu0 }
 0x16c   : > { %v685_v38 = vadd.f32 %v684_v5, %v483_v56  ;;  %v764_v39 = vadd.f32 %v763_v6, %v562_v47 }
 0x16d   : > { %v7998_v7 = vpop.f32.mrf.mxu0  ;;  %v8000_v8 = vpop.f32.mrf.mxu1 }
 0x16f   : > { %v8002_v9 = vpop.f32.mrf.mxu0  ;;  %v8004_v10 = vpop.f32.mrf.mxu1 }
 0x171   : > { %v871_v11 = vpop.f32.mrf.mxu0  ;;  %v7004_v12 = vpop.f32.mrf.mxu1 }
 0x172   : > { %v976_v13 = vadd.f32 %v871_v11, %v671_v55  ;;  %v984_v14 = vadd.f32 %v7004_v12, %v769_v2 }
 0x173   : > { %v873_v15 = vpop.f32.mrf.mxu0  ;;  %v964_v16 = vpop.f32.mrf.mxu1 }
 0x174   : > { %v977_v25 = vadd.f32 %v873_v15, %v673_v22  ;;  %v981_v45 = vadd.f32 %v964_v16, %v764_v39 }
 0x175   : > { %v877_v17 = vpop.f32.mrf.mxu0  ;;  %v8006_v18 = vpop.f32.mrf.mxu1 }
 0x176   : > { %v979_v19 = vadd.f32 %v877_v17, %v677_v60 }
 0x177   : > { %v879_v20 = vpop.f32.mrf.mxu0  ;;  %v8008_v21 = vpop.f32.mrf.mxu1 }
 0x178   : > { %v980_v34 = vadd.f32 %v879_v20, %v679_v30 }
 0x179   : > { %v883_v23 = vpop.f32.mrf.mxu0  ;;  %v1084_v24 = vpop.f32.mrf.mxu1 }
 0x17a   : > { %v982_v26 = vadd.f32 %v883_v23, %v683_v4  ;;  %v1189_v27 = vadd.f32 %v1084_v24, %v976_v13 }
 0x17b   : > { %v885_v28 = vpop.f32.mrf.mxu0  ;;  %v1086_v29 = vpop.f32.mrf.mxu1 }
 0x17c   : > { %v1190_v31 = vadd.f32 %v1086_v29, %v977_v25  ;;  %v983_v46 = vadd.f32 %v885_v28, %v685_v38 }
 0x17d   : > { %v1090_v32 = vpop.f32.mrf.mxu1  ;;  %v8010_v33 = vpop.f32.mrf.mxu0 }
 0x17e   : > { %v1192_v35 = vadd.f32 %v1090_v32, %v979_v19 }
 0x17f   : > { %v1092_v36 = vpop.f32.mrf.mxu1  ;;  %v8012_v37 = vpop.f32.mrf.mxu0 }
 0x180   : > { %v1193_v40 = vadd.f32 %v1092_v36, %v980_v34 }
 0x181   : > { %v1096_v41 = vpop.f32.mrf.mxu1  ;;  %v7012_v44 = vpop.f32.mrf.mxu0 }
 0x182   : > { %v1195_v48 = vadd.f32 %v1096_v41, %v982_v26  ;;  %v1197_v49 = vadd.f32 %v7012_v44, %v984_v14 }
 0x183   : > { %v1098_v53 = vpop.f32.mrf.mxu1  ;;  %v1177_v51 = vpop.f32.mrf.mxu0 }
 0x184   : > { %v1196_v54 = vadd.f32 %v1098_v53, %v983_v46  ;;  %v1194_v55 = vadd.f32 %v1177_v51, %v981_v45 }
 0x185   : > { %v8014_v57 = vpop.f32.mrf.mxu0  ;;  %v8016_v58 = vpop.f32.mrf.mxu1 }
 0x187   : > { %v8018_v59 = vpop.f32.mrf.mxu0  ;;  %v8020_v60 = vpop.f32.mrf.mxu1 }
 0x189   : > { %v1282_v47 = vpop.f32.mrf.mxu0  ;;  %v7020_v56 = vpop.f32.mrf.mxu1 }
 0x18a   : > { %v8022_v62 = vadd.f32 %v1282_v47, %v1189_v27  ;;  %v8024_v0 = vadd.f32 %v7020_v56, %v1197_v49 }
 0x18b   : > { %v1284_v3 = vpop.f32.mrf.mxu0  ;;  %v1375_v4 = vpop.f32.mrf.mxu1 }
 0x18c   : > { %v1388_v2 = vadd.f32 %v1284_v3, %v1190_v31  ;;  %v1392_v5 = vadd.f32 %v1375_v4, %v1194_v55 }
 0x18d   : > { %v1288_v6 = vpop.f32.mrf.mxu0  ;;  %v1497_v11 = vpop.f32.mrf.mxu1 }
 0x18e   : > { %v1390_v12 = vadd.f32 %v1288_v6, %v1192_v35  ;;  %v978_v6 = vadd.f32 %v8000_v8, %v7994_v61  ;;  %v8066_v8 = vpop.permute.xlu1 %2268 }
 0x18f   : > { %v1290_v13 = vpop.f32.mrf.mxu0  ;;  %v8026_v14 = vpop.f32.mrf.mxu1 }
 0x190   : > { %v1391_v15 = vadd.f32 %v1290_v13, %v1193_v40 }
 0x191   : > { %v1294_v16 = vpop.f32.mrf.mxu0  ;;  %v8028_v17 = vpop.f32.mrf.mxu1 }
 0x192   : > { %v1393_v19 = vadd.f32 %v1294_v16, %v1195_v48  ;;  %v2301_v16 = vlaneseq }
 0x193   : > { %v1296_v20 = vpop.f32.mrf.mxu0  ;;  %v1505_v22 = vpop.f32.mrf.mxu1 }
 0x194   : > { %v1394_v23 = vadd.f32 %v1296_v20, %v1196_v54  ;;  %v8030_v24 = vadd.f32 %v1505_v22, %v1388_v2  ;;  %v1191_v20 = vadd.f32 %v8010_v33, %v978_v6 }
 0x195   : > { %v1509_v25 = vpop.f32.mrf.mxu1  ;;  %v7025_v26 = vpop.f32.mrf.mxu0 }
 0x196   : > { %v1611_v27 = vadd.f32 %v1509_v25, %v1390_v12 }
 0x197   : > { %v1511_v28 = vpop.f32.mrf.mxu1  ;;  %v8032_v29 = vpop.f32.mrf.mxu0 }
 0x198   : > { %v1612_v30 = vadd.f32 %v1511_v28, %v1391_v15 }
 0x199   : > { %v1515_v31 = vpop.f32.mrf.mxu1  ;;  %v8034_v32 = vpop.f32.mrf.mxu0 }
 0x19a   : > { %v1614_v34 = vadd.f32 %v1515_v31, %v1393_v19  ;;  %v2302_v31 = vshrl.u32 %v2301_v16, 7 }
 0x19b   : > { %v1517_v35 = vpop.f32.mrf.mxu1  ;;  %v1596_v36 = vpop.f32.mrf.mxu0 }
 0x19c   : > { %v1615_v38 = vadd.f32 %v1517_v35, %v1394_v23  ;;  %v8036_v39 = vadd.f32 %v1596_v36, %v1392_v5  ;;  %v973_v5 = vadd.f32 %v7998_v7, %v7990_v50  ;;  %v1389_v7 = vadd.f32 %v8016_v58, %v1191_v20  ;;  %v8069_v35 = vpop.permute.xlu0 %2273 }
 0x19d   : > { %v1710_v40 = vpop.f32.mrf.mxu0  ;;  %v7033_v41 = vpop.f32.mrf.mxu1 }
 0x19e   : > { %v1186_v19 = vadd.f32 %v8006_v18, %v973_v5 }
 0x19f   : > { %v8038_v44 = vpop.f32.mrf.mxu0  ;;  %v8040_v45 = vpop.f32.mrf.mxu1 }
 0x1a0   : > { %v1384_v50 = vadd.f32 %v8014_v57, %v1186_v19  ;;  %v2259_v19 = vpop.permute.xlu0 %2258 }
 0x1a1   : > { %v8042_v46 = vpop.f32.mrf.mxu0  ;;  %v8044_v48 = vpop.f32.mrf.mxu1 }
 0x1a2   : > { %v1605_v33 = vadd.f32 %v1497_v11, %v1384_v50 }
 0x1a3   : > { %v8046_v49 = vpop.f32.mrf.mxu0  ;;  %v8048_v53 = vpop.f32.mrf.mxu1 }
 0x1a5   : > { %v1722_v51 = vpop.f32.mrf.mxu0  ;;  %v1923_v54 = vpop.f32.mrf.mxu1 }
 0x1a6   : > { %v1824_v55 = vadd.f32 %v1722_v51, %v1611_v27  ;;  %v667_v27 = vadd.f32 %v7992_v52, %v7986_v42  ;;  %v754_v42 = vadd.f32 %v7996_v63, %v7988_v43  ;;  %v320_v63 = vld [vmem:[%s10074_s1] sm:$0x7] }
 0x1a7   : > { %v1724_v47 = vpop.f32.mrf.mxu0  ;;  %v1925_v56 = vpop.f32.mrf.mxu1 }
 0x1a8   : > { %v1825_v3 = vadd.f32 %v1724_v47, %v1612_v30  ;;  %v974_v18 = vadd.f32 %v8002_v9, %v667_v27  ;;  %v975_v47 = vadd.f32 %v8004_v10, %v754_v42 }
 0x1a9   : > { %v1728_v4 = vpop.f32.mrf.mxu0  ;;  %v8050_v2 = vpop.f32.mrf.mxu1 }
 0x1aa   : > { %v1827_v12 = vadd.f32 %v1728_v4, %v1614_v34  ;;  %v1610_v34 = vadd.f32 %v7025_v26, %v1389_v7  ;;  %v1187_v58 = vadd.f32 %v8008_v21, %v974_v18  ;;  %v2303_v26 = vsub.s32 0, %v2302_v31  ;;  %v8087_v21 = vpop.permute.xlu1 %2263 }
 0x1ab   : > { %v1730_v13 = vpop.f32.mrf.mxu0  ;;  %v8056_v15 = vpop.f32.mrf.mxu1  ;;  %v2311_v4 = vsub.s32 2, %v2302_v31  ;;  %v1188_v10 = vadd.f32 %v8012_v37, %v975_v47 }
 0x1ac   : > { %v1828_v22 = vadd.f32 %v1730_v13, %v1615_v38  ;;  %v1818_v38 = vadd.f32 %v1710_v40, %v1605_v33  ;;  %v1823_v51 = vadd.f32 %v7033_v41, %v1610_v34 }
 0x1ad   : > { %v1935_v23 = vpop.f32.mrf.mxu1  ;;  %v7041_v25 = vpop.f32.mrf.mxu0  ;;  %v1386_v20 = vadd.f32 %v8020_v60, %v1188_v10 }
 0x1ae   : > { %v8064_v61 = vadd.f32 %v1935_v23, %v1824_v55  ;;  %v2031_v5 = vadd.f32 %v1923_v54, %v1818_v38  ;;  %v2036_v6 = vadd.f32 %v7041_v25, %v1823_v51  ;;  %v8093_v54 = vrot.slane %v320_v63, %v2311_v4 }
 0x1af   : > { %v1937_v28 = vpop.f32.mrf.mxu1  ;;  %v2012_v30 = vpop.f32.mrf.mxu0  ;;  %v1607_v50 = vadd.f32 %v8032_v29, %v1386_v20 }
 0x1b0   : > { %v8071_v36 = vadd.f32 %v1937_v28, %v1825_v3  ;;  %v1385_v3 = vadd.f32 %v8018_v59, %v1187_v58  ;;  %v8091_v59 = vrot.slane %v320_v63, %v2303_v26  ;;  %10142 = vst [vmem:[#allocation8_spill] sm:$0xff] %v8093_v54 }
 0x1b1   : > { %v1941_v52 = vpop.f32.mrf.mxu1  ;;  %v7044_v57 = vpop.f32.mrf.mxu0  ;;  %v1820_v28 = vadd.f32 %v8040_v45, %v1607_v50 }
 0x1b2   : > { %v8076_v55 = vadd.f32 %v1941_v52, %v1827_v12  ;;  %v1606_v12 = vadd.f32 %v8026_v14, %v1385_v3  ;;  %10141 = vst [vmem:[#allocation7_spill] sm:$0xff] %v8091_v59 }
 0x1b3   : > { %v1943_v9 = vpop.f32.mrf.mxu1  ;;  %v8079_v11 = vpop.f32.mrf.mxu0 }
 0x1b4   : > { %v8082_v43 = vadd.f32 %v1943_v9, %v1828_v22  ;;  %v1819_v22 = vadd.f32 %v8038_v44, %v1606_v12  ;;  %v2033_v44 = vadd.f32 %v2012_v30, %v1820_v28  ;;  %v1616_v30 = vadd.f32 %v8034_v32, %v8024_v0 }
 0x1b5   : > { %v2136_v40 = vpop.f32.mrf.mxu0  ;;  %v7049_v41 = vpop.f32.mrf.mxu1  ;;  %v1608_v9 = vadd.f32 %v8028_v17, %v8022_v62 }
 0x1b6   : > { %v2244_v13 = vadd.f32 %v2136_v40, %v2031_v5  ;;  %v2249_v16 = vadd.f32 %v7049_v41, %v2036_v6  ;;  %v2032_v37 = vadd.f32 %v1925_v56, %v1819_v22  ;;  %v2307_v56 = vsub.s32 1, %v2302_v31 }
 0x1b7   : > { %v2138_v27 = vpop.f32.mrf.mxu0  ;;  %v2225_v60 = vpop.f32.mrf.mxu1  ;;  %v1829_v31 = vadd.f32 %v8044_v48, %v1616_v30  ;;  %v1821_v0 = vadd.f32 %v8042_v46, %v1608_v9  ;;  %v1826_v41 = vadd.f32 %v8048_v53, %v8036_v39  ;;  %v8276_v30 = vld [vmem:[%s10077_s4 + $0x20] sm:$0xff] }
 0x1b8   : > { %v2276_v23 = vadd.f32 %v2259_v19, %v2244_v13  ;;  %v2281_v25 = vadd.f32 %v8087_v21, %v2249_v16  ;;  %v2245_v33 = vadd.f32 %v2138_v27, %v2032_v37  ;;  %v2246_v42 = vadd.f32 %v2225_v60, %v2033_v44  ;;  %7061 = vmatprep.mubr.msk.f32.mxu0 %vm2468_vm9, %v8276_v30 }
 0x1b9   : > { %v8114_v52 = vrot.slane %v320_v63, %v2307_v56  ;;  %v7052_v47 = vpop.f32.mrf.mxu1  ;;  %v2042_v26 = vadd.f32 %v7044_v57, %v1829_v31  ;;  %v2142_v4 = vpop.f32.mrf.mxu0  ;;  %v2034_v3 = vadd.f32 %v8050_v2, %v1821_v0  ;;  %v1822_v2 = vadd.f32 %v8046_v49, %v8030_v24 }
 0x1ba   : > { %v2288_v7 = vmax.f32 %v2276_v23, 0.0  ;;  %v2293_v14 = vmax.f32 %v2281_v25, 0.0  ;;  %v2277_v29 = vadd.f32 %v2259_v19, %v2245_v33  ;;  %v2278_v58 = vadd.f32 %v2259_v19, %v2246_v42 }
 0x1bb   : > { %10145 = vst [vmem:[#allocation11_spill] sm:$0xff] %v8114_v52  ;;  %v2255_v48 = vadd.f32 %v7052_v47, %v2042_v26  ;;  %v2247_v62 = vadd.f32 %v2142_v4, %v2034_v3  ;;  %v2144_v63 = vpop.f32.mrf.mxu0  ;;  %v2035_v40 = vadd.f32 %v8056_v15, %v1822_v2  ;;  %v2235_v49 = vpop.f32.mrf.mxu1  ;;  %v2039_v12 = vadd.f32 %v8079_v11, %v1826_v41 }
 0x1bc   : > { %v8101_v18 = vmul.f32 %v8091_v59, %v2288_v7  ;;  %v8104_v34 = vmul.f32 %v8093_v54, %v2293_v14  ;;  %v2289_v45 = vmax.f32 %v2277_v29, 0.0  ;;  %v2290_v51 = vmax.f32 %v2278_v58, 0.0 }
 0x1bd   : > { %v2287_v17 = vadd.f32 %v8069_v35, %v2255_v48  ;;  %v2279_v46 = vadd.f32 %v8087_v21, %v2247_v62  ;;  %v2248_v24 = vadd.f32 %v2144_v63, %v2035_v40  ;;  %v2252_v13 = vadd.f32 %v2235_v49, %v2039_v12  ;;  %v2148_v19 = vpop.f32.mrf.mxu0 }
 0x1be   : > { %10143 = vst [vmem:[#allocation9_spill] sm:$0xff] %v8101_v18  ;;  %10144 = vst [vmem:[#allocation10_spill] sm:$0xff] %v8104_v34  ;;  %2414 = vrot.lane.b32.xlu1 %v8101_v18, %s7536_s24  ;;  %2669 = vrot.lane.b32.xlu0 %v8104_v34, %s7537_s25  ;;  %v8124_v38 = vmul.f32 %v8114_v52, %v2289_v45  ;;  %v8134_v32 = vmul.f32 %v8093_v54, %v2290_v51  ;;  %v8286_v51 = vpop.permute.xlu1 %7334 }
 0x1bf   : > { %v2299_v57 = vmax.f32 %v2287_v17, 0.0  ;;  %v2291_v5 = vmax.f32 %v2279_v46, 0.0  ;;  %v2280_v15 = vadd.f32 %v8087_v21, %v2248_v24  ;;  %v2284_v53 = vadd.f32 %v8066_v8, %v2252_v13  ;;  %v2150_v23 = vpop.f32.mrf.mxu0 }
 0x1c0   : > { %10146 = vst [vmem:[#allocation12_spill] sm:$0xff] %v8124_v38  ;;  %v2250_v20 = vadd.f32 %v2148_v19, %v8064_v61  ;;  %v2251_v27 = vadd.f32 %v2150_v23, %v8071_v36 }
 0x1c1   : > { %v8154_v6 = vmul.f32 %v8093_v54, %v2299_v57  ;;  %v8164_v10 = vmul.f32 %v8091_v59, %v2291_v5  ;;  %v2292_v39 = vmax.f32 %v2280_v15, 0.0  ;;  %v2296_v21 = vmax.f32 %v2284_v53, 0.0  ;;  %v2154_v37 = vpop.f32.mrf.mxu0 }
 0x1c2   : > { %3165 = vrot.lane.b32.xlu0 %v8104_v34, %s7539_s10  ;;  %2426 = vrot.lane.b32.xlu1 %v8104_v34, %s7536_s24  ;;  %v2282_v22 = vadd.f32 %v8066_v8, %v2250_v20  ;;  %v2283_v50 = vadd.f32 %v8066_v8, %v2251_v27  ;;  %v2253_v36 = vadd.f32 %v2154_v37, %v8076_v55  ;;  %v8232_v55 = vpop.permute.xlu0 %7339  ;;  %v8298_v9 = vpop.permute.xlu1 %7369 }
 0x1c3   : > { %v8182_v11 = vmul.f32 %v8114_v52, %v2292_v39  ;;  %v8189_v16 = vmul.f32 %v8093_v54, %v2296_v21  ;;  %v2156_v14 = vpop.f32.mrf.mxu0  ;;  %v10157_v54 = vmov 0.0  }
 0x1c4   : > { %v2294_v25 = vmax.f32 %v2282_v22, 0.0  ;;  %v2295_v7 = vmax.f32 %v2283_v50, 0.0  ;;  %v2285_v8 = vadd.f32 %v8069_v35, %v2253_v36  ;;  %v2254_v33 = vadd.f32 %v2156_v14, %v8082_v43 }
 0x1c5   : > { %10147 = vst [vmem:[#allocation13_spill] sm:$0xff] %v8182_v11  ;;  %10148 = vst [vmem:[#allocation14_spill] sm:$0xff] %v8189_v16 }
 0x1c6   : > { %3153 = vrot.lane.b32.xlu0 %v8101_v18, %s7539_s10  ;;  %2657 = vrot.lane.b32.xlu1 %v8101_v18, %s7537_s25  ;;  %v8211_v61 = vmul.f32 %v8091_v59, %v2294_v25  ;;  %v8224_v28 = vmul.f32 %v8114_v52, %v2295_v7  ;;  %v2297_v60 = vmax.f32 %v2285_v8, 0.0  ;;  %v2286_v44 = vadd.f32 %v8069_v35, %v2254_v33  ;;  %v8242_v56 = vpop.permute.xlu0 %7344 }
 0x1c8   : > { %10149 = vst [vmem:[#allocation15_spill] sm:$0xff] %v8211_v61  ;;  %10150 = vst [vmem:[#allocation16_spill] sm:$0xff] %v8224_v28  ;;  %v8240_v29 = vmul.f32 %v8091_v59, %v2297_v60  ;;  %v2298_v43 = vmax.f32 %v2286_v44, 0.0 }
 0x1ca   : > { %2416 = vrot.lane.b32.xlu0 %v8124_v38, %s7536_s24  ;;  %2899 = vrot.lane.b32.xlu1 %v8101_v18, %s7538_s26  ;;  %10151 = vst [vmem:[#allocation17_spill] sm:$0xff] %v8240_v29  ;;  %v8249_v35 = vmul.f32 %v8114_v52, %v2298_v43  ;;  %v8255_v42 = vpop.permute.xlu0 %7349 }
 0x1ce   : > { %2418 = vrot.lane.b32.xlu0 %v8134_v32, %s7536_s24  ;;  %2911 = vrot.lane.b32.xlu1 %v8104_v34, %s7538_s26  ;;  %v8261_v45 = vpop.permute.xlu0 %7354 }
 0x1d2   : > { %2661 = vrot.lane.b32.xlu0 %v8134_v32, %s7537_s25  ;;  %2659 = vrot.lane.b32.xlu1 %v8124_v38, %s7537_s25  ;;  %v8271_v58 = vpop.permute.xlu0 %7359 }
 0x1d6   : > { %2901 = vrot.lane.b32.xlu0 %v8124_v38, %s7538_s26  ;;  %3155 = vrot.lane.b32.xlu1 %v8124_v38, %s7539_s10  ;;  %v8284_v31 = vpop.permute.xlu0 %7364 }
 0x1da   : > { %2903 = vrot.lane.b32.xlu0 %v8134_v32, %s7538_s26  ;;  %2442 = vrot.lane.b32.xlu1 %v8154_v6, %s7536_s24  ;;  %v8296_v47 = vpop.permute.xlu0 %7374 }
 0x1db   : > { %10153 = vst [vmem:[#allocation18_spill] sm:$0xff] %v8296_v47 }
 0x1de   : > { %3157 = vrot.lane.b32.xlu0 %v8134_v32, %s7539_s10  ;;  %2665 = vrot.lane.b32.xlu1 %v8164_v10, %s7537_s25 }
 0x1e2   : > { %2927 = vrot.lane.b32.xlu1 %v8154_v6, %s7538_s26  ;;  %2422 = vrot.lane.b32.xlu0 %v8164_v10, %s7536_s24 }
 0x1e6   : > { %3663 = vrot.lane.b32.xlu1 %v8154_v6, %s10140_s22  ;;  %2685 = vrot.lane.b32.xlu0 %v8154_v6, %s7537_s25 }
 0x1ea   : > { %2424 = vrot.lane.b32.xlu1 %v8182_v11, %s7536_s24  ;;  %2907 = vrot.lane.b32.xlu0 %v8164_v10, %s7538_s26 }
 0x1ee   : > { %2677 = vrot.lane.b32.xlu1 %v8189_v16, %s7537_s25  ;;  %3181 = vrot.lane.b32.xlu0 %v8154_v6, %s7539_s10 }
 0x1f2   : > { %2667 = vrot.lane.b32.xlu1 %v8182_v11, %s7537_s25  ;;  %3161 = vrot.lane.b32.xlu0 %v8164_v10, %s7539_s10 }
 0x1f6   : > { %2909 = vrot.lane.b32.xlu1 %v8182_v11, %s7538_s26  ;;  %2434 = vrot.lane.b32.xlu0 %v8189_v16, %s7536_s24 }
 0x1fa   : > { %3173 = vrot.lane.b32.xlu1 %v8189_v16, %s7539_s10  ;;  %2919 = vrot.lane.b32.xlu0 %v8189_v16, %s7538_s26 }
 0x1fe   : > { %3163 = vrot.lane.b32.xlu1 %v8182_v11, %s7539_s10  ;;  %2430 = vrot.lane.b32.xlu0 %v8211_v61, %s7536_s24 }
 0x202   : > { %3655 = vrot.lane.b32.xlu1 %v8189_v16, %s10140_s22  ;;  %2915 = vrot.lane.b32.xlu0 %v8211_v61, %s7538_s26 }
 0x206   : > { %2673 = vrot.lane.b32.xlu1 %v8211_v61, %s7537_s25  ;;  %2675 = vrot.lane.b32.xlu0 %v8224_v28, %s7537_s25 }
 0x20a   : > { %3169 = vrot.lane.b32.xlu1 %v8211_v61, %s7539_s10  ;;  %3171 = vrot.lane.b32.xlu0 %v8224_v28, %s7539_s10 }
 0x20e   : > { %2432 = vrot.lane.b32.xlu1 %v8224_v28, %s7536_s24  ;;  %2923 = vrot.lane.b32.xlu0 %v8240_v29, %s7538_s26 }
 0x212   : > { %2917 = vrot.lane.b32.xlu1 %v8224_v28, %s7538_s26  ;;  %2440 = vrot.lane.b32.xlu0 %v8249_v35, %s7536_s24 }
 0x216   : > { %2438 = vrot.lane.b32.xlu1 %v8240_v29, %s7536_s24  ;;  %3647 = vrot.lane.b32.xlu0 %v8104_v34, %s10140_s22 }
 0x21a   : > { %2681 = vrot.lane.b32.xlu1 %v8240_v29, %s7537_s25  ;;  %3639 = vrot.lane.b32.xlu0 %v8134_v32, %s10140_s22 }
 0x21e   : > { %3177 = vrot.lane.b32.xlu1 %v8240_v29, %s7539_s10  ;;  %3659 = vrot.lane.b32.xlu0 %v8240_v29, %s10140_s22 }
 0x222   : > { %7379 = vrot.lane.b32.xlu1 %v10088_v1, %s10140_s22  ;;  %3651 = vrot.lane.b32.xlu0 %v8211_v61, %s10140_s22 }
 0x226   : > { %3653 = vrot.lane.b32.xlu1 %v8224_v28, %s10140_s22  ;;  %3645 = vrot.lane.b32.xlu0 %v8182_v11, %s10140_s22 }
 0x22a   : > { %3917 = vrot.lane.b32.xlu1 %v8154_v6, %s10152_s13  ;;  %3909 = vrot.lane.b32.xlu0 %v8189_v16, %s10152_s13 }
 0x22e   : > { %3913 = vrot.lane.b32.xlu1 %v8240_v29, %s10152_s13  ;;  %3905 = vrot.lane.b32.xlu0 %v8211_v61, %s10152_s13 }
 0x230   : > { %v8304_v26 = vpop.permute.xlu0 %2669  ;;  %v8306_v0 = vpop.permute.xlu1 %2414 }
 0x232   : > { %3907 = vrot.lane.b32.xlu1 %v8224_v28, %s10152_s13  ;;  %3899 = vrot.lane.b32.xlu0 %v8182_v11, %s10152_s13 }
 0x234   : > { %v8312_v48 = vpop.permute.xlu0 %3165  ;;  %v8314_v4 = vpop.permute.xlu1 %2426 }
 0x236   : > { %2683 = vrot.lane.b32.xlu1 %v8249_v35, %s7537_s25  ;;  %3635 = vrot.lane.b32.xlu0 %v8101_v18, %s10140_s22 }
 0x238   : > { %v8320_v3 = vpop.permute.xlu0 %3153  ;;  %v8322_v62 = vpop.permute.xlu1 %2657 }
 0x23a   : > { %3643 = vrot.lane.b32.xlu1 %v8164_v10, %s10140_s22  ;;  %3891 = vrot.lane.b32.xlu0 %v8124_v38, %s10152_s13 }
 0x23c   : > { %v8328_v17 = vpop.permute.xlu0 %2416  ;;  %v8330_v46 = vpop.permute.xlu1 %2899 }
 0x23e   : > { %2925 = vrot.lane.b32.xlu1 %v8249_v35, %s7538_s26  ;;  %3889 = vrot.lane.b32.xlu0 %v8101_v18, %s10152_s13 }
 0x240   : > { %v8336_v57 = vpop.permute.xlu0 %2418  ;;  %v8338_v2 = vpop.permute.xlu1 %2911 }
 0x242   : > { %3637 = vrot.lane.b32.xlu1 %v8124_v38, %s10140_s22  ;;  %4171 = vrot.lane.b32.xlu0 %v8154_v6, %s10154_s17 }
 0x244   : > { %v8344_v5 = vpop.permute.xlu0 %2661  ;;  %v8346_v63 = vpop.permute.xlu1 %2659 }
 0x246   : > { %3901 = vrot.lane.b32.xlu1 %v8104_v34, %s10152_s13  ;;  %7394 = vrot.lane.b32.xlu0 %v10088_v1, %s10152_s13 }
 0x248   : > { %v8352_v40 = vpop.permute.xlu0 %2901  ;;  %v8354_v41 = vpop.permute.xlu1 %3155 }
 0x24a   : > { %3897 = vrot.lane.b32.xlu1 %v8164_v10, %s10152_s13  ;;  %4155 = vrot.lane.b32.xlu0 %v8104_v34, %s10154_s17 }
 0x24c   : > { %v8360_v24 = vpop.permute.xlu0 %2903  ;;  %v2443_v49 = vpop.permute.xlu1 %2442 }
 0x24e   : > { %3179 = vrot.lane.b32.xlu1 %v8249_v35, %s7539_s10  ;;  %4147 = vrot.lane.b32.xlu0 %v8134_v32, %s10154_s17 }
 0x250   : > { %v8366_v12 = vpop.permute.xlu0 %3157  ;;  %v8368_v15 = vpop.permute.xlu1 %2665 }
 0x252   : > { %3893 = vrot.lane.b32.xlu1 %v8134_v32, %s10152_s13  ;;  %4167 = vrot.lane.b32.xlu0 %v8240_v29, %s10154_s17 }
 0x254   : > { %v8374_v13 = vpop.permute.xlu0 %2422  ;;  %v8376_v39 = vpop.permute.xlu1 %2927 }
 0x256   : > { %7384 = vrot.lane.b32.xlu1 %v10088_v1, %s10152_s13  ;;  %4159 = vrot.lane.b32.xlu0 %v8211_v61, %s10154_s17 }
 0x258   : > { %v8382_v53 = vpop.permute.xlu0 %2685  ;;  %v8384_v21 = vpop.permute.xlu1 %3663 }
 0x259   : > { %10155 = vst [vmem:[#allocation19_spill] sm:$0xff] %v8384_v21  ;;  %v2378_v21 = vld [vmem:[%s10078_s5 + $0x10] sm:$0xff] }
 0x25a   : > { %7389 = vrot.lane.b32.xlu1 %v10088_v1, %s10154_s17  ;;  %3915 = vrot.lane.b32.xlu0 %v8249_v35, %s10152_s13 }
 0x25c   : > { %v8390_v19 = vpop.permute.xlu0 %2907  ;;  %v8392_v20 = vpop.permute.xlu1 %2424 }
 0x25e   : > { %4163 = vrot.lane.b32.xlu1 %v8189_v16, %s10154_s17  ;;  %4153 = vrot.lane.b32.xlu0 %v8182_v11, %s10154_s17 }
 0x260   : > { %v8398_v22 = vpop.permute.xlu0 %3181  ;;  %v8400_v23 = vpop.permute.xlu1 %2677 }
 0x262   : > { %7399 = vrot.lane.b32.xlu1 %v10088_v1, %s10154_s17  ;;  %4417 = vrot.lane.b32.xlu0 %v8189_v16, %s10112_s18 }
 0x264   : > { %v8406_v25 = vpop.permute.xlu0 %3161  ;;  %v8408_v27 = vpop.permute.xlu1 %2667 }
 0x266   : > { %4161 = vrot.lane.b32.xlu1 %v8224_v28, %s10154_s17  ;;  %4413 = vrot.lane.b32.xlu0 %v8211_v61, %s10112_s18 }
 0x268   : > { %v2435_v50 = vpop.permute.xlu0 %2434  ;;  %v8414_v37 = vpop.permute.xlu1 %2909 }
 0x26a   : > { %4425 = vrot.lane.b32.xlu1 %v8154_v6, %s10112_s18  ;;  %4407 = vrot.lane.b32.xlu0 %v8182_v11, %s10112_s18 }
 0x26c   : > { %v8420_v7 = vpop.permute.xlu0 %2919  ;;  %v8422_v36 = vpop.permute.xlu1 %3173 }
 0x26e   : > { %3661 = vrot.lane.b32.xlu1 %v8249_v35, %s10140_s22  ;;  %4143 = vrot.lane.b32.xlu0 %v8101_v18, %s10154_s17 }
 0x270   : > { %v2431_v14 = vpop.permute.xlu0 %2430  ;;  %v8428_v8 = vpop.permute.xlu1 %3163 }
 0x272   : > { %4421 = vrot.lane.b32.xlu1 %v8240_v29, %s10112_s18  ;;  %4423 = vrot.lane.b32.xlu0 %v8249_v35, %s10112_s18  ;;  %v7337_v29 = vunpack.i.h.bf16 %v8286_v51 }
 0x274   : > { %v8434_v33 = vpop.permute.xlu0 %2915  ;;  %v8436_v60 = vpop.permute.xlu1 %3655 }
 0x275   : > { %10156 = vst [vmem:[#allocation20_spill] sm:$0xff] %v8436_v60 }
 0x276   : > { %4415 = vrot.lane.b32.xlu1 %v8224_v28, %s10112_s18  ;;  %4399 = vrot.lane.b32.xlu0 %v8124_v38, %s10112_s18 }
 0x278   : > { %v8442_v44 = vpop.permute.xlu0 %2675  ;;  %v8444_v43 = vpop.permute.xlu1 %2673 }
 0x27a   : > { %4397 = vrot.lane.b32.xlu0 %v8101_v18, %s10112_s18  ;;  %4151 = vrot.lane.b32.xlu1 %v8164_v10, %s10154_s17 }
 0x27c   : > { %v8450_v1 = vpop.permute.xlu0 %3171  ;;  %v8452_v52 = vpop.permute.xlu1 %3169 }
 0x27e   : > { %4419 = vrot.lane.b32.xlu0 %v10157_v54, %s10112_s18  ;;  %4145 = vrot.lane.b32.xlu1 %v8124_v38, %s10154_s17  ;;  %v7336_v38 = vunpack.i.l.bf16 %v8286_v51  ;;  %v2448_v51 = vsel %vm377_vm1, %v8374_v13, %v8392_v20 }
 0x280   : > { %v8458_v59 = vpop.permute.xlu0 %2923  ;;  %v2433_v60 = vpop.permute.xlu1 %2432 }
 0x281   : > { %v2452_v16 = vsel %vm377_vm1, %v2433_v60, %v2435_v50 }
 0x282   : > { %4403 = vrot.lane.b32.xlu0 %v10157_v54, %s10112_s18  ;;  %4409 = vrot.lane.b32.xlu1 %v8104_v34, %s10112_s18  ;;  %v2376_v34 = vld [vmem:[%s10078_s5] sm:$0xff] }
 0x284   : > { %v2441_v18 = vpop.permute.xlu0 %2440  ;;  %v8467_v47 = vpop.permute.xlu1 %2917 }
 0x285   : > { %v2455_v11 = vsel %vm377_vm1, %v2441_v18, %v2443_v49 }
 0x286   : > { %4663 = vperm.xlu0 %7331, %v2378_v21   ;;  %4169 = vrot.lane.b32.xlu1 %v8249_v35, %s10154_s17 }
 0x287   : > { %7053 = vmatprep.subr.mxu0 %v2455_v11 }
 0x288   : > { %7054 = vmatpush3.msra.mxu0 %v2455_v11  ;;  %v8476_v61 = vpop.permute.xlu0 %3647  ;;  %v2439_v28 = vpop.permute.xlu1 %2438  ;;  %v2449_v11 = vsel %vm377_vm1, %v8392_v20, %v8314_v4  ;;  %v2345_v4 = vld [vmem:[%s10077_s4 + $0x28] sm:$0xff]  ;;  %v2445_v20 = vsel %vm377_vm1, %v8306_v0, %v8328_v17 }
 0x289   : > { %10158 = vst [vmem:[#allocation21_spill] sm:$0xff] %v8476_v61  ;;  %7055 = vmatprep.subr.mxu0 %v2452_v16  ;;  %v2454_v49 = vsel %vm377_vm1, %v2439_v28, %v2441_v18  ;;  %v2453_v21 = vsel %vm377_vm1, %v7336_v38, %v2439_v28  ;;  %v2451_v18 = vsel %vm377_vm1, %v2431_v14, %v2433_v60  ;;  %v7341_v28 = vunpack.i.l.bf16 %v8232_v55 }
 0x28a   : > { %7056 = vmatpush3.msra.mxu0 %v2452_v16  ;;  %4653 = vperm.xlu0 %7331, %v2376_v34   ;;  %v2446_v34 = vsel %vm377_vm1, %v8328_v17, %v8336_v57  ;;  %v2450_v38 = vsel %vm377_vm1, %v7337_v29, %v2431_v14  ;;  %v7342_v16 = vunpack.i.h.bf16 %v8232_v55  ;;  %v2346_v14 = vld [vmem:[%s10077_s4 + $0x30] sm:$0xff] }
 0x28b   : > { %4405 = vrot.lane.b32.xlu1 %v8164_v10, %s10112_s18  ;;  %2505 = vmatprep.subr.mxu1 %v2454_v49  ;;  %v2447_v29 = vsel %vm377_vm1, %v7341_v28, %v8374_v13  ;;  %v2347_v13 = vld [vmem:[%s10077_s4 + $0x38] sm:$0xff] }
 0x28c   : > { %7057 = vmatprep.subr.mxu0 %v2449_v11  ;;  %2506 = vmatpush1.msra.mxu1 %v2453_v21  ;;  %v8487_v50 = vpop.permute.xlu0 %3639  ;;  %v8489_v61 = vpop.permute.xlu1 %2681  ;;  %v2444_v60 = vsel %vm377_vm1, %v7342_v16, %v8306_v0 }
 0x28d   : > { %7058 = vmatpush3.msra.mxu0 %v2449_v11  ;;  %2507 = vmatprep.subr.mxu1 %v2451_v18  ;;  %v2379_v11 = vld [vmem:[%s10078_s5 + $0x18] sm:$0xff] }
 0x28e   : > { %7059 = vmatprep.subr.mxu0 %v2446_v34  ;;  %2508 = vmatpush1.msra.mxu1 %v2450_v38  ;;  %v2340_v38 = vld [vmem:[%s10077_s4] sm:$0xff] }
 0x28f   : > { %7060 = vmatpush3.msra.mxu0 %v2446_v34  ;;  %4401 = vrot.lane.b32.xlu1 %v8134_v32, %s10112_s18  ;;  %v2377_v34 = vld [vmem:[%s10078_s5 + $0x8] sm:$0xff] }
 0x290   : > { %2509 = vmatprep.subr.mxu1 %v2448_v51  ;;  %v8508_v57 = vpop.permute.xlu0 %3659  ;;  %v8510_v55 = vpop.permute.xlu1 %3177  ;;  %7062 = vmatmul.mubr.msk.f32.vlgmr.msra.gmra.mxu0 %vm2468_vm9, %v2345_v4 }
 0x291   : > { %2510 = vmatpush1.msra.mxu1 %v2447_v29  ;;  %7064 = vmatprep.mubr.msk.f32.mxu0 %vm2468_vm9, %v2346_v14  ;;  %v7346_v29 = vunpack.i.l.bf16 %v8242_v56 }
 0x292   : > { %2511 = vmatprep.subr.mxu1 %v2445_v20  ;;  %7409 = vrot.lane.b32.xlu0 %v10157_v54, %s7536_s24 }
 0x293   : > { %2512 = vmatpush1.msra.mxu1 %v2444_v60  ;;  %4427 = vrot.lane.b32.xlu1 %v10157_v54, %s10112_s18 }
 0x294   : > { %v8527_v49 = vpop.permute.xlu0 %3651  ;;  %v8529_v21 = vpop.permute.xlu1 %7379  ;;  %6726 = vmatmul.mubr.msk.f32.vlgmr.msra.gmra.mxu1 %vm2468_vm9, %v8276_v30  ;;  %7065 = vmatmul.mubr.msk.f32.gmra.mxu0 %vm2468_vm9, %v2347_v13 }
 0x295   : > { %2551 = vmatprep.mubr.f32.mxu1 %v10157_v54  ;;  %2787 = vmatprep.mubr.f32.mxu0 %v10157_v54 }
 0x296   : > { %7414 = vrot.lane.b32.xlu0 %v10157_v54, %s7537_s25 }
 0x297   : > { %4411 = vrot.lane.b32.xlu1 %v10157_v54, %s10112_s18  ;;  %s10194_s18 = smov 109  }
 0x298   : > { %v8538_v0 = vpop.permute.xlu0 %3645  ;;  %v8540_v17 = vpop.permute.xlu1 %3653  ;;  %6727 = vmatmul.mubr.msk.f32.gmra.mxu1 %vm2468_vm9, %v2345_v4 }
 0x299   : > { %2557 = vmatprep.mubr.f32.mxu1 %v10157_v54 }
 0x29a   : > { %7419 = vrot.lane.b32.xlu0 %v10157_v54, %s7537_s25 }
 0x29b   : > { %4668 = vperm.xlu1 %7332, %v2379_v11  }
 0x29c   : > { %v8547_v30 = vpop.permute.xlu0 %3909  ;;  %v8549_v18 = vpop.permute.xlu1 %3917  ;;  %6728 = vmatmul.mubr.msk.f32.gmra.mxu1 %vm2468_vm9, %v2346_v14 }
 0x29d   : > { %2563 = vmatprep.mubr.f32.mxu1 %v10157_v54 }
 0x29e   : > { %7424 = vrot.lane.b32.xlu0 %v10157_v54, %s7538_s26 }
 0x29f   : > { %4658 = vperm.xlu1 %7332, %v2377_v34   ;;  %v7347_v34 = vunpack.i.h.bf16 %v8242_v56 }
 0x2a0   : > { %v8559_v16 = vpop.permute.xlu0 %3905  ;;  %v8561_v28 = vpop.permute.xlu1 %3913  ;;  %6729 = vmatmul.mubr.msk.f32.gmra.mxu1 %vm2468_vm9, %v2347_v13  ;;  %v2696_v13 = vsel %vm579_vm2, %v7346_v29, %v8489_v61  ;;  %v2691_v29 = vsel %vm579_vm2, %v8368_v15, %v8408_v27 }
 0x2a1   : > { %10159 = vst [vmem:[#allocation22_spill] sm:$0xff] %v8559_v16  ;;  %7075 = vmatprep.mubr.msk.f32.mxu1 %vm2468_vm9, %v2340_v38  ;;  %v2695_v16 = vsel %vm579_vm2, %v8442_v44, %v8400_v23  ;;  %v2692_v23 = vsel %vm579_vm2, %v8408_v27, %v8304_v26 }
 0x2a2   : > { %7429 = vrot.lane.b32.xlu0 %v10157_v54, %s7538_s26 }
 0x2a3   : > { %7404 = vrot.lane.b32.xlu1 %v10157_v54, %s7536_s24 }
 0x2a4   : > { %v8565_v51 = vpop.permute.xlu0 %3899  ;;  %v8567_v4 = vpop.permute.xlu1 %3907 }
 0x2a5   : > { %10160 = vst [vmem:[#allocation23_spill] sm:$0xff] %v8565_v51  ;;  %10161 = vst [vmem:[#allocation24_spill] sm:$0xff] %v8567_v4  ;;  %v2694_v51 = vsel %vm579_vm2, %v8444_v43, %v8442_v44  ;;  %v7357_v4 = vunpack.i.h.bf16 %v8261_v45  ;;  %v2688_v44 = vsel %vm579_vm2, %v8322_v62, %v8346_v63 }
 0x2a6   : > { %7434 = vrot.lane.b32.xlu0 %v10157_v54, %s7539_s10 }
 0x2a8   : > { %v8570_v14 = vpop.permute.xlu0 %3635  ;;  %v2684_v20 = vpop.permute.xlu1 %2683 }
 0x2a9   : > { %v2697_v60 = vsel %vm579_vm2, %v8489_v61, %v2684_v20  ;;  %v2698_v11 = vsel %vm579_vm2, %v2684_v20, %v8382_v53  ;;  %v7356_v53 = vunpack.i.l.bf16 %v8261_v45  ;;  %v2693_v61 = vsel %vm579_vm2, %v7347_v34, %v8444_v43 }
 0x2aa   : > { %2747 = vmatprep.subr.mxu0 %v2697_v60  ;;  %7067 = vmatprep.subr.mxu1 %v2698_v11  ;;  %v2689_v43 = vsel %vm579_vm2, %v8346_v63, %v8344_v5 }
 0x2ab   : > { %2748 = vmatpush1.msra.mxu0 %v2696_v13  ;;  %7068 = vmatpush3.msra.mxu1 %v2698_v11  ;;  %v2690_v45 = vsel %vm579_vm2, %v7356_v53, %v8368_v15  ;;  %v2687_v15 = vsel %vm579_vm2, %v7357_v4, %v8322_v62  ;;  %v2342_v62 = vld [vmem:[%s10077_s4 + $0x10] sm:$0xff]  ;;  %v7352_v4 = vunpack.i.h.bf16 %v8255_v42  ;;  %v7361_v13 = vunpack.i.l.bf16 %v8271_v58 }
 0x2ac   : > { %v8587_v56 = vpop.permute.xlu0 %3891  ;;  %2749 = vmatprep.subr.mxu0 %v2694_v51  ;;  %v8589_v20 = vpop.permute.xlu1 %3643  ;;  %7069 = vmatprep.subr.mxu1 %v2695_v16  ;;  %v7351_v51 = vunpack.i.l.bf16 %v8255_v42  ;;  %v2343_v42 = vld [vmem:[%s10077_s4 + $0x18] sm:$0xff]  ;;  %v2934_v53 = vsel %vm780_vm3, %v8414_v37, %v8338_v2 }
 0x2ad   : > { %2750 = vmatpush1.msra.mxu0 %v2693_v61  ;;  %7070 = vmatpush3.msra.mxu1 %v2695_v16  ;;  %v2341_v16 = vld [vmem:[%s10077_s4 + $0x8] sm:$0xff]  ;;  %v2935_v34 = vsel %vm780_vm3, %v7352_v4, %v8434_v33 }
 0x2ae   : > { %2751 = vmatprep.subr.mxu0 %v2691_v29  ;;  %7071 = vmatprep.subr.mxu1 %v2692_v23  ;;  %v2938_v63 = vsel %vm780_vm3, %v7351_v51, %v8458_v59  ;;  %v2931_v29 = vsel %vm780_vm3, %v8352_v40, %v8360_v24 }
 0x2af   : > { %2752 = vmatpush1.msra.mxu0 %v2690_v45  ;;  %7072 = vmatpush3.msra.mxu1 %v2692_v23  ;;  %v2930_v23 = vsel %vm780_vm3, %v8330_v46, %v8352_v40 }
 0x2b0   : > { %v8610_v26 = vpop.permute.xlu0 %3889  ;;  %2753 = vmatprep.subr.mxu0 %v2688_v44  ;;  %v2926_v27 = vpop.permute.xlu1 %2925  ;;  %7073 = vmatprep.subr.mxu1 %v2689_v43 }
 0x2b1   : > { %2754 = vmatpush1.msra.mxu0 %v2687_v15  ;;  %7074 = vmatpush3.msra.mxu1 %v2689_v43  ;;  %v2939_v60 = vsel %vm780_vm3, %v8458_v59, %v2926_v27  ;;  %v2940_v5 = vsel %vm780_vm3, %v2926_v27, %v8376_v39  ;;  %v2937_v39 = vsel %vm780_vm3, %v8467_v47, %v8420_v7  ;;  %v7362_v7 = vunpack.i.h.bf16 %v8271_v58  ;;  %v2350_v43 = vld [vmem:[%s10077_s4 + $0x50] sm:$0xff] }
 0x2b2   : > { %6734 = vmatmul.mubr.msk.f32.vlgmr.msra.gmra.mxu0 %vm2468_vm9, %v2340_v38  ;;  %7076 = vmatmul.mubr.msk.f32.vlgmr.msra.gmra.mxu1 %vm2468_vm9, %v2341_v16  ;;  %v2936_v59 = vsel %vm780_vm3, %v8434_v33, %v8467_v47  ;;  %v2933_v47 = vsel %vm780_vm3, %v8390_v19, %v8414_v37  ;;  %v2932_v58 = vsel %vm780_vm3, %v7361_v13, %v8390_v19  ;;  %v2348_v19 = vld [vmem:[%s10077_s4 + $0x40] sm:$0xff]  ;;  %v2355_v13 = vld [vmem:[%s10077_s4 + $0x78] sm:$0xff] }
 0x2b3   : > { %2989 = vmatprep.subr.mxu1 %v2939_v60  ;;  %7081 = vmatprep.subr.mxu0 %v2940_v5  ;;  %v2929_v2 = vsel %vm780_vm3, %v7362_v7, %v8330_v46  ;;  %v2349_v46 = vld [vmem:[%s10077_s4 + $0x48] sm:$0xff]  ;;  %v3191_v60 = vsel %vm993_vm4, %v8450_v1, %v8422_v36  ;;  %v7371_v36 = vunpack.i.l.bf16 %v8298_v9  ;;  %v10163_v7 = vld [vmem:[#allocation16_spill] sm:$0xff] }
 0x2b4   : > { %2990 = vmatpush1.msra.mxu1 %v2938_v63  ;;  %7082 = vmatpush3.msra.mxu0 %v2940_v5  ;;  %v8627_v11 = vpop.permute.xlu0 %4171  ;;  %v8632_v38 = vpop.permute.xlu1 %3637  ;;  %v3190_v5 = vsel %vm993_vm4, %v8452_v52, %v8450_v1  ;;  %v3187_v1 = vsel %vm993_vm4, %v8406_v25, %v8428_v8 }
 0x2b5   : > { %7083 = vmatprep.subr.mxu0 %v2937_v39  ;;  %2991 = vmatprep.subr.mxu1 %v2936_v59  ;;  %v3186_v4 = vsel %vm993_vm4, %v7371_v36, %v8406_v25  ;;  %v3184_v59 = vsel %vm993_vm4, %v8320_v3, %v8354_v41  ;;  %v2352_v25 = vld [vmem:[%s10077_s4 + $0x60] sm:$0xff]  ;;  %v10173_v36 = vld [vmem:[#allocation21_spill] sm:$0xff] }
 0x2b6   : > { %2793 = vmatprep.mubr.f32.mxu0 %v10157_v54  ;;  %7078 = vmatprep.mubr.msk.f32.mxu1 %vm2468_vm9, %v2342_v62 }
 0x2b7   : > { %2992 = vmatpush1.msra.mxu1 %v2935_v34  ;;  %7084 = vmatpush3.msra.mxu0 %v2937_v39  ;;  %v2354_v34 = vld [vmem:[%s10077_s4 + $0x70] sm:$0xff] }
 0x2b8   : > { %6735 = vmatmul.mubr.msk.f32.gmra.mxu0 %vm2468_vm9, %v2341_v16  ;;  %7079 = vmatmul.mubr.msk.f32.gmra.mxu1 %vm2468_vm9, %v2343_v42  ;;  %v8654_v61 = vpop.permute.xlu1 %3901  ;;  %v8658_v33 = vpop.permute.xlu0 %7394  ;;  %v7366_v16 = vunpack.i.l.bf16 %v8284_v31 }
 0x2b9   : > { %2993 = vmatprep.subr.mxu1 %v2933_v47  ;;  %7085 = vmatprep.subr.mxu0 %v2934_v53  ;;  %v10164_v47 = vld [vmem:[#allocation14_spill] sm:$0xff] }
 0x2ba   : > { %2994 = vmatpush1.msra.mxu1 %v2932_v58  ;;  %7086 = vmatpush3.msra.mxu0 %v2934_v53  ;;  %v3192_v51 = vsel %vm993_vm4, %v7366_v16, %v8510_v55  ;;  %v10165_v53 = vld [vmem:[#allocation15_spill] sm:$0xff] }
 0x2bb   : > { %7087 = vmatprep.subr.mxu0 %v2931_v29  ;;  %2995 = vmatprep.subr.mxu1 %v2930_v23 }
 0x2bc   : > { %2799 = vmatprep.mubr.f32.mxu0 %v10157_v54  ;;  %2996 = vmatpush1.msra.mxu1 %v2929_v2  ;;  %v8672_v37 = vpop.permute.xlu1 %3897  ;;  %v8682_v40 = vpop.permute.xlu0 %4155  ;;  %v10168_v2 = vld [vmem:[#allocation12_spill] sm:$0xff] }
 0x2bd   : > { %3029 = vmatprep.mubr.f32.mxu1 %v10157_v54  ;;  %7088 = vmatpush3.msra.mxu0 %v2931_v29  ;;  %v10167_v29 = vld [vmem:[#allocation10_spill] sm:$0xff] }
 0x2be   : > { %6736 = vmatmul.mubr.msk.f32.gmra.mxu0 %vm2468_vm9, %v2342_v62  ;;  %6742 = vmatmul.mubr.msk.f32.vlgmr.msra.gmra.mxu1 %vm2468_vm9, %v2348_v19  ;;  %v7372_v62 = vunpack.i.h.bf16 %v8298_v9  ;;  %v3185_v9 = vsel %vm993_vm4, %v8354_v41, %v8366_v12  ;;  %v10162_v12 = vld [vmem:[#allocation17_spill] sm:$0xff] }
 0x2bf   : > { %2805 = vmatprep.mubr.f32.mxu0 %v10157_v54  ;;  %3035 = vmatprep.mubr.f32.mxu1 %v10157_v54 }
 0x2c0   : > { %v3180_v24 = vpop.permute.xlu1 %3179  ;;  %v8699_v15 = vpop.permute.xlu0 %4147  ;;  %7439 = vrot.lane.b32.xlu0 %v10157_v54, %s7539_s10 }
 0x2c1   : > { %v3193_v45 = vsel %vm993_vm4, %v8510_v55, %v3180_v24  ;;  %v3194_v44 = vsel %vm993_vm4, %v3180_v24, %v8398_v22  ;;  %v7367_v22 = vunpack.i.h.bf16 %v8284_v31  ;;  %v2351_v31 = vld [vmem:[%s10077_s4 + $0x58] sm:$0xff] }
 0x2c2   : > { %6737 = vmatmul.mubr.msk.f32.gmra.mxu0 %vm2468_vm9, %v2343_v42  ;;  %6743 = vmatmul.mubr.msk.f32.gmra.mxu1 %vm2468_vm9, %v2349_v46 }
 0x2c3   : > { %3041 = vmatprep.mubr.f32.mxu1 %v10157_v54  ;;  %7089 = vmatprep.mubr.msk.f32.mxu0 %vm2468_vm9, %v2348_v19  ;;  %v3189_v55 = vsel %vm993_vm4, %v7367_v22, %v8452_v52  ;;  %v3188_v52 = vsel %vm993_vm4, %v8428_v8, %v8312_v48  ;;  %v3183_v48 = vsel %vm993_vm4, %v7372_v62, %v8320_v3  ;;  %v2353_v8 = vld [vmem:[%s10077_s4 + $0x68] sm:$0xff]  ;;  %v2356_v19 = vld [vmem:[%s10077_s4 + $0x80] sm:$0xff]  ;;  %v7381_v22 = vunpack.i.l.bf16 %v8529_v21 }
 0x2c4   : > { %3243 = vmatprep.subr.mxu0 %v3193_v45  ;;  %7095 = vmatprep.subr.mxu1 %v3194_v44  ;;  %v8696_v27 = vpop.permute.xlu1 %3893  ;;  %v8732_v39 = vpop.permute.xlu0 %4167  ;;  %v10170_v45 = vld [vmem:[#allocation9_spill] sm:$0xff] }
 0x2c5   : > { %7096 = vmatpush3.msra.mxu1 %v3194_v44  ;;  %v10171_v44 = vld [vmem:[#allocation19_spill] sm:$0xff]  ;;  %7444 = vrot.lane.b32.xlu0 %v10157_v54, %s10140_s22 }
 0x2c6   : > { %6744 = vmatmul.mubr.msk.f32.gmra.mxu1 %vm2468_vm9, %v2350_v43  ;;  %7090 = vmatmul.mubr.msk.f32.vlgmr.msra.gmra.mxu0 %vm2468_vm9, %v2349_v46  ;;  %v10169_v46 = vld [vmem:[#allocation18_spill] sm:$0xff] }
 0x2c7   : > { %3244 = vmatpush1.msra.mxu0 %v3192_v51  ;;  %7097 = vmatprep.subr.mxu1 %v3191_v60  ;;  %v7376_v24 = vunpack.i.l.bf16 %v10169_v46 }
 0x2c8   : > { %3245 = vmatprep.subr.mxu0 %v3190_v5  ;;  %3047 = vmatprep.mubr.f32.mxu1 %v10157_v54  ;;  %v8717_v63 = vpop.permute.xlu1 %7384  ;;  %v8757_v3 = vpop.permute.xlu0 %4159 }
 0x2c9   : > { %7092 = vmatprep.mubr.msk.f32.mxu0 %vm2468_vm9, %v2350_v43  ;;  %3246 = vmatpush1.msra.mxu0 %v3189_v55  ;;  %v3678_v43 = vsel %vm1412_vm5, %v10171_v44, %v7376_v24 }
 0x2ca   : > { %7098 = vmatpush3.msra.mxu1 %v3191_v60  ;;  %7093 = vmatmul.mubr.msk.f32.gmra.mxu0 %vm2468_vm9, %v2351_v31  ;;  %v10172_v60 = vld [vmem:[#allocation20_spill] sm:$0xff] }
 0x2cb   : > { %6745 = vmatmul.mubr.msk.f32.gmra.mxu1 %vm2468_vm9, %v2351_v31  ;;  %3247 = vmatprep.subr.mxu0 %v3187_v1  ;;  %v7382_v31 = vunpack.i.h.bf16 %v8529_v21  ;;  %v3672_v1 = vsel %vm1412_vm5, %v10173_v36, %v7381_v22  ;;  %v3921_v22 = vsel %vm1625_vm6, %v8610_v26, %v8587_v56  ;;  %v7397_v26 = vunpack.i.h.bf16 %v8658_v33 }
 0x2cc   : > { %7099 = vmatprep.subr.mxu1 %v3188_v52  ;;  %3248 = vmatpush1.msra.mxu0 %v3186_v4  ;;  %v8737_v42 = vpop.permute.xlu1 %7389  ;;  %v8779_v58 = vpop.permute.xlu0 %3915 }
 0x2cd   : > { %7100 = vmatpush3.msra.mxu1 %v3188_v52  ;;  %3249 = vmatprep.subr.mxu0 %v3184_v59  ;;  %v3669_v21 = vsel %vm1412_vm5, %v8487_v50, %v7382_v31  ;;  %v2358_v52 = vld [vmem:[%s10077_s4 + $0x90] sm:$0xff]  ;;  %v7396_v31 = vunpack.i.l.bf16 %v8658_v33 }
 0x2ce   : > { %7101 = vmatprep.subr.mxu1 %v3185_v9  ;;  %3250 = vmatpush1.msra.mxu0 %v3183_v48 }
 0x2cf   : > { %3283 = vmatprep.mubr.f32.mxu0 %v10157_v54  ;;  %7102 = vmatpush3.msra.mxu1 %v3185_v9  ;;  %v3931_v9 = vsel %vm1625_vm6, %v8779_v58, %v8549_v18  ;;  %v3926_v33 = vsel %vm1625_vm6, %v8654_v61, %v7396_v31 }
 0x2d0   : > { %7103 = vmatprep.mubr.msk.f32.mxu1 %vm2468_vm9, %v2352_v25  ;;  %6750 = vmatmul.mubr.msk.f32.vlgmr.msra.gmra.mxu0 %vm2468_vm9, %v2352_v25  ;;  %v8753_v41 = vpop.permute.xlu1 %4163  ;;  %v8804_v51 = vpop.permute.xlu0 %4153  ;;  %v2359_v25 = vld [vmem:[%s10077_s4 + $0x98] sm:$0xff] }
 0x2d1   : > { %7104 = vmatmul.mubr.msk.f32.vlgmr.msra.gmra.mxu1 %vm2468_vm9, %v2353_v8  ;;  %3441 = vmatprep.subr.mxu1 %v8249_v35 }
 0x2d2   : > { %7109 = vmatprep.subr.mxu0 %v8154_v6  ;;  %3442 = vmatpush1.msra.mxu1 %v10162_v12 }
 0x2d3   : > { %7110 = vmatpush3.msra.mxu0 %v8154_v6  ;;  %3443 = vmatprep.subr.mxu1 %v10163_v7  ;;  %v10166_v6 = vld [vmem:[#allocation13_spill] sm:$0xff] }
 0x2d4   : > { %7111 = vmatprep.subr.mxu0 %v10164_v47  ;;  %3289 = vmatprep.mubr.f32.mxu0 %v10157_v54  ;;  %v8771_v35 = vpop.permute.xlu1 %7399  ;;  %v8827_v4 = vpop.permute.xlu0 %4417 }
 0x2d5   : > { %7106 = vmatprep.mubr.msk.f32.mxu1 %vm2468_vm9, %v2354_v34  ;;  %3444 = vmatpush1.msra.mxu1 %v10165_v53  ;;  %v2361_v53 = vld [vmem:[%s10077_s4 + $0xa8] sm:$0xff] }
 0x2d6   : > { %7112 = vmatpush3.msra.mxu0 %v10164_v47  ;;  %7107 = vmatmul.mubr.msk.f32.gmra.mxu1 %vm2468_vm9, %v2355_v13  ;;  %v3670_v47 = vsel %vm1412_vm5, %v8589_v20, %v8538_v0  ;;  %v3667_v20 = vsel %vm1412_vm5, %v8570_v14, %v8632_v38  ;;  %v7387_v14 = vunpack.i.h.bf16 %v8717_v63 }
 0x2d7   : > { %6751 = vmatmul.mubr.msk.f32.gmra.mxu0 %vm2468_vm9, %v2353_v8  ;;  %3445 = vmatprep.subr.mxu1 %v10166_v6  ;;  %v2360_v8 = vld [vmem:[%s10077_s4 + $0xa0] sm:$0xff]  ;;  %v3668_v6 = vsel %vm1412_vm5, %v8632_v38, %v8487_v50 }
 0x2d8   : > { %7113 = vmatprep.subr.mxu0 %v10167_v29  ;;  %3446 = vmatpush1.msra.mxu1 %v8164_v10  ;;  %v8783_v23 = vpop.permute.xlu1 %4161  ;;  %v7377_v10 = vunpack.i.h.bf16 %v10169_v46  ;;  %v8855_v7 = vpop.permute.xlu0 %4413 }
 0x2d9   : > { %7114 = vmatpush3.msra.mxu0 %v10167_v29  ;;  %3447 = vmatprep.subr.mxu1 %v10168_v2  ;;  %v3930_v29 = vsel %vm1625_vm6, %v8561_v28, %v8779_v58  ;;  %v10174_v2 = vld [vmem:[#allocation24_spill] sm:$0xff]  ;;  %v10175_v28 = vld [vmem:[#allocation22_spill] sm:$0xff] }
 0x2da   : > { %7115 = vmatprep.subr.mxu0 %v8134_v32  ;;  %3295 = vmatprep.mubr.f32.mxu0 %v10157_v54  ;;  %v3675_v5 = vsel %vm1412_vm5, %v10172_v60, %v7377_v10  ;;  %v3928_v50 = vsel %vm1625_vm6, %v10174_v2, %v8547_v30  ;;  %v3927_v58 = vsel %vm1625_vm6, %v10175_v28, %v10174_v2  ;;  %v10176_v10 = vld [vmem:[#allocation23_spill] sm:$0xff]  ;;  %v2374_v28 = vld [vmem:[%s10077_s4 + $0x110] sm:$0xff] }
 0x2db   : > { %3448 = vmatpush1.msra.mxu1 %v10170_v45  ;;  %3481 = vmatprep.mubr.f32.mxu1 %v10157_v54  ;;  %v7391_v45 = vunpack.i.l.bf16 %v8737_v42 }
 0x2dc   : > { %7116 = vmatpush3.msra.mxu0 %v8134_v32  ;;  %6758 = vmatmul.mubr.msk.f32.vlgmr.msra.gmra.mxu1 %vm2468_vm9, %v2356_v19  ;;  %v8800_v16 = vpop.permute.xlu1 %4425  ;;  %v2357_v32 = vld [vmem:[%s10077_s4 + $0x88] sm:$0xff]  ;;  %v8898_v38 = vpop.permute.xlu0 %4407 }
 0x2dd   : > { %6752 = vmatmul.mubr.msk.f32.gmra.mxu0 %vm2468_vm9, %v2354_v34  ;;  %7123 = vmatprep.subr.mxu1 %v3678_v43  ;;  %v3673_v34 = vsel %vm1412_vm5, %v8527_v49, %v8540_v17  ;;  %v7386_v49 = vunpack.i.l.bf16 %v8717_v63  ;;  %v3925_v63 = vsel %vm1625_vm6, %v10176_v10, %v8654_v61  ;;  %v2366_v61 = vld [vmem:[%s10077_s4 + $0xd0] sm:$0xff] }
 0x2de   : > { %7124 = vmatpush3.msra.mxu1 %v3678_v43  ;;  %3301 = vmatprep.mubr.f32.mxu0 %v10157_v54  ;;  %v2364_v43 = vld [vmem:[%s10077_s4 + $0xc0] sm:$0xff] }
 0x2df   : > { %7125 = vmatprep.subr.mxu1 %v3675_v5  ;;  %3487 = vmatprep.mubr.f32.mxu1 %v10157_v54  ;;  %v3932_v46 = vsel %vm1625_vm6, %v8549_v18, %v7386_v49  ;;  %v3922_v18 = vsel %vm1625_vm6, %v8587_v56, %v8696_v27 }
 0x2e0   : > { %7126 = vmatpush3.msra.mxu1 %v3675_v5  ;;  %v3662_v55 = vpop.permute.xlu1 %3661  ;;  %v7401_v5 = vunpack.i.l.bf16 %v8771_v35  ;;  %7449 = vrot.lane.b32.xlu0 %v10157_v54, %s10140_s22 }
 0x2e1   : > { %6753 = vmatmul.mubr.msk.f32.gmra.mxu0 %vm2468_vm9, %v2355_v13  ;;  %6759 = vmatmul.mubr.msk.f32.gmra.mxu1 %vm2468_vm9, %v2357_v32  ;;  %v3677_v62 = vsel %vm1412_vm5, %v3662_v55, %v10171_v44  ;;  %v3676_v48 = vsel %vm1412_vm5, %v8508_v57, %v3662_v55  ;;  %v3674_v57 = vsel %vm1412_vm5, %v8540_v17, %v10172_v60  ;;  %v8872_v17 = vld [vmem:[%s10077_s4 + $0xb0] sm:$0xff]  ;;  %v7392_v60 = vunpack.i.h.bf16 %v8737_v42  ;;  %v8934_v55 = vpop.permute.xlu0 %4143 }
 0x2e2   : > { %7127 = vmatprep.subr.mxu1 %v3672_v1  ;;  %3493 = vmatprep.mubr.f32.mxu1 %v10157_v54  ;;  %v3671_v13 = vsel %vm1412_vm5, %v8538_v0, %v10173_v36  ;;  %v3924_v44 = vsel %vm1625_vm6, %v8672_v37, %v10176_v10  ;;  %v3929_v37 = vsel %vm1625_vm6, %v8547_v30, %v7387_v14  ;;  %v7402_v42 = vunpack.i.h.bf16 %v8771_v35  ;;  %v2365_v36 = vld [vmem:[%s10077_s4 + $0xc8] sm:$0xff] }
 0x2e3   : > { %7128 = vmatpush3.msra.mxu1 %v3672_v1  ;;  %7117 = vmatprep.mubr.msk.f32.mxu0 %vm2468_vm9, %v2356_v19  ;;  %v8895_v19 = vld [vmem:[%s10077_s4 + $0xb8] sm:$0xff]  ;;  %v4183_v30 = vsel %vm1838_vm7, %v8753_v41, %v7392_v60  ;;  %v4180_v1 = vsel %vm1838_vm7, %v8682_v40, %v7401_v5  ;;  %v2373_v14 = vld [vmem:[%s10077_s4 + $0x108] sm:$0xff] }
 0x2e4   : > { %7129 = vmatprep.subr.mxu1 %v3669_v21  ;;  %3727 = vmatprep.subr.mxu0 %v3677_v62  ;;  %v8829_v59 = vpop.permute.xlu1 %4421  ;;  %v4177_v62 = vsel %vm1838_vm7, %v8699_v15, %v7402_v42 }
 0x2e5   : > { %7130 = vmatpush3.msra.mxu1 %v3669_v21  ;;  %7118 = vmatmul.mubr.msk.f32.vlgmr.msra.gmra.mxu0 %vm2468_vm9, %v2357_v32  ;;  %v4186_v32 = vsel %vm1838_vm7, %v8627_v11, %v7391_v45  ;;  %v4424_v35 = vpop.permute.xlu0 %4423  ;;  %v3923_v21 = vsel %vm1625_vm6, %v8696_v27, %v7397_v26  ;;  %v2367_v27 = vld [vmem:[%s10077_s4 + $0xd8] sm:$0xff] }
 0x2e6   : > { %6760 = vmatmul.mubr.msk.f32.gmra.mxu1 %vm2468_vm9, %v2358_v52  ;;  %3981 = vmatprep.subr.mxu1 %v3931_v9  ;;  %v4439_v9 = vsel %vm2051_vm8, %v4424_v35, %v8800_v16 }
 0x2e7   : > { %3499 = vmatprep.mubr.f32.mxu1 %v10157_v54  ;;  %7120 = vmatprep.mubr.msk.f32.mxu0 %vm2468_vm9, %v2358_v52 }
 0x2e8   : > { %3728 = vmatpush1.msra.mxu0 %v3676_v48  ;;  %v8849_v12 = vpop.permute.xlu1 %4415  ;;  %7454 = vrot.lane.b32.xlu0 %v10157_v54, %s10152_s13 }
 0x2e9   : > { %7121 = vmatmul.mubr.msk.f32.gmra.mxu0 %vm2468_vm9, %v2359_v25  ;;  %3729 = vmatprep.subr.mxu0 %v3674_v57 }
 0x2ea   : > { %6761 = vmatmul.mubr.msk.f32.gmra.mxu1 %vm2468_vm9, %v2359_v25  ;;  %3730 = vmatpush1.msra.mxu0 %v3673_v34  ;;  %v4400_v34 = vpop.permute.xlu0 %4399 }
 0x2eb   : > { %7131 = vmatprep.mubr.msk.f32.mxu1 %vm2468_vm9, %v2360_v8  ;;  %3731 = vmatprep.subr.mxu0 %v3671_v13 }
 0x2ec   : > { %3732 = vmatpush1.msra.mxu0 %v3670_v47  ;;  %3767 = vmatprep.mubr.f32.mxu0 %v10157_v54  ;;  %v8878_v0 = vpop.permute.xlu1 %4151  ;;  %v4438_v47 = vsel %vm2051_vm8, %v8829_v59, %v4424_v35  ;;  %v4435_v59 = vsel %vm2051_vm8, %v8855_v7, %v8849_v12 }
 0x2ed   : > { %3733 = vmatprep.subr.mxu0 %v3668_v6  ;;  %v2370_v6 = vld [vmem:[%s10077_s4 + $0xf0] sm:$0xff]  ;;  %v4178_v7 = vsel %vm1838_vm7, %v8878_v0, %v8804_v51  ;;  %v2372_v0 = vld [vmem:[%s10077_s4 + $0x100] sm:$0xff]  ;;  %7459 = vrot.lane.b32.xlu0 %v10157_v54, %s10152_s13 }
 0x2ee   : > { %7132 = vmatmul.mubr.msk.f32.vlgmr.msra.gmra.mxu1 %vm2468_vm9, %v2361_v53  ;;  %3734 = vmatpush1.msra.mxu0 %v3667_v20 }
 0x2ef   : > { %3982 = vmatpush1.msra.mxu1 %v3930_v29  ;;  %7134 = vmatprep.mubr.msk.f32.mxu1 %vm2468_vm9, %v8872_v17 }
 0x2f0   : > { %3983 = vmatprep.subr.mxu1 %v3928_v50  ;;  %6766 = vmatmul.mubr.msk.f32.vlgmr.msra.gmra.mxu0 %vm2468_vm9, %v2360_v8  ;;  %v8906_v24 = vpop.permute.xlu1 %4145  ;;  %v2369_v8 = vld [vmem:[%s10077_s4 + $0xe8] sm:$0xff] }
 0x2f1   : > { %3984 = vmatpush1.msra.mxu1 %v3927_v58  ;;  %7137 = vmatprep.subr.mxu0 %v3932_v46  ;;  %v4176_v29 = vsel %vm1838_vm7, %v8906_v24, %v8699_v15 }
 0x2f2   : > { %3985 = vmatprep.subr.mxu1 %v3925_v63  ;;  %7135 = vmatmul.mubr.msk.f32.gmra.mxu1 %vm2468_vm9, %v8895_v19 }
 0x2f3   : > { %3986 = vmatpush1.msra.mxu1 %v3924_v44  ;;  %4021 = vmatprep.mubr.f32.mxu1 %v10157_v54 }
 0x2f4   : > { %3987 = vmatprep.subr.mxu1 %v3922_v18  ;;  %7138 = vmatpush3.msra.mxu0 %v3932_v46  ;;  %v8937_v56 = vpop.permute.xlu1 %4409  ;;  %v2375_v46 = vld [vmem:[%s10077_s4 + $0x118] sm:$0xff] }
 0x2f5   : > { %3988 = vmatpush1.msra.mxu1 %v3921_v22  ;;  %7139 = vmatprep.subr.mxu0 %v3929_v37 }
 0x2f6   : > { %7151 = vmatprep.subr.mxu1 %v4186_v32  ;;  %6774 = vmatmul.mubr.msk.f32.vlgmr.msra.gmra.mxu1 %vm2468_vm9, %v2364_v43 }
 0x2f7   : > { %7152 = vmatpush3.msra.mxu1 %v4186_v32  ;;  %3773 = vmatprep.mubr.f32.mxu0 %v10157_v54 }
 0x2f8   : > { %7153 = vmatprep.subr.mxu1 %v4183_v30  ;;  %4027 = vmatprep.mubr.f32.mxu1 %v10157_v54  ;;  %v4170_v52 = vpop.permute.xlu1 %4169 }
 0x2f9   : > { %7154 = vmatpush3.msra.mxu1 %v4183_v30  ;;  %7140 = vmatpush3.msra.mxu0 %v3929_v37  ;;  %v4185_v48 = vsel %vm1838_vm7, %v4170_v52, %v8627_v11  ;;  %v2368_v11 = vld [vmem:[%s10077_s4 + $0xe0] sm:$0xff]  ;;  %v4184_v57 = vsel %vm1838_vm7, %v8732_v39, %v4170_v52  ;;  %v4436_v39 = vsel %vm2051_vm8, %v8849_v12, %v8827_v4 }
 0x2fa   : > { %7155 = vmatprep.subr.mxu1 %v4180_v1  ;;  %6767 = vmatmul.mubr.msk.f32.gmra.mxu0 %vm2468_vm9, %v2361_v53  ;;  %v4182_v53 = vsel %vm1838_vm7, %v8783_v23, %v8753_v41  ;;  %v4181_v41 = vsel %vm1838_vm7, %v8757_v3, %v8783_v23  ;;  %v4179_v12 = vsel %vm1838_vm7, %v8804_v51, %v8682_v40  ;;  %v2371_v3 = vld [vmem:[%s10077_s4 + $0xf8] sm:$0xff]  ;;  %v4398_v23 = vpop.permute.xlu0 %4397 }
 0x2fb   : > { %6775 = vmatmul.mubr.msk.f32.gmra.mxu1 %vm2468_vm9, %v2365_v36  ;;  %7141 = vmatprep.subr.mxu0 %v3926_v33  ;;  %v4175_v51 = vsel %vm1838_vm7, %v8934_v55, %v8906_v24  ;;  %v4429_v2 = vsel %vm2051_vm8, %v4398_v23, %v4400_v34 }
 0x2fc   : > { %7156 = vmatpush3.msra.mxu1 %v4180_v1  ;;  %7142 = vmatpush3.msra.mxu0 %v3926_v33 }
 0x2fd   : > { %7157 = vmatprep.subr.mxu1 %v4177_v62  ;;  %7143 = vmatprep.subr.mxu0 %v3923_v21  ;;  %v4406_v25 = vpop.permute.xlu1 %4405 }
 0x2fe   : > { %7158 = vmatpush3.msra.mxu1 %v4177_v62  ;;  %3779 = vmatprep.mubr.f32.mxu0 %v10157_v54  ;;  %v4432_v49 = vsel %vm2051_vm8, %v4406_v25, %v8898_v38  ;;  %v4420_v50 = vpop.permute.xlu0 %4419 }
 0x2ff   : > { %4033 = vmatprep.mubr.f32.mxu1 %v10157_v54  ;;  %7144 = vmatpush3.msra.mxu0 %v3923_v21 }
 0x300   : > { %4489 = vmatprep.subr.mxu1 %v4439_v9  ;;  %6768 = vmatmul.mubr.msk.f32.gmra.mxu0 %vm2468_vm9, %v8872_v17  ;;  %v4433_v17 = vsel %vm2051_vm8, %v8898_v38, %v8937_v56 }
 0x301   : > { %6776 = vmatmul.mubr.msk.f32.gmra.mxu1 %vm2468_vm9, %v2366_v61  ;;  %3785 = vmatprep.mubr.f32.mxu0 %v10157_v54  ;;  %v8989_v13 = vpop.permute.xlu1 %4401 }
 0x302   : > { %4039 = vmatprep.mubr.f32.mxu1 %v10157_v54  ;;  %4235 = vmatprep.subr.mxu0 %v4185_v48  ;;  %v4430_v40 = vsel %vm2051_vm8, %v4400_v34, %v8989_v13  ;;  %v4404_v58 = vpop.permute.xlu0 %4403 }
 0x304   : > { %6769 = vmatmul.mubr.msk.f32.gmra.mxu0 %vm2468_vm9, %v8895_v19 }
 0x305   : > { %6777 = vmatmul.mubr.msk.f32.gmra.mxu1 %vm2468_vm9, %v2367_v27  ;;  %7145 = vmatprep.mubr.msk.f32.mxu0 %vm2468_vm9, %v2364_v43  ;;  %v4428_v20 = vpop.permute.xlu1 %4427 }
 0x306   : > { %7159 = vmatprep.mubr.msk.f32.mxu1 %vm2468_vm9, %v2368_v11  ;;  %v4440_v15 = vsel %vm2051_vm8, %v8800_v16, %v4428_v20  ;;  %v4437_v16 = vsel %vm2051_vm8, %v8827_v4, %v4420_v50  ;;  %v4431_v4 = vsel %vm2051_vm8, %v8989_v13, %v4404_v58 }
 0x308   : > { %7146 = vmatmul.mubr.msk.f32.vlgmr.msra.gmra.mxu0 %vm2468_vm9, %v2365_v36 }
 0x309   : > { %7160 = vmatmul.mubr.msk.f32.vlgmr.msra.gmra.mxu1 %vm2468_vm9, %v2369_v8  ;;  %4236 = vmatpush1.msra.mxu0 %v4184_v57  ;;  %v4412_v19 = vpop.permute.xlu1 %4411 }
 0x30a   : > { %4490 = vmatpush1.msra.mxu1 %v4438_v47  ;;  %4237 = vmatprep.subr.mxu0 %v4182_v53  ;;  %v4434_v38 = vsel %vm2051_vm8, %v8937_v56, %v4412_v19 }
 0x30b   : > { %4491 = vmatprep.subr.mxu1 %v4436_v39  ;;  %7148 = vmatprep.mubr.msk.f32.mxu0 %vm2468_vm9, %v2366_v61 }
 0x30c   : > { %4492 = vmatpush1.msra.mxu1 %v4435_v59  ;;  %4238 = vmatpush1.msra.mxu0 %v4181_v41 }
 0x30d   : > { %4493 = vmatprep.subr.mxu1 %v4433_v17  ;;  %7149 = vmatmul.mubr.msk.f32.gmra.mxu0 %vm2468_vm9, %v2367_v27 }
 0x30e   : > { %4239 = vmatprep.subr.mxu0 %v4179_v12  ;;  %4494 = vmatpush1.msra.mxu1 %v4432_v49 }
 0x30f   : > { %4240 = vmatpush1.msra.mxu0 %v4178_v7  ;;  %7162 = vmatprep.mubr.msk.f32.mxu1 %vm2468_vm9, %v2370_v6 }
 0x310   : > { %4241 = vmatprep.subr.mxu0 %v4176_v29  ;;  %7163 = vmatmul.mubr.msk.f32.gmra.mxu1 %vm2468_vm9, %v2371_v3 }
 0x311   : > { %4242 = vmatpush1.msra.mxu0 %v4175_v51  ;;  %4275 = vmatprep.mubr.f32.mxu0 %v10157_v54 }
 0x312   : > { %6782 = vmatmul.mubr.msk.f32.vlgmr.msra.gmra.mxu0 %vm2468_vm9, %v2368_v11  ;;  %4495 = vmatprep.subr.mxu1 %v4430_v40 }
 0x313   : > { %4496 = vmatpush1.msra.mxu1 %v4429_v2  ;;  %4529 = vmatprep.mubr.f32.mxu1 %v10157_v54 }
 0x314   : > { %6790 = vmatmul.mubr.msk.f32.vlgmr.msra.gmra.mxu1 %vm2468_vm9, %v2372_v0  ;;  %4281 = vmatprep.mubr.f32.mxu0 %v10157_v54 }
 0x315   : > { %7165 = vmatprep.subr.mxu0 %v4440_v15  ;;  %4535 = vmatprep.mubr.f32.mxu1 %v10157_v54 }
 0x316   : > { %6783 = vmatmul.mubr.msk.f32.gmra.mxu0 %vm2468_vm9, %v2369_v8  ;;  %7179 = vmatprep.subr.mxu1 %v10157_v54 }
 0x317   : > { %7166 = vmatpush3.msra.mxu0 %v4440_v15  ;;  %4287 = vmatprep.mubr.f32.mxu0 %v10157_v54 }
 0x318   : > { %6791 = vmatmul.mubr.msk.f32.gmra.mxu1 %vm2468_vm9, %v2373_v14  ;;  %7167 = vmatprep.subr.mxu0 %v4437_v16 }
 0x319   : > { %7168 = vmatpush3.msra.mxu0 %v4437_v16  ;;  %4541 = vmatprep.mubr.f32.mxu1 %v10157_v54 }
 0x31a   : > { %6784 = vmatmul.mubr.msk.f32.gmra.mxu0 %vm2468_vm9, %v2370_v6  ;;  %7169 = vmatprep.subr.mxu0 %v4434_v38 }
 0x31b   : > { %7170 = vmatpush3.msra.mxu0 %v4434_v38  ;;  %4293 = vmatprep.mubr.f32.mxu0 %v10157_v54 }
 0x31c   : > { %6792 = vmatmul.mubr.msk.f32.gmra.mxu1 %vm2468_vm9, %v2374_v28  ;;  %7171 = vmatprep.subr.mxu0 %v4431_v4 }
 0x31d   : > { %7172 = vmatpush3.msra.mxu0 %v4431_v4  ;;  %4547 = vmatprep.mubr.f32.mxu1 %v10157_v54 }
 0x31e   : > { %6785 = vmatmul.mubr.msk.f32.gmra.mxu0 %vm2468_vm9, %v2371_v3 }
 0x31f   : > { %7173 = vmatprep.mubr.msk.f32.mxu0 %vm2468_vm9, %v2372_v0 }
 0x320   : > { %6793 = vmatmul.mubr.msk.f32.gmra.mxu1 %vm2468_vm9, %v2375_v46 }
 0x321   : > { %7187 = vmatprep.mubr.msk.f32.mxu1 %vm7545_vm10, %v10157_v54 }
 0x322   : > { %7174 = vmatmul.mubr.msk.f32.vlgmr.msra.gmra.mxu0 %vm2468_vm9, %v2373_v14 }
 0x323   : > { %7176 = vmatprep.mubr.msk.f32.mxu0 %vm2468_vm9, %v2374_v28 }
 0x326   : > { %7177 = vmatmul.mubr.msk.f32.gmra.mxu0 %vm2468_vm9, %v2375_v46 }
 0x327   : > { %4884 = vmatprep.mubr.f32.mxu0 %v10157_v54 }
 0x350   : > { %v7063_v18 = vpop.f32.mrf.mxu0 }
 0x352   : > { %v2636_v22 = vpop.f32.mrf.mxu0 }
 0x354   : > { %v9096_v24 = vpop.f32.mrf.mxu1  ;;  %v7066_v60 = vpop.f32.mrf.mxu0 }
 0x356   : > { %v2549_v45 = vpop.f32.mrf.mxu1  ;;  %v2646_v32 = vpop.f32.mrf.mxu0 }
 0x358   : > { %v2553_v10 = vpop.f32.mrf.mxu1 }
 0x35a   : > { %v2555_v63 = vpop.f32.mrf.mxu1 }
 0x35c   : > { %v2559_v44 = vpop.f32.mrf.mxu1 }
 0x35e   : > { %v2561_v43 = vpop.f32.mrf.mxu1 }
 0x360   : > { %v2565_v37 = vpop.f32.mrf.mxu1 }
 0x362   : > { %v2567_v5 = vpop.f32.mrf.mxu1 }
 0x372   : > { %v9104_v31 = vpop.f32.mrf.mxu0  ;;  %v7077_v55 = vpop.f32.mrf.mxu1 }
 0x373   : > { %v9106_v56 = vadd.f32 %v7077_v55, %v7063_v18 }
 0x374   : > { %v2791_v30 = vpop.f32.mrf.mxu0  ;;  %v2878_v26 = vpop.f32.mrf.mxu1 }
 0x375   : > { %v2792_v42 = vadd.f32 %v2791_v30, %v2549_v45  ;;  %v2879_v36 = vadd.f32 %v2878_v26, %v2636_v22 }
 0x378   : > { %v2795_v1 = vpop.f32.mrf.mxu0  ;;  %v7080_v33 = vpop.f32.mrf.mxu1 }
 0x379   : > { %v2796_v35 = vadd.f32 %v2795_v1, %v2553_v10  ;;  %v2894_v62 = vadd.f32 %v7080_v33, %v7066_v60 }
 0x37a   : > { %v2797_v21 = vpop.f32.mrf.mxu0  ;;  %v2888_v52 = vpop.f32.mrf.mxu1 }
 0x37b   : > { %v2798_v61 = vadd.f32 %v2797_v21, %v2555_v63  ;;  %v2889_v9 = vadd.f32 %v2888_v52, %v2646_v32 }
 0x37e   : > { %v2801_v48 = vpop.f32.mrf.mxu0  ;;  %v9108_v27 = vpop.f32.mrf.mxu1 }
 0x37f   : > { %v2802_v25 = vadd.f32 %v2801_v48, %v2559_v44 }
 0x380   : > { %v2803_v11 = vpop.f32.mrf.mxu0  ;;  %v3033_v8 = vpop.f32.mrf.mxu1 }
 0x381   : > { %v2804_v57 = vadd.f32 %v2803_v11, %v2561_v43  ;;  %v3140_v34 = vadd.f32 %v3033_v8, %v2792_v42 }
 0x382   : > { %v2807_v13 = vpop.f32.mrf.mxu0  ;;  %v3037_v47 = vpop.f32.mrf.mxu1 }
 0x383   : > { %v2808_v53 = vadd.f32 %v2807_v13, %v2565_v37  ;;  %v3142_v39 = vadd.f32 %v3037_v47, %v2796_v35 }
 0x384   : > { %v2809_v49 = vpop.f32.mrf.mxu0  ;;  %v3039_v59 = vpop.f32.mrf.mxu1 }
 0x385   : > { %v2810_v41 = vadd.f32 %v2809_v49, %v2567_v5  ;;  %v3143_v17 = vadd.f32 %v3039_v59, %v2798_v61 }
 0x386   : > { %v3043_v6 = vpop.f32.mrf.mxu1  ;;  %v9110_v12 = vpop.f32.mrf.mxu0 }
 0x387   : > { %v3145_v3 = vadd.f32 %v3043_v6, %v2802_v25 }
 0x388   : > { %v3045_v23 = vpop.f32.mrf.mxu1  ;;  %v3120_v7 = vpop.f32.mrf.mxu0 }
 0x389   : > { %v3146_v20 = vadd.f32 %v3045_v23, %v2804_v57  ;;  %v3141_v29 = vadd.f32 %v3120_v7, %v2879_v36 }
 0x38a   : > { %v7094_v40 = vpop.f32.mrf.mxu0 }
 0x38b   : > { %v3049_v51 = vpop.f32.mrf.mxu1  ;;  %v3150_v0 = vadd.f32 %v7094_v40, %v2894_v62 }
 0x38c   : > { %v3148_v2 = vadd.f32 %v3049_v51, %v2808_v53  ;;  %v3130_v15 = vpop.f32.mrf.mxu0 }
 0x38d   : > { %v3051_v50 = vpop.f32.mrf.mxu1  ;;  %v3147_v19 = vadd.f32 %v3130_v15, %v2889_v9 }
 0x38e   : > { %v3149_v14 = vadd.f32 %v3051_v50, %v2810_v41 }
 0x390   : > { %v9112_v16 = vpop.f32.mrf.mxu0 }
 0x391   : > { %v9114_v38 = vpop.f32.mrf.mxu1 }
 0x392   : > { %v3287_v28 = vpop.f32.mrf.mxu0 }
 0x393   : > { %v3394_v58 = vadd.f32 %v3287_v28, %v3140_v34  ;;  %v3374_v4 = vpop.f32.mrf.mxu1 }
 0x394   : > { %v9116_v46 = vadd.f32 %v3374_v4, %v3141_v29 }
 0x396   : > { %v7108_v45 = vpop.f32.mrf.mxu1 }
 0x397   : > { %v3291_v10 = vpop.f32.mrf.mxu0  ;;  %v3404_v63 = vadd.f32 %v7108_v45, %v3150_v0 }
 0x398   : > { %v3396_v44 = vadd.f32 %v3291_v10, %v3142_v39  ;;  %v3384_v18 = vpop.f32.mrf.mxu1 }
 0x399   : > { %v3293_v43 = vpop.f32.mrf.mxu0  ;;  %v3401_v22 = vadd.f32 %v3384_v18, %v3147_v19 }
 0x39a   : > { %v3397_v37 = vadd.f32 %v3293_v43, %v3143_v17 }
 0x39c   : > { %v9118_v60 = vpop.f32.mrf.mxu1 }
 0x39d   : > { %v3297_v5 = vpop.f32.mrf.mxu0 }
 0x39e   : > { %v3399_v32 = vadd.f32 %v3297_v5, %v3145_v3  ;;  %v3485_v55 = vpop.f32.mrf.mxu1 }
 0x39f   : > { %v3299_v30 = vpop.f32.mrf.mxu0  ;;  %v9120_v26 = vadd.f32 %v3485_v55, %v3394_v58 }
 0x3a0   : > { %v3400_v42 = vadd.f32 %v3299_v30, %v3146_v20 }
 0x3a1   : > { %v3303_v36 = vpop.f32.mrf.mxu0  ;;  %v3489_v1 = vpop.f32.mrf.mxu1 }
 0x3a2   : > { %v3402_v33 = vadd.f32 %v3303_v36, %v3148_v2  ;;  %v9122_v35 = vadd.f32 %v3489_v1, %v3396_v44 }
 0x3a3   : > { %v3305_v62 = vpop.f32.mrf.mxu0  ;;  %v3491_v21 = vpop.f32.mrf.mxu1 }
 0x3a4   : > { %v3403_v52 = vadd.f32 %v3305_v62, %v3149_v14  ;;  %v3595_v61 = vadd.f32 %v3491_v21, %v3397_v37 }
 0x3a5   : > { %v9124_v9 = vpop.f32.mrf.mxu0 }
 0x3a6   : > { %v3495_v48 = vpop.f32.mrf.mxu1 }
 0x3a7   : > { %v3597_v25 = vadd.f32 %v3495_v48, %v3399_v32  ;;  %v9126_v11 = vpop.f32.mrf.mxu0 }
 0x3a8   : > { %v3497_v8 = vpop.f32.mrf.mxu1 }
 0x3a9   : > { %v3598_v57 = vadd.f32 %v3497_v8, %v3400_v42  ;;  %v7122_v34 = vpop.f32.mrf.mxu0 }
 0x3aa   : > { %v3501_v13 = vpop.f32.mrf.mxu1  ;;  %v3602_v47 = vadd.f32 %v7122_v34, %v3404_v63  ;;  %v2790_v63 = vadd.f32 %v9104_v31, %v9096_v24 }
 0x3ab   : > { %v3600_v53 = vadd.f32 %v3501_v13, %v3402_v33  ;;  %v3582_v39 = vpop.f32.mrf.mxu0 }
 0x3ac   : > { %v3503_v49 = vpop.f32.mrf.mxu1  ;;  %v3599_v59 = vadd.f32 %v3582_v39, %v3401_v22  ;;  %v3139_v30 = vadd.f32 %v9108_v27, %v2790_v63  ;;  %v9179_v63 = vpop.permute.xlu1 %4668 }
 0x3ad   : > { %v3601_v41 = vadd.f32 %v3503_v49, %v3403_v52 }
 0x3ae   : > { %v9128_v17 = vpop.f32.mrf.mxu1  ;;  %v3393_v62 = vadd.f32 %v9112_v16, %v3139_v30 }
 0x3b0   : > { %v9130_v6 = vpop.f32.mrf.mxu1  ;;  %v3769_v23 = vpop.f32.mrf.mxu0  ;;  %v3591_v31 = vadd.f32 %v9118_v60, %v3393_v62  ;;  %v3144_v60 = vadd.f32 %v9110_v12, %v9106_v56  ;;  %v3593_v56 = vadd.f32 %v9126_v11, %v9116_v46 }
 0x3b2   : > { %v7136_v3 = vpop.f32.mrf.mxu1  ;;  %v9136_v40 = vpop.f32.mrf.mxu0  ;;  %v3877_v48 = vadd.f32 %v3769_v23, %v3591_v31  ;;  %v3398_v23 = vadd.f32 %v9114_v38, %v3144_v60 }
 0x3b3   : > { %v9132_v7 = vadd.f32 %v7136_v3, %v3602_v47 }
 0x3b4   : > { %v3868_v20 = vpop.f32.mrf.mxu1 }
 0x3b5   : > { %v9134_v29 = vadd.f32 %v3868_v20, %v3599_v59 }
 0x3b6   : > { %v4023_v51 = vpop.f32.mrf.mxu1 }
 0x3b7   : > { %v4131_v34 = vadd.f32 %v4023_v51, %v3877_v48  ;;  %v3596_v51 = vadd.f32 %v9124_v9, %v3398_v23  ;;  %v3879_v9 = vadd.f32 %v9130_v6, %v3593_v56 }
 0x3b8   : > { %v9138_v0 = vpop.f32.mrf.mxu1 }
 0x3ba   : > { %v9140_v2 = vpop.f32.mrf.mxu0 }
 0x3bb   : > { %v9142_v15 = vpop.f32.mrf.mxu1 }
 0x3bc   : > { %v3777_v50 = vpop.f32.mrf.mxu0 }
 0x3bd   : > { %v3881_v19 = vadd.f32 %v3777_v50, %v3595_v61  ;;  %v4031_v14 = vpop.f32.mrf.mxu1 }
 0x3bf   : > { %v4135_v28 = vadd.f32 %v4031_v14, %v3881_v19 }
 0x3c0   : > { %v3781_v58 = vpop.f32.mrf.mxu0 }
 0x3c1   : > { %v3883_v4 = vadd.f32 %v3781_v58, %v3597_v25  ;;  %v4035_v45 = vpop.f32.mrf.mxu1  ;;  %v10177_v58 = vld [vmem:[#allocation7_spill] sm:$0xff] }
 0x3c2   : > { %v3783_v10 = vpop.f32.mrf.mxu0 }
 0x3c3   : > { %v3884_v44 = vadd.f32 %v3783_v10, %v3598_v57  ;;  %v9146_v18 = vadd.f32 %v4035_v45, %v3883_v4  ;;  %v4037_v43 = vpop.f32.mrf.mxu1  ;;  %v9155_v57 = vpop.permute.xlu0 %4663  ;;  %v3882_v45 = vadd.f32 %v9128_v17, %v3596_v51 }
 0x3c4   : > { %v3787_v22 = vpop.f32.mrf.mxu0 }
 0x3c5   : > { %v3886_v37 = vadd.f32 %v3787_v22, %v3600_v53  ;;  %v4138_v5 = vadd.f32 %v4037_v43, %v3884_v44  ;;  %v4041_v32 = vpop.f32.mrf.mxu1 }
 0x3c6   : > { %v3789_v55 = vpop.f32.mrf.mxu0 }
 0x3c7   : > { %v3887_v42 = vadd.f32 %v3789_v55, %v3601_v41  ;;  %v4140_v36 = vadd.f32 %v4041_v32, %v3886_v37  ;;  %v4043_v1 = vpop.f32.mrf.mxu1  ;;  %v4654_v59 = vpop.permute.xlu0 %4653 }
 0x3c8   : > { %v7147_v33 = vpop.f32.mrf.mxu0  ;;  %v9188_v32 = vpop.permute.xlu1 %4658 }
 0x3c9   : > { %v4141_v21 = vadd.f32 %v4043_v1, %v3887_v42  ;;  %v7161_v52 = vpop.f32.mrf.mxu1  ;;  %v4136_v38 = vadd.f32 %v7147_v33, %v3882_v45  ;;  %v10179_v1 = vld [vmem:[#allocation8_spill] sm:$0xff] }
 0x3ca   : > { %v4112_v24 = vpop.f32.mrf.mxu0 }
 0x3cb   : > { %v4366_v61 = vpop.f32.mrf.mxu1  ;;  %v4133_v22 = vadd.f32 %v4112_v24, %v3879_v9  ;;  %v4390_v46 = vadd.f32 %v7161_v52, %v4136_v38 }
 0x3cd   : > { %v9151_v25 = vpop.f32.mrf.mxu0  ;;  %v4387_v55 = vadd.f32 %v4366_v61, %v4133_v22 }
 0x3cf   : > { %v9153_v8 = vpop.f32.mrf.mxu0 }
 0x3d0   : > { %v9157_v27 = vpop.f32.mrf.mxu1 }
 0x3d2   : > { %v4277_v13 = vpop.f32.mrf.mxu0  ;;  %v9159_v47 = vpop.f32.mrf.mxu1 }
 0x3d3   : > { %v4385_v16 = vadd.f32 %v4277_v13, %v4131_v34 }
 0x3d4   : > { %v4279_v53 = vpop.f32.mrf.mxu0  ;;  %v4531_v39 = vpop.f32.mrf.mxu1 }
 0x3d5   : > { %v4639_v49 = vadd.f32 %v4531_v39, %v4385_v16  ;;  %v4142_v16 = vadd.f32 %v9151_v25, %v9132_v7  ;;  %v10182_v7 = vld [vmem:[#allocation11_spill] sm:$0xff] }
 0x3d6   : > { %v4283_v41 = vpop.f32.mrf.mxu0  ;;  %v4533_v52 = vpop.f32.mrf.mxu1 }
 0x3d7   : > { %v4671_v3 = vadd.f32 %v4654_v59, %v4639_v49  ;;  %v4396_v60 = vadd.f32 %v9157_v27, %v4142_v16 }
 0x3d8   : > { %v4285_v20 = vpop.f32.mrf.mxu0  ;;  %v4537_v61 = vpop.f32.mrf.mxu1 }
 0x3d9   : > { %v4683_v50 = vmax.f32 %v4671_v3, 0.0  ;;  %v9164_v19 = vadd.f32 %v4285_v20, %v4135_v28 }
 0x3da   : > { %v9167_v14 = vpop.f32.mrf.mxu0  ;;  %v4539_v45 = vpop.f32.mrf.mxu1 }
 0x3db   : > { %v9170_v4 = vmul.f32 %v4683_v50, %v10177_v58 }
 0x3dc   : > { %v4291_v10 = vpop.f32.mrf.mxu0 }
 0x3dd   : > { %10178 = vst [vmem:[#allocation17_spill] sm:$0xff] %v9170_v4  ;;  %v9175_v12 = vadd.f32 %v4291_v10, %v4138_v5  ;;  %4763 = vrot.lane.b32.xlu0 %v9170_v4, %s7536_s24  ;;  %v4391_v10 = vadd.f32 %v9167_v14, %v9146_v18 }
 0x3de   : > { %v4295_v28 = vpop.f32.mrf.mxu0 }
 0x3df   : > { %v9182_v44 = vadd.f32 %v4295_v28, %v4140_v36  ;;  %v3880_v36 = vadd.f32 %v9140_v2, %v9122_v35  ;;  %v4543_v28 = vpop.f32.mrf.mxu1 }
 0x3e0   : > { %v4297_v43 = vpop.f32.mrf.mxu0  ;;  %v4645_v9 = vadd.f32 %v4543_v28, %v4391_v10 }
 0x3e1   : > { %v9184_v17 = vadd.f32 %v4297_v43, %v4141_v21  ;;  %4963 = vrot.lane.b32.xlu0 %v9170_v4, %s7537_s25  ;;  %v3878_v21 = vadd.f32 %v9136_v40, %v9120_v26  ;;  %v4134_v24 = vadd.f32 %v9142_v15, %v3880_v36 }
 0x3e2   : > { %v7175_v11 = vpop.f32.mrf.mxu0  ;;  %v4677_v14 = vadd.f32 %v9155_v57, %v4645_v9 }
 0x3e3   : > { %v4644_v37 = vadd.f32 %v7175_v11, %v4390_v46  ;;  %v4388_v35 = vadd.f32 %v4283_v41, %v4134_v24  ;;  %v4132_v31 = vadd.f32 %v9138_v0, %v3878_v21  ;;  %v4545_v46 = vpop.f32.mrf.mxu1  ;;  %v4643_v21 = vadd.f32 %v4539_v45, %v9164_v19 }
 0x3e4   : > { %v4620_v5 = vpop.f32.mrf.mxu0  ;;  %v4689_v43 = vmax.f32 %v4677_v14, 0.0 }
 0x3e5   : > { %5163 = vrot.lane.b32.xlu0 %v9170_v4, %s7538_s26  ;;  %v4676_v6 = vadd.f32 %v9188_v32, %v4644_v37  ;;  %v4641_v30 = vadd.f32 %v4620_v5, %v4387_v55  ;;  %v4386_v26 = vadd.f32 %v4279_v53, %v4132_v31  ;;  %v4642_v40 = vadd.f32 %v4537_v61, %v4388_v35 }
 0x3e6   : > { %v7178_v49 = vpop.f32.mrf.mxu0  ;;  %v9296_v11 = vmul.f32 %v4689_v43, %v10177_v58  ;;  %v4646_v37 = vadd.f32 %v4545_v46, %v9175_v12 }
 0x3e7   : > { %v4688_v42 = vmax.f32 %v4676_v6, 0.0  ;;  %v4673_v62 = vadd.f32 %v4654_v59, %v4641_v30  ;;  %v4640_v15 = vadd.f32 %v4533_v52, %v4386_v26  ;;  %v4674_v0 = vadd.f32 %v9188_v32, %v4642_v40 }
 0x3e8   : > { %v4650_v41 = vadd.f32 %v7178_v49, %v4396_v60  ;;  %v4630_v3 = vpop.f32.mrf.mxu0  ;;  %10184 = vst [vmem:[#allocation13_spill] sm:$0xff] %v9296_v11  ;;  %v4678_v55 = vadd.f32 %v9155_v57, %v4646_v37 }
 0x3e9   : > { %5366 = vrot.lane.b32.xlu0 %v9170_v4, %s7539_s10  ;;  %v9198_v33 = vmul.f32 %v4688_v42, %v10179_v1  ;;  %v4685_v2 = vmax.f32 %v4673_v62, 0.0  ;;  %v4672_v34 = vadd.f32 %v4654_v59, %v4640_v15  ;;  %v4686_v13 = vmax.f32 %v4674_v0, 0.0  ;;  %v4549_v42 = vpop.f32.mrf.mxu1  ;;  %v9387_v0 = vpop.permute.xlu1 %7404 }
 0x3ea   : > { %v4139_v59 = vadd.f32 %v9153_v8, %v9134_v29  ;;  %v4682_v29 = vadd.f32 %v9179_v63, %v4650_v41  ;;  %v4690_v6 = vmax.f32 %v4678_v55, 0.0  ;;  %v4648_v41 = vadd.f32 %v4549_v42, %v9182_v44 }
 0x3eb   : > { %4775 = vrot.lane.b32.xlu1 %v9198_v33, %s7536_s24  ;;  %v9213_v48 = vmul.f32 %v4685_v2, %v10179_v1  ;;  %v4684_v53 = vmax.f32 %v4672_v34, 0.0  ;;  %v9231_v39 = vmul.f32 %v4686_v13, %v10177_v58  ;;  %v4551_v36 = vpop.f32.mrf.mxu1 }
 0x3ec   : > { %v4393_v23 = vadd.f32 %v9159_v47, %v4139_v59  ;;  %v4694_v27 = vmax.f32 %v4682_v29, 0.0  ;;  %v9258_v47 = vpop.permute.xlu0 %7409  ;;  %v9317_v12 = vmul.f32 %v4690_v6, %v10182_v7 }
 0x3ed   : > { %5758 = vrot.lane.b32.xlu0 %v9198_v33, %s10140_s22  ;;  %10180 = vst [vmem:[#allocation16_spill] sm:$0xff] %v9213_v48  ;;  %10181 = vst [vmem:[#allocation14_spill] sm:$0xff] %v9231_v39  ;;  %v9241_v25 = vmul.f32 %v4684_v53, %v10182_v7 }
 0x3ee   : > { %v4647_v8 = vadd.f32 %v4630_v3, %v4393_v23  ;;  %v9261_v50 = vmul.f32 %v4694_v27, %v10179_v1  ;;  %10185 = vst [vmem:[#allocation10_spill] sm:$0xff] %v9317_v12 }
 0x3ef   : > { %4975 = vrot.lane.b32.xlu1 %v9198_v33, %s7537_s25  ;;  %10183 = vst [vmem:[#allocation15_spill] sm:$0xff] %v9241_v25 }
 0x3f0   : > { %v4679_v20 = vadd.f32 %v9155_v57, %v4647_v8  ;;  %v9272_v38 = vpop.permute.xlu0 %7414  ;;  %v4680_v8 = vadd.f32 %v9179_v63, %v4648_v41 }
 0x3f1   : > { %5961 = vrot.lane.b32.xlu0 %v9198_v33, %s10152_s13 }
 0x3f2   : > { %v4691_v51 = vmax.f32 %v4679_v20, 0.0  ;;  %v4692_v20 = vmax.f32 %v4680_v8, 0.0 }
 0x3f3   : > { %5175 = vrot.lane.b32.xlu1 %v9198_v33, %s7538_s26 }
 0x3f4   : > { %v9270_v56 = vmul.f32 %v4691_v51, %v10179_v1  ;;  %v9282_v18 = vpop.permute.xlu0 %7419  ;;  %v4649_v1 = vadd.f32 %v4551_v36, %v9184_v17  ;;  %v4675_v17 = vadd.f32 %v9188_v32, %v4643_v21 }
 0x3f5   : > { %5370 = vrot.lane.b32.xlu0 %v9213_v48, %s7539_s10 }
 0x3f6   : > { %v4681_v52 = vadd.f32 %v9179_v63, %v4649_v1  ;;  %v4687_v19 = vmax.f32 %v4675_v17, 0.0  ;;  %v9450_v63 = vmul.f32 %v4692_v20, %v10177_v58 }
 0x3f7   : > { %5378 = vrot.lane.b32.xlu1 %v9198_v33, %s7539_s10 }
 0x3f8   : > { %v9289_v22 = vpop.permute.xlu0 %7424  ;;  %v4693_v35 = vmax.f32 %v4681_v52, 0.0  ;;  %v9359_v32 = vmul.f32 %v4687_v19, %v10182_v7  ;;  %10198 = vst [vmem:[#allocation11_spill] sm:$0xff] %v9450_v63 }
 0x3f9   : > { %5750 = vrot.lane.b32.xlu0 %v9213_v48, %s10140_s22 }
 0x3fa   : > { %v9350_v2 = vmul.f32 %v4693_v35, %v10182_v7  ;;  %10189 = vst [vmem:[#allocation19_spill] sm:$0xff] %v9359_v32 }
 0x3fb   : > { %5746 = vrot.lane.b32.xlu1 %v9170_v4, %s10140_s22 }
 0x3fc   : > { %v9303_v5 = vpop.permute.xlu0 %7429  ;;  %10188 = vst [vmem:[#allocation9_spill] sm:$0xff] %v9350_v2 }
 0x3fd   : > { %5953 = vrot.lane.b32.xlu0 %v9213_v48, %s10152_s13 }
 0x3ff   : > { %5949 = vrot.lane.b32.xlu1 %v9170_v4, %s10152_s13 }
 0x400   : > { %v9310_v30 = vpop.permute.xlu0 %7434 }
 0x401   : > { %4771 = vrot.lane.b32.xlu0 %v9231_v39, %s7536_s24 }
 0x403   : > { %4765 = vrot.lane.b32.xlu1 %v9241_v25, %s7536_s24 }
 0x404   : > { %v9323_v57 = vpop.permute.xlu0 %7439 }
 0x405   : > { %4971 = vrot.lane.b32.xlu0 %v9231_v39, %s7537_s25 }
 0x407   : > { %4767 = vrot.lane.b32.xlu1 %v9213_v48, %s7536_s24 }
 0x408   : > { %v9330_v62 = vpop.permute.xlu0 %7444 }
 0x409   : > { %5171 = vrot.lane.b32.xlu0 %v9231_v39, %s7538_s26  ;;  %10186 = vst [vmem:[#allocation12_spill] sm:$0xff] %v9330_v62 }
 0x40b   : > { %4965 = vrot.lane.b32.xlu1 %v9241_v25, %s7537_s25 }
 0x40c   : > { %v9342_v24 = vpop.permute.xlu0 %7449 }
 0x40d   : > { %5374 = vrot.lane.b32.xlu0 %v9231_v39, %s7539_s10  ;;  %10187 = vst [vmem:[#allocation18_spill] sm:$0xff] %v9342_v24  ;;  %v7452_v7 = vunpack.i.h.bf16 %v9342_v24 }
 0x40f   : > { %4967 = vrot.lane.b32.xlu1 %v9213_v48, %s7537_s25 }
 0x410   : > { %v9352_v31 = vpop.permute.xlu0 %7454 }
 0x411   : > { %5774 = vrot.lane.b32.xlu0 %v9261_v50, %s10140_s22 }
 0x413   : > { %5165 = vrot.lane.b32.xlu1 %v9241_v25, %s7538_s26 }
 0x414   : > { %v9365_v61 = vpop.permute.xlu0 %7459 }
 0x415   : > { %4783 = vrot.lane.b32.xlu0 %v9270_v56, %s7536_s24  ;;  %10190 = vst [vmem:[#allocation20_spill] sm:$0xff] %v9365_v61 }
 0x417   : > { %5167 = vrot.lane.b32.xlu1 %v9213_v48, %s7538_s26 }
 0x419   : > { %4983 = vrot.lane.b32.xlu0 %v9270_v56, %s7537_s25 }
 0x41b   : > { %5368 = vrot.lane.b32.xlu1 %v9241_v25, %s7539_s10 }
 0x41d   : > { %5183 = vrot.lane.b32.xlu0 %v9270_v56, %s7538_s26 }
 0x41f   : > { %5748 = vrot.lane.b32.xlu1 %v9241_v25, %s10140_s22 }
 0x421   : > { %5386 = vrot.lane.b32.xlu0 %v9270_v56, %s7539_s10 }
 0x423   : > { %5951 = vrot.lane.b32.xlu1 %v9241_v25, %s10152_s13 }
 0x425   : > { %4779 = vrot.lane.b32.xlu0 %v9296_v11, %s7536_s24 }
 0x427   : > { %4791 = vrot.lane.b32.xlu1 %v9261_v50, %s7536_s24 }
 0x429   : > { %5762 = vrot.lane.b32.xlu0 %v9296_v11, %s10140_s22 }
 0x42b   : > { %4991 = vrot.lane.b32.xlu1 %v9261_v50, %s7537_s25 }
 0x42d   : > { %5965 = vrot.lane.b32.xlu0 %v9296_v11, %s10152_s13 }
 0x42f   : > { %5191 = vrot.lane.b32.xlu1 %v9261_v50, %s7538_s26 }
 0x431   : > { %4981 = vrot.lane.b32.xlu0 %v9317_v12, %s7537_s25 }
 0x433   : > { %5394 = vrot.lane.b32.xlu1 %v9261_v50, %s7539_s10 }
 0x435   : > { %5181 = vrot.lane.b32.xlu0 %v9317_v12, %s7538_s26 }
 0x437   : > { %5754 = vrot.lane.b32.xlu1 %v9231_v39, %s10140_s22 }
 0x439   : > { %5384 = vrot.lane.b32.xlu0 %v9317_v12, %s7539_s10 }
 0x43b   : > { %5977 = vrot.lane.b32.xlu1 %v9261_v50, %s10152_s13 }
 0x43d   : > { %5764 = vrot.lane.b32.xlu0 %v9317_v12, %s10140_s22 }
 0x43f   : > { %5957 = vrot.lane.b32.xlu1 %v9231_v39, %s10152_s13 }
 0x441   : > { %5967 = vrot.lane.b32.xlu0 %v9317_v12, %s10152_s13 }
 0x443   : > { %6180 = vrot.lane.b32.xlu1 %v9261_v50, %s10154_s17 }
 0x445   : > { %4789 = vrot.lane.b32.xlu0 %v9350_v2, %s7536_s24 }
 0x447   : > { %4773 = vrot.lane.b32.xlu1 %v9359_v32, %s7536_s24 }
 0x449   : > { %6170 = vrot.lane.b32.xlu0 %v9317_v12, %s10154_s17 }
 0x44b   : > { %4973 = vrot.lane.b32.xlu1 %v9359_v32, %s7537_s25 }
 0x44d   : > { %4989 = vrot.lane.b32.xlu0 %v9350_v2, %s7537_s25 }
 0x44f   : > { %v9371_v26 = vpop.permute.xlu0 %4763  ;;  %5173 = vrot.lane.b32.xlu1 %v9359_v32, %s7538_s26 }
 0x451   : > { %6168 = vrot.lane.b32.xlu0 %v9296_v11, %s10154_s17 }
 0x453   : > { %v9377_v40 = vpop.permute.xlu0 %4963  ;;  %5376 = vrot.lane.b32.xlu1 %v9359_v32, %s7539_s10 }
 0x455   : > { %5189 = vrot.lane.b32.xlu0 %v9350_v2, %s7538_s26 }
 0x457   : > { %v9383_v15 = vpop.permute.xlu0 %5163  ;;  %5766 = vrot.lane.b32.xlu1 %v9270_v56, %s10140_s22 }
 0x459   : > { %6164 = vrot.lane.b32.xlu0 %v9198_v33, %s10154_s17 }
 0x45b   : > { %v9391_v34 = vpop.permute.xlu0 %5366  ;;  %5756 = vrot.lane.b32.xlu1 %v9359_v32, %s10140_s22 }
 0x45d   : > { %5392 = vrot.lane.b32.xlu0 %v9350_v2, %s7539_s10  ;;  %v9397_v13 = vpop.permute.xlu1 %4775 }
 0x45f   : > { %v9399_v16 = vpop.permute.xlu0 %5758  ;;  %5969 = vrot.lane.b32.xlu1 %v9270_v56, %s10152_s13 }
 0x460   : > { %10191 = vst [vmem:[#allocation21_spill] sm:$0xff] %v9399_v16 }
 0x461   : > { %7464 = vrot.lane.b32.xlu0 %v10157_v54, %s10154_s17  ;;  %v9405_v53 = vpop.permute.xlu1 %4975 }
 0x463   : > { %v9407_v49 = vpop.permute.xlu0 %5961  ;;  %5959 = vrot.lane.b32.xlu1 %v9359_v32, %s10152_s13 }
 0x464   : > { %10192 = vst [vmem:[#allocation24_spill] sm:$0xff] %v9407_v49 }
 0x465   : > { %6156 = vrot.lane.b32.xlu0 %v9213_v48, %s10154_s17  ;;  %v9413_v59 = vpop.permute.xlu1 %5175 }
 0x467   : > { %v5371_v60 = vpop.permute.xlu0 %5370  ;;  %4979 = vrot.lane.b32.xlu1 %v9296_v11, %s7537_s25 }
 0x469   : > { %7469 = vrot.lane.b32.xlu0 %v10157_v54, %s10154_s17  ;;  %v9421_v3 = vpop.permute.xlu1 %5378 }
 0x46b   : > { %v5751_v23 = vpop.permute.xlu0 %5750  ;;  %5179 = vrot.lane.b32.xlu1 %v9296_v11, %s7538_s26 }
 0x46c   : > { %v9424_v29 = vsel %vm1412_vm5, %v5751_v23, %v7452_v7 }
 0x46d   : > { %10193 = vst [vmem:[#allocation22_spill] sm:$0xff] %v9424_v29  ;;  %6373 = vrot.lane.b32.xlu0 %v9317_v12, %s10194_s18  ;;  %v9433_v27 = vpop.permute.xlu1 %5746  ;;  %v7456_v29 = vunpack.i.l.bf16 %v9352_v31 }
 0x46e   : > { %10195 = vst [vmem:[#allocation23_spill] sm:$0xff] %v9433_v27 }
 0x46f   : > { %v9435_v44 = vpop.permute.xlu0 %5953  ;;  %5382 = vrot.lane.b32.xlu1 %v9296_v11, %s7539_s10 }
 0x470   : > { %10196 = vst [vmem:[#allocation7_spill] sm:$0xff] %v9435_v44 }
 0x471   : > { %6371 = vrot.lane.b32.xlu0 %v9296_v11, %s10194_s18  ;;  %v9441_v51 = vpop.permute.xlu1 %5949 }
 0x472   : > { %10197 = vst [vmem:[#allocation8_spill] sm:$0xff] %v9441_v51 }
 0x473   : > { %v9443_v45 = vpop.permute.xlu0 %4771  ;;  %4781 = vrot.lane.b32.xlu1 %v9317_v12, %s7536_s24 }
 0x475   : > { %5975 = vrot.lane.b32.xlu0 %v9350_v2, %s10152_s13  ;;  %v9452_v10 = vpop.permute.xlu1 %4765 }
 0x477   : > { %v9454_v28 = vpop.permute.xlu0 %4971  ;;  %4787 = vrot.lane.b32.xlu1 %v9450_v63, %s7536_s24 }
 0x479   : > { %6367 = vrot.lane.b32.xlu0 %v9198_v33, %s10194_s18  ;;  %v9460_v9 = vpop.permute.xlu1 %4767 }
 0x47b   : > { %v9462_v14 = vpop.permute.xlu0 %5171  ;;  %4987 = vrot.lane.b32.xlu1 %v9450_v63, %s7537_s25  ;;  %s6588_s25 = scalar_lea.hbm %s10081_s8, %s7280_s20 }
 0x47d   : > { %6178 = vrot.lane.b32.xlu0 %v9350_v2, %s10154_s17  ;;  %v4966_v58 = vpop.permute.xlu1 %4965 }
 0x47e   : > { %v9472_v46 = vsel %vm579_vm2, %v9377_v40, %v4966_v58 }
 0x47f   : > { %v9468_v43 = vpop.permute.xlu0 %5374  ;;  %5187 = vrot.lane.b32.xlu1 %v9450_v63, %s7538_s26  ;;  %s6576_s26 = scalar_lea.sflag [#allocation5], %s296_s21 }
 0x481   : > { %6385 = vrot.lane.b32.xlu0 %v10157_v54, %s10194_s18  ;;  %v4968_v37 = vpop.permute.xlu1 %4967 }
 0x482   : > { %v9479_v55 = vsel %vm579_vm2, %v4966_v58, %v4968_v37 }
 0x483   : > { %v9481_v6 = vpop.permute.xlu0 %5774  ;;  %5390 = vrot.lane.b32.xlu1 %v9450_v63, %s7539_s10  ;;  %s7473_s10 = scalar_lea.vmem %s6591_s12, 192 }
 0x484   : > { %10199 = vst [vmem:[#allocation25_spill] sm:$0xff] %v9481_v6  ;;  %p7474_p11 = scmp.ne.s32.totalorder %s6591_s12, %s7473_s10 }
 0x485   : > { %6381 = vrot.lane.b32.xlu0 %v9350_v2, %s10194_s18  ;;  %v5166_v42 = vpop.permute.xlu1 %5165 }
 0x486   : > { %v9491_v1 = vsel %vm780_vm3, %v9383_v15, %v5166_v42  ;;  %p7475_p12 = pnand %p7474_p11, %p7630_p5 }
 0x487   : > { %v9487_v36 = vpop.permute.xlu0 %4783  ;;  %5770 = vrot.lane.b32.xlu1 %v9450_v63, %s10140_s22 }
 0x488   : > { %p7476_p13 = pneg %p7475_p12 }
 0x489   : > { %6359 = vrot.lane.b32.xlu0 %v9213_v48, %s10194_s18  ;;  %v5168_v21 = vpop.permute.xlu1 %5167 }
 0x48a   : > { %v9498_v52 = vsel %vm780_vm3, %v5166_v42, %v5168_v21 }
 0x48b   : > { %v4984_v17 = vpop.permute.xlu0 %4983  ;;  %5973 = vrot.lane.b32.xlu1 %v9450_v63, %s10152_s13 }
 0x48d   : > { %6377 = vrot.lane.b32.xlu0 %v10157_v54, %s10194_s18  ;;  %v5369_v35 = vpop.permute.xlu1 %5368 }
 0x48e   : > { %v9505_v19 = vsel %vm993_vm4, %v5369_v35, %v5371_v60  ;;  %v9509_v41 = vsel %vm993_vm4, %v9391_v34, %v5369_v35 }
 0x48f   : > { %v5184_v7 = vpop.permute.xlu0 %5183  ;;  %6176 = vrot.lane.b32.xlu1 %v9450_v63, %s10154_s17 }
 0x491   : > { %6361 = vrot.lane.b32.xlu0 %v10157_v54, %s10194_s18  ;;  %v9515_v8 = vpop.permute.xlu1 %5748 }
 0x492   : > { %10200 = vst [vmem:[#allocation26_spill] sm:$0xff] %v9515_v8  ;;  %v9519_v58 = vsel %vm1412_vm5, %v9515_v8, %v5751_v23 }
 0x493   : > { %v5387_v20 = vpop.permute.xlu0 %5386  ;;  %10201 = vst [vmem:[#allocation27_spill] sm:$0xff] %v9519_v58  ;;  %6172 = vrot.lane.b32.xlu1 %v9270_v56, %s10154_s17 }
 0x495   : > { %v9523_v60 = vpop.permute.xlu1 %5951 }
 0x496   : > { %10202 = vst [vmem:[#allocation28_spill] sm:$0xff] %v9523_v60  ;;  %v9530_v42 = vsel %vm1625_vm6, %v9523_v60, %v9435_v44 }
 0x497   : > { %v9525_v37 = vpop.permute.xlu0 %4779  ;;  %10203 = vst [vmem:[#allocation29_spill] sm:$0xff] %v9530_v42  ;;  %6162 = vrot.lane.b32.xlu1 %v9359_v32, %s10154_s17 }
 0x499   : > { %v4792_v21 = vpop.permute.xlu1 %4791 }
 0x49b   : > { %v5763_v35 = vpop.permute.xlu0 %5762  ;;  %6160 = vrot.lane.b32.xlu1 %v9231_v39, %s10154_s17 }
 0x49d   : > { %v9536_v23 = vpop.permute.xlu1 %4991 }
 0x49f   : > { %v5966_v51 = vpop.permute.xlu0 %5965  ;;  %6154 = vrot.lane.b32.xlu1 %v9241_v25, %s10154_s17 }
 0x4a1   : > { %v9540_v58 = vpop.permute.xlu1 %5191 }
 0x4a3   : > { %v9542_v27 = vpop.permute.xlu0 %4981  ;;  %5772 = vrot.lane.b32.xlu1 %v9350_v2, %s10140_s22  ;;  %s7546_s22 = smov [#allocation4]  }
 0x4a4   : > { %v9546_v42 = vsel %vm579_vm2, %v9542_v27, %v4984_v17  ;;  %s7477_s13 = sshll.u32 %s7546_s22, 4  ;;  %s7478_s13 = int_to_ptr.vmem [resolvable:$false] %s7477_s13 }
 0x4a5   : > { %v9550_v60 = vpop.permute.xlu1 %5394  ;;  %s7479_s9 = scalar_lea.vmem %s7478_s13, 384  ;;  %p7480_p0 = scmp.lt.s32.totalorder %s6591_s12, %s7478_s13 }
 0x4a6   : > { %p7481_p1 = scmp.lt.s32.totalorder %s7479_s9, %s7473_s10 }
 0x4a7   : > { %v9552_v8 = vpop.permute.xlu0 %5181  ;;  %6152 = vrot.lane.b32.xlu1 %v9170_v4, %s10154_s17 }
 0x4a8   : > { %v9556_v44 = vsel %vm780_vm3, %v9552_v8, %v5184_v7  ;;  %p7482_p2 = por %p7481_p1, %p7480_p0 }
 0x4a9   : > { %v5755_v49 = vpop.permute.xlu1 %5754 }
 0x4aa   : > { %p7483_p3 = pnand %p7482_p2, %p7476_p13 }
 0x4ab   : > { %v9560_v61 = vpop.permute.xlu0 %5384  ;;  %6383 = vrot.lane.b32.xlu1 %v9261_v50, %s10194_s18 }
 0x4ac   : > { %v9564_v17 = vsel %vm993_vm4, %v9560_v61, %v5387_v20 }
 0x4ad   : > { %v9569_v16 = vpop.permute.xlu1 %5977 }
 0x4ae   : > { %10204 = vst [vmem:[#allocation30_spill] sm:$0xff] %v9569_v16  ;;  %v9573_v7 = vsel %vm1625_vm6, %v9569_v16, %v7456_v29 }
 0x4af   : > { %10205 = vst [vmem:[#allocation31_spill] sm:$0xff] %v9573_v7  ;;  %v5765_v11 = vpop.permute.xlu0 %5764  ;;  %6379 = vrot.lane.b32.xlu1 %v9450_v63, %s10194_s18 }
 0x4b0   : > { %v9576_v12 = vsel %vm1412_vm5, %v5763_v35, %v5765_v11 }
 0x4b1   : > { %10206 = vst [vmem:[#allocation32_spill] sm:$0xff] %v9576_v12  ;;  %v5958_v20 = vpop.permute.xlu1 %5957 }
 0x4b3   : > { %v5968_v6 = vpop.permute.xlu0 %5967  ;;  %6375 = vrot.lane.b32.xlu1 %v9270_v56, %s10194_s18 }
 0x4b4   : > { %v9581_v24 = vsel %vm1625_vm6, %v5966_v51, %v5968_v6 }
 0x4b5   : > { %10207 = vst [vmem:[#allocation33_spill] sm:$0xff] %v9581_v24  ;;  %v9585_v48 = vpop.permute.xlu1 %6180 }
 0x4b6   : > { %10208 = vst [vmem:[#allocation34_spill] sm:$0xff] %v9585_v48 }
 0x4b7   : > { %v4790_v2 = vpop.permute.xlu0 %4789  ;;  %6365 = vrot.lane.b32.xlu1 %v9359_v32, %s10194_s18 }
 0x4b8   : > { %v4804_v29 = vsel %vm377_vm1, %v4790_v2, %v4792_v21  ;;  %v4728_v21 = vld [vmem:[%s10080_s7] sm:$0xf] }
 0x4b9   : > { %7180 = vmatpush3.msra.mxu1 %v4804_v29  ;;  %v4774_v35 = vpop.permute.xlu1 %4773 }
 0x4ba   : > { %7181 = vmatprep.subr.mxu1 %v10157_v54 }
 0x4bb   : > { %6363 = vrot.lane.b32.xlu1 %v9231_v39, %s10194_s18  ;;  %v9608_v29 = vpop.permute.xlu0 %6170  ;;  %v7457_v39 = vunpack.i.h.bf16 %v9352_v31 }
 0x4bc   : > { %10209 = vst [vmem:[#allocation35_spill] sm:$0xff] %v9608_v29 }
 0x4bd   : > { %v9593_v51 = vpop.permute.xlu1 %4973 }
 0x4bf   : > { %6357 = vrot.lane.b32.xlu1 %v9241_v25, %s10194_s18  ;;  %v4990_v25 = vpop.permute.xlu0 %4989 }
 0x4c1   : > { %v9597_v24 = vpop.permute.xlu1 %5173 }
 0x4c3   : > { %6355 = vrot.lane.b32.xlu1 %v9170_v4, %s10194_s18  ;;  %v9629_v62 = vpop.permute.xlu0 %6168 }
 0x4c4   : > { %10214 = vst [vmem:[#allocation40_spill] sm:$0xff] %v9629_v62 }
 0x4c5   : > { %v9601_v16 = vpop.permute.xlu1 %5376 }
 0x4c7   : > { %6369 = vrot.lane.b32.xlu1 %v10157_v54, %s10194_s18 }
 0x4c9   : > { %v9610_v48 = vpop.permute.xlu1 %5766 }
 0x4ca   : > { %v9614_v12 = vsel %vm1412_vm5, %v5765_v11, %v9610_v48 }
 0x4cb   : > { %10210 = vst [vmem:[#allocation36_spill] sm:$0xff] %v9614_v12  ;;  %6560 = vperm.xlu1 %7332, %v4728_v21  }
 0x4cd   : > { %v9616_v7 = vpop.permute.xlu1 %5756 }
 0x4ce   : > { %10211 = vst [vmem:[#allocation37_spill] sm:$0xff] %v9616_v7  ;;  %v9620_v4 = vsel %vm1412_vm5, %v5755_v49, %v9616_v7 }
 0x4cf   : > { %10212 = vst [vmem:[#allocation38_spill] sm:$0xff] %v9620_v4  ;;  %v9639_v4 = vpop.permute.xlu0 %5189 }
 0x4d1   : > { %v5970_v32 = vpop.permute.xlu1 %5969 }
 0x4d2   : > { %v9624_v63 = vsel %vm1625_vm6, %v5970_v32, %v7457_v39  ;;  %v9627_v29 = vsel %vm1625_vm6, %v5968_v6, %v5970_v32 }
 0x4d3   : > { %10213 = vst [vmem:[#allocation39_spill] sm:$0xff] %v9627_v29  ;;  %v9643_v7 = vpop.permute.xlu0 %6164  ;;  %v4795_v29 = vsel %vm377_vm1, %v9452_v10, %v9460_v9 }
 0x4d4   : > { %10217 = vst [vmem:[#allocation43_spill] sm:$0xff] %v9643_v7 }
 0x4d5   : > { %v9631_v11 = vpop.permute.xlu1 %5959 }
 0x4d6   : > { %10215 = vst [vmem:[#allocation41_spill] sm:$0xff] %v9631_v11  ;;  %v9635_v21 = vsel %vm1625_vm6, %v5958_v20, %v9631_v11  ;;  %v7406_v20 = vunpack.i.l.bf16 %v9387_v0 }
 0x4d7   : > { %10216 = vst [vmem:[#allocation42_spill] sm:$0xff] %v9635_v21  ;;  %v9649_v62 = vpop.permute.xlu0 %5392  ;;  %v4798_v21 = vsel %vm377_vm1, %v4774_v35, %v9397_v13  ;;  %v7407_v13 = vunpack.i.h.bf16 %v9387_v0 }
 0x4d9   : > { %v9637_v49 = vpop.permute.xlu1 %4979 }
 0x4db   : > { %v9674_v12 = vpop.permute.xlu0 %7464 }
 0x4dd   : > { %v9641_v31 = vpop.permute.xlu1 %5179 }
 0x4e1   : > { %v9645_v39 = vpop.permute.xlu1 %5382 }
 0x4e5   : > { %v4782_v32 = vpop.permute.xlu1 %4781 }
 0x4e6   : > { %v4801_v6 = vsel %vm377_vm1, %v4782_v32, %v9487_v36  ;;  %v4800_v9 = vsel %vm377_vm1, %v9525_v37, %v4782_v32  ;;  %v9694_v32 = vpop.permute.xlu0 %6156 }
 0x4e7   : > { %7182 = vmatpush3.msra.mxu1 %v4801_v6  ;;  %v4720_v6 = vld [vmem:[%s10079_s6 + $0x4] sm:$0xf] }
 0x4e8   : > { %7183 = vmatprep.subr.mxu1 %v10157_v54 }
 0x4e9   : > { %v4788_v11 = vpop.permute.xlu1 %4787  ;;  %7184 = vmatpush3.msra.mxu1 %v4798_v21  ;;  %v7412_v21 = vunpack.i.h.bf16 %v9258_v47 }
 0x4ea   : > { %v4802_v7 = vsel %vm377_vm1, %v7406_v20, %v4788_v11  ;;  %7185 = vmatprep.subr.mxu1 %v10157_v54  ;;  %v4803_v36 = vsel %vm377_vm1, %v4788_v11, %v4790_v2  ;;  %v7411_v20 = vunpack.i.l.bf16 %v9258_v47  ;;  %v4799_v2 = vsel %vm377_vm1, %v7407_v13, %v9525_v37 }
 0x4eb   : > { %4844 = vmatprep.subr.mxu0 %v4803_v36  ;;  %7186 = vmatpush3.msra.mxu1 %v4795_v29  ;;  %v5004_v11 = vsel %vm579_vm2, %v4990_v25, %v9536_v23  ;;  %v4794_v37 = vsel %vm377_vm1, %v9371_v26, %v9452_v10  ;;  %v4793_v23 = vsel %vm377_vm1, %v7412_v21, %v9371_v26  ;;  %v7416_v29 = vunpack.i.l.bf16 %v9272_v38 }
 0x4ec   : > { %4845 = vmatpush1.msra.mxu0 %v4802_v7  ;;  %7190 = vmatprep.subr.mxu1 %v10157_v54  ;;  %v4797_v7 = vsel %vm377_vm1, %v9443_v45, %v4774_v35  ;;  %v4796_v47 = vsel %vm377_vm1, %v7411_v20, %v9443_v45  ;;  %v4998_v35 = vsel %vm579_vm2, %v9593_v51, %v9405_v53  ;;  %v7417_v26 = vunpack.i.h.bf16 %v9272_v38  ;;  %v4719_v53 = vld [vmem:[%s10079_s6] sm:$0xf] }
 0x4ed   : > { %v4988_v0 = vpop.permute.xlu1 %4987  ;;  %4846 = vmatprep.subr.mxu0 %v4800_v9  ;;  %7188 = vmatmul.mubr.msk.f32.vlgmr.msra.gmra.mxu1 %vm2468_vm9, %v4720_v6  ;;  %v5000_v38 = vsel %vm579_vm2, %v9637_v49, %v9542_v27  ;;  %v7422_v36 = vunpack.i.h.bf16 %v9282_v18  ;;  %v5204_v13 = vsel %vm780_vm3, %v9639_v4, %v9540_v58  ;;  %v4997_v27 = vsel %vm579_vm2, %v9454_v28, %v9593_v51 }
 0x4ee   : > { %7191 = vmatpush3.msra.mxu1 %v5004_v11  ;;  %4847 = vmatpush1.msra.mxu0 %v4799_v2  ;;  %v5002_v10 = vsel %vm579_vm2, %v7416_v29, %v4988_v0  ;;  %v7426_v51 = vunpack.i.l.bf16 %v9289_v22  ;;  %v5407_v11 = vsel %vm993_vm4, %v9649_v62, %v9550_v60 }
 0x4ef   : > { %7192 = vmatprep.subr.mxu1 %v10157_v54  ;;  %4848 = vmatprep.subr.mxu0 %v4797_v7  ;;  %v4993_v58 = vsel %vm579_vm2, %v7422_v36, %v9377_v40  ;;  %v7436_v7 = vunpack.i.l.bf16 %v9310_v30 }
 0x4f0   : > { %7193 = vmatpush3.msra.mxu1 %v9546_v42  ;;  %4849 = vmatpush1.msra.mxu0 %v4796_v47  ;;  %v5003_v42 = vsel %vm579_vm2, %v4988_v0, %v4990_v25 }
 0x4f1   : > { %7194 = vmatprep.subr.mxu1 %v10157_v54  ;;  %v5188_v45 = vpop.permute.xlu1 %5187  ;;  %4850 = vmatprep.subr.mxu0 %v4794_v37  ;;  %v7441_v37 = vunpack.i.l.bf16 %v9323_v57 }
 0x4f2   : > { %7195 = vmatpush3.msra.mxu1 %v4998_v35  ;;  %4851 = vmatpush1.msra.mxu0 %v4793_v23  ;;  %v5203_v21 = vsel %vm780_vm3, %v5188_v45, %v9639_v4  ;;  %v5200_v4 = vsel %vm780_vm3, %v9641_v31, %v9552_v8  ;;  %v5197_v8 = vsel %vm780_vm3, %v9462_v14, %v9597_v24 }
 0x4f3   : > { %7196 = vmatprep.subr.mxu1 %v10157_v54  ;;  %5044 = vmatprep.subr.mxu0 %v5003_v42  ;;  %v5399_v35 = vsel %vm993_vm4, %v7441_v37, %v9468_v43  ;;  %v10222_v42 = vld [vmem:[#allocation18_spill] sm:$0xff]  ;;  %v7467_v37 = vunpack.i.h.bf16 %v9674_v12 }
 0x4f4   : > { %7197 = vmatpush3.msra.mxu1 %v9479_v55  ;;  %6798 = vmatmul.mubr.msk.f32.vlgmr.msra.gmra.mxu0 %vm2468_vm9, %v4720_v6  ;;  %v7421_v55 = vunpack.i.l.bf16 %v9282_v18  ;;  %v4999_v6 = vsel %vm579_vm2, %v7417_v26, %v9637_v49  ;;  %v9725_v49 = vpop.permute.xlu0 %7469  ;;  %v7451_v26 = vunpack.i.l.bf16 %v10222_v42 }
 0x4f5   : > { %5045 = vmatpush1.msra.mxu0 %v5002_v10  ;;  %7198 = vmatprep.mubr.msk.f32.mxu1 %vm7545_vm10, %v10157_v54  ;;  %v9706_v25 = vpop.permute.xlu1 %5390  ;;  %v10223_v10 = vld [vmem:[#allocation25_spill] sm:$0xff] }
 0x4f6   : > { %7201 = vmatprep.subr.mxu1 %v10157_v54  ;;  %5046 = vmatprep.subr.mxu0 %v5000_v38  ;;  %v4996_v18 = vsel %vm579_vm2, %v7421_v55, %v9454_v28  ;;  %v5198_v28 = vsel %vm780_vm3, %v9597_v24, %v9413_v59  ;;  %v5202_v59 = vsel %vm780_vm3, %v7426_v51, %v5188_v45  ;;  %v10220_v45 = vld [vmem:[#allocation16_spill] sm:$0xff]  ;;  %v10225_v55 = vld [vmem:[#allocation13_spill] sm:$0xff] }
 0x4f7   : > { %7199 = vmatmul.mubr.msk.f32.vlgmr.msra.gmra.mxu1 %vm2468_vm9, %v4719_v53  ;;  %5047 = vmatpush1.msra.mxu0 %v4999_v6  ;;  %v5401_v24 = vsel %vm993_vm4, %v9601_v16, %v9421_v3  ;;  %v7437_v3 = vunpack.i.h.bf16 %v9310_v30  ;;  %v7442_v30 = vunpack.i.h.bf16 %v9323_v57  ;;  %v10230_v51 = vld [vmem:[#allocation17_spill] sm:$0xff] }
 0x4f8   : > { %7202 = vmatpush3.msra.mxu1 %v5204_v13  ;;  %5048 = vmatprep.subr.mxu0 %v4997_v27  ;;  %v9752_v20 = vpop.permute.xlu0 %6373  ;;  %v10226_v13 = vld [vmem:[#allocation19_spill] sm:$0xff]  ;;  %v10227_v27 = vld [vmem:[#allocation21_spill] sm:$0xff] }
 0x4f9   : > { %7203 = vmatprep.subr.mxu1 %v10157_v54  ;;  %5049 = vmatpush1.msra.mxu0 %v4996_v18  ;;  %v9728_v9 = vpop.permute.xlu1 %5770  ;;  %v5783_v18 = vsel %vm1412_vm5, %v10227_v27, %v7451_v26 }
 0x4fa   : > { %7204 = vmatpush3.msra.mxu1 %v9556_v44  ;;  %5050 = vmatprep.subr.mxu0 %v9472_v46  ;;  %v7427_v44 = vunpack.i.h.bf16 %v9289_v22  ;;  %v4721_v46 = vld [vmem:[%s10079_s6 + $0x8] sm:$0xf]  ;;  %v7432_v22 = vunpack.i.h.bf16 %v9303_v5 }
 0x4fb   : > { %7205 = vmatprep.subr.mxu1 %v10157_v54  ;;  %5051 = vmatpush1.msra.mxu0 %v4993_v58  ;;  %v10228_v58 = vld [vmem:[#allocation14_spill] sm:$0xff] }
 0x4fc   : > { %7206 = vmatpush3.msra.mxu1 %v5198_v28  ;;  %5084 = vmatprep.mubr.f32.mxu0 %v10157_v54  ;;  %v5199_v2 = vsel %vm780_vm3, %v7427_v44, %v9641_v31  ;;  %v5193_v60 = vsel %vm780_vm3, %v7432_v22, %v9383_v15  ;;  %v9783_v31 = vpop.permute.xlu0 %6371  ;;  %v5406_v15 = vsel %vm993_vm4, %v9706_v25, %v9649_v62  ;;  %v10229_v28 = vld [vmem:[#allocation15_spill] sm:$0xff] }
 0x4fd   : > { %7207 = vmatprep.subr.mxu1 %v10157_v54  ;;  %5244 = vmatprep.subr.mxu0 %v5203_v21  ;;  %v9743_v40 = vpop.permute.xlu1 %5973  ;;  %v5403_v62 = vsel %vm993_vm4, %v9645_v39, %v9560_v61  ;;  %v5400_v61 = vsel %vm993_vm4, %v9468_v43, %v9601_v16  ;;  %v10218_v16 = vld [vmem:[#allocation12_spill] sm:$0xff]  ;;  %v4724_v21 = vld [vmem:[%s10079_s6 + $0x14] sm:$0xf] }
 0x4fe   : > { %7208 = vmatpush3.msra.mxu1 %v9498_v52  ;;  %6800 = vmatmul.mubr.msk.f32.vlgmr.msra.gmra.mxu0 %vm2468_vm9, %v4719_v53  ;;  %v7431_v52 = vunpack.i.l.bf16 %v9303_v5  ;;  %v7446_v43 = vunpack.i.l.bf16 %v10218_v16  ;;  %v7447_v29 = vunpack.i.h.bf16 %v10218_v16  ;;  %v10242_v16 = vld [vmem:[#allocation23_spill] sm:$0xff] }
 0x4ff   : > { %5245 = vmatpush1.msra.mxu0 %v5202_v59  ;;  %7209 = vmatprep.mubr.msk.f32.mxu1 %vm7545_vm10, %v10157_v54  ;;  %v10231_v59 = vld [vmem:[#allocation22_spill] sm:$0xff] }
 0x500   : > { %7212 = vmatprep.subr.mxu1 %v10157_v54  ;;  %5246 = vmatprep.subr.mxu0 %v5200_v4  ;;  %v5196_v5 = vsel %vm780_vm3, %v7431_v52, %v9462_v14  ;;  %v9814_v23 = vpop.permute.xlu0 %5975  ;;  %v5789_v53 = vsel %vm1412_vm5, %v10223_v10, %v7446_v43  ;;  %v5786_v36 = vsel %vm1412_vm5, %v9610_v48, %v7447_v29  ;;  %v10232_v4 = vld [vmem:[#allocation20_spill] sm:$0xff]  ;;  %v10244_v29 = vld [vmem:[#allocation30_spill] sm:$0xff] }
 0x501   : > { %7210 = vmatmul.mubr.msk.f32.vlgmr.msra.gmra.mxu1 %vm2468_vm9, %v4721_v46  ;;  %5247 = vmatpush1.msra.mxu0 %v5199_v2  ;;  %v9771_v0 = vpop.permute.xlu1 %6176  ;;  %v7461_v22 = vunpack.i.l.bf16 %v10232_v4  ;;  %v5991_v42 = vsel %vm1625_vm6, %v9814_v23, %v10244_v29 }
 0x502   : > { %7213 = vmatpush3.msra.mxu1 %v5407_v11  ;;  %5248 = vmatprep.subr.mxu0 %v5197_v8  ;;  %v10233_v11 = vld [vmem:[#allocation31_spill] sm:$0xff]  ;;  %v7462_v8 = vunpack.i.h.bf16 %v10232_v4 }
 0x503   : > { %7214 = vmatprep.subr.mxu1 %v10157_v54  ;;  %5249 = vmatpush1.msra.mxu0 %v5196_v5  ;;  %v10235_v5 = vld [vmem:[#allocation24_spill] sm:$0xff] }
 0x504   : > { %7215 = vmatpush3.msra.mxu1 %v9564_v17  ;;  %5250 = vmatprep.subr.mxu0 %v9491_v1  ;;  %v5405_v1 = vsel %vm993_vm4, %v7436_v7, %v9706_v25  ;;  %v4722_v17 = vld [vmem:[%s10079_s6 + $0xc] sm:$0xf]  ;;  %v10224_v25 = vld [vmem:[#allocation10_spill] sm:$0xff]  ;;  %v10236_v7 = vld [vmem:[#allocation32_spill] sm:$0xff] }
 0x505   : > { %7216 = vmatprep.subr.mxu1 %v10157_v54  ;;  %5251 = vmatpush1.msra.mxu0 %v5193_v60  ;;  %v9786_v14 = vpop.permute.xlu1 %6172  ;;  %v5986_v60 = vsel %vm1625_vm6, %v10235_v5, %v7461_v22 }
 0x506   : > { %7217 = vmatpush3.msra.mxu1 %v5401_v24  ;;  %5284 = vmatprep.mubr.f32.mxu0 %v10157_v54  ;;  %v7466_v24 = vunpack.i.l.bf16 %v9674_v12  ;;  %v7472_v12 = vunpack.i.h.bf16 %v9725_v49 }
 0x507   : > { %7218 = vmatprep.subr.mxu1 %v10157_v54  ;;  %6802 = vmatmul.mubr.msk.f32.vlgmr.msra.gmra.mxu0 %vm2468_vm9, %v4721_v46 }
 0x508   : > { %5447 = vmatprep.subr.mxu0 %v5406_v15  ;;  %7219 = vmatpush3.msra.mxu1 %v9505_v19  ;;  %v5402_v19 = vsel %vm993_vm4, %v7437_v3, %v9645_v39  ;;  %v5396_v39 = vsel %vm993_vm4, %v7442_v30, %v9391_v34  ;;  %v4723_v34 = vld [vmem:[%s10079_s6 + $0x10] sm:$0xf]  ;;  %v10237_v15 = vld [vmem:[#allocation37_spill] sm:$0xff] }
 0x509   : > { %5448 = vmatpush1.msra.mxu0 %v5405_v1  ;;  %7220 = vmatprep.mubr.msk.f32.mxu1 %vm7545_vm10, %v10157_v54  ;;  %v9807_v47 = vpop.permute.xlu1 %6162  ;;  %v5782_v3 = vsel %vm1412_vm5, %v10237_v15, %v10227_v27 }
 0x50a   : > { %7223 = vmatprep.subr.mxu1 %v10157_v54  ;;  %5449 = vmatprep.subr.mxu0 %v5403_v62 }
 0x50b   : > { %7221 = vmatmul.mubr.msk.f32.vlgmr.msra.gmra.mxu1 %vm2468_vm9, %v4722_v17  ;;  %5450 = vmatpush1.msra.mxu0 %v5402_v19  ;;  %v10239_v19 = vld [vmem:[#allocation38_spill] sm:$0xff] }
 0x50c   : > { %7224 = vmatpush3.msra.mxu1 %v9261_v50  ;;  %5451 = vmatprep.subr.mxu0 %v5400_v61  ;;  %v9833_v50 = vpop.permute.xlu0 %6367  ;;  %v10240_v61 = vld [vmem:[#allocation34_spill] sm:$0xff] }
 0x50d   : > { %7225 = vmatprep.subr.mxu1 %v10157_v54  ;;  %5452 = vmatpush1.msra.mxu0 %v5399_v35  ;;  %v9824_v57 = vpop.permute.xlu1 %6160  ;;  %v6195_v35 = vsel %vm1838_vm7, %v10240_v61, %v7466_v24 }
 0x50e   : > { %7226 = vmatpush3.msra.mxu1 %v9270_v56  ;;  %5453 = vmatprep.subr.mxu0 %v9509_v41  ;;  %v10219_v41 = vld [vmem:[#allocation9_spill] sm:$0xff] }
 0x50f   : > { %7227 = vmatprep.subr.mxu1 %v10157_v54  ;;  %5454 = vmatpush1.msra.mxu0 %v5396_v39 }
 0x510   : > { %7228 = vmatpush3.msra.mxu1 %v9198_v33  ;;  %5487 = vmatprep.mubr.f32.mxu0 %v10157_v54  ;;  %v10221_v33 = vld [vmem:[#allocation11_spill] sm:$0xff]  ;;  %v9859_v6 = vpop.permute.xlu0 %6178 }
 0x511   : > { %7229 = vmatprep.subr.mxu1 %v10157_v54  ;;  %6804 = vmatmul.mubr.msk.f32.vlgmr.msra.gmra.mxu0 %vm2468_vm9, %v4722_v17  ;;  %v9840_v56 = vpop.permute.xlu1 %6154  ;;  %v10238_v17 = vld [vmem:[#allocation7_spill] sm:$0xff]  ;;  %v6194_v22 = vsel %vm1838_vm7, %v9859_v6, %v10240_v61 }
 0x512   : > { %5594 = vmatprep.subr.mxu0 %v10219_v41  ;;  %7230 = vmatpush3.msra.mxu1 %v10220_v45  ;;  %v5983_v62 = vsel %vm1625_vm6, %v10238_v17, %v7462_v8  ;;  %v7471_v41 = vunpack.i.l.bf16 %v9725_v49  ;;  %v10243_v45 = vld [vmem:[#allocation27_spill] sm:$0xff] }
 0x513   : > { %7231 = vmatprep.mubr.msk.f32.mxu1 %vm7545_vm10, %v10157_v54  ;;  %5595 = vmatpush1.msra.mxu0 %v10221_v33  ;;  %v6192_v33 = vsel %vm1838_vm7, %v9786_v14, %v7467_v37 }
 0x514   : > { %7232 = vmatmul.mubr.msk.f32.vlgmr.msra.gmra.mxu1 %vm2468_vm9, %v4723_v34  ;;  %7234 = vmatprep.subr.mxu1 %v10157_v54  ;;  %v9884_v52 = vpop.permute.xlu0 %6385 }
 0x515   : > { %5596 = vmatprep.subr.mxu0 %v10224_v25  ;;  %7235 = vmatpush3.msra.mxu1 %v5789_v53  ;;  %v5773_v38 = vpop.permute.xlu1 %5772  ;;  %v10245_v53 = vld [vmem:[#allocation43_spill] sm:$0xff] }
 0x516   : > { %5597 = vmatpush1.msra.mxu0 %v10225_v55  ;;  %7236 = vmatprep.subr.mxu1 %v10157_v54  ;;  %v5788_v44 = vsel %vm1412_vm5, %v5773_v38, %v10223_v10  ;;  %v5787_v46 = vsel %vm1412_vm5, %v9728_v9, %v5773_v38  ;;  %v10234_v9 = vld [vmem:[#allocation36_spill] sm:$0xff]  ;;  %v5990_v10 = vsel %vm1625_vm6, %v9743_v40, %v9814_v23  ;;  %v10246_v38 = vld [vmem:[#allocation39_spill] sm:$0xff]  ;;  %v10248_v55 = vld [vmem:[#allocation41_spill] sm:$0xff] }
 0x517   : > { %5598 = vmatprep.subr.mxu0 %v10226_v13  ;;  %7237 = vmatpush3.msra.mxu1 %v5786_v36  ;;  %v6189_v25 = vsel %vm1838_vm7, %v10245_v53, %v7471_v41  ;;  %v10247_v36 = vld [vmem:[#allocation33_spill] sm:$0xff]  ;;  %v5985_v40 = vsel %vm1625_vm6, %v10248_v55, %v10235_v5  ;;  %v6186_v23 = vsel %vm1838_vm7, %v9694_v32, %v7472_v12  ;;  %v4726_v13 = vld [vmem:[%s10079_s6 + $0x1c] sm:$0xf] }
 0x518   : > { %5599 = vmatpush1.msra.mxu0 %v10228_v58  ;;  %7238 = vmatprep.subr.mxu1 %v10157_v54  ;;  %v9910_v30 = vpop.permute.xlu0 %6381 }
 0x519   : > { %5600 = vmatprep.subr.mxu0 %v10229_v28  ;;  %7239 = vmatpush3.msra.mxu1 %v5783_v18  ;;  %v9867_v48 = vpop.permute.xlu1 %6152  ;;  %v10249_v18 = vld [vmem:[#allocation42_spill] sm:$0xff] }
 0x51a   : > { %5601 = vmatpush1.msra.mxu0 %v10230_v51  ;;  %5634 = vmatprep.mubr.f32.mxu0 %v10157_v54  ;;  %v10250_v51 = vld [vmem:[#allocation28_spill] sm:$0xff]  ;;  %v6184_v24 = vsel %vm1838_vm7, %v9867_v48, %v9840_v56 }
 0x51b   : > { %7240 = vmatprep.subr.mxu1 %v10157_v54  ;;  %6806 = vmatmul.mubr.msk.f32.vlgmr.msra.gmra.mxu0 %vm2468_vm9, %v4723_v34  ;;  %v10241_v34 = vld [vmem:[#allocation26_spill] sm:$0xff] }
 0x51c   : > { %7241 = vmatpush3.msra.mxu1 %v10231_v59  ;;  %7242 = vmatprep.mubr.msk.f32.mxu1 %vm7545_vm10, %v10157_v54  ;;  %v5778_v43 = vsel %vm1412_vm5, %v10242_v16, %v10241_v34  ;;  %v9937_v26 = vpop.permute.xlu0 %6359 }
 0x51d   : > { %7243 = vmatmul.mubr.msk.f32.vlgmr.msra.gmra.mxu1 %vm2468_vm9, %v4724_v21  ;;  %7245 = vmatprep.subr.mxu1 %v10157_v54  ;;  %v9888_v2 = vpop.permute.xlu1 %6383 }
 0x51e   : > { %7246 = vmatpush3.msra.mxu1 %v10233_v11  ;;  %5829 = vmatprep.subr.mxu0 %v5788_v44  ;;  %v6398_v28 = vsel %vm2051_vm8, %v9888_v2, %v9884_v52  ;;  %v6193_v52 = vsel %vm1838_vm7, %v9771_v0, %v9859_v6  ;;  %v10253_v11 = vld [vmem:[#allocation35_spill] sm:$0xff]  ;;  %v6188_v0 = vsel %vm1838_vm7, %v9807_v47, %v10245_v53 }
 0x51f   : > { %7247 = vmatprep.subr.mxu1 %v10157_v54  ;;  %5830 = vmatpush1.msra.mxu0 %v5787_v46  ;;  %v10252_v46 = vld [vmem:[#allocation29_spill] sm:$0xff]  ;;  %v6191_v8 = vsel %vm1838_vm7, %v10253_v11, %v9786_v14  ;;  %v6187_v14 = vsel %vm1838_vm7, %v9824_v57, %v9807_v47  ;;  %v6185_v6 = vsel %vm1838_vm7, %v9840_v56, %v9694_v32 }
 0x520   : > { %7248 = vmatpush3.msra.mxu1 %v9624_v63  ;;  %5831 = vmatprep.subr.mxu0 %v10234_v9  ;;  %v4725_v63 = vld [vmem:[%s10079_s6 + $0x18] sm:$0xf]  ;;  %v6378_v58 = vpop.permute.xlu0 %6377  ;;  %v10254_v9 = vld [vmem:[#allocation40_spill] sm:$0xff]  ;;  %v6397_v15 = vsel %vm2051_vm8, %v9910_v30, %v9888_v2  ;;  %v6393_v56 = vsel %vm2051_vm8, %v9783_v31, %v9752_v20 }
 0x521   : > { %7249 = vmatprep.subr.mxu1 %v10157_v54  ;;  %5832 = vmatpush1.msra.mxu0 %v10236_v7  ;;  %v9903_v1 = vpop.permute.xlu1 %6379  ;;  %v6190_v5 = vsel %vm1838_vm7, %v10254_v9, %v10253_v11 }
 0x522   : > { %7250 = vmatpush3.msra.mxu1 %v5986_v60  ;;  %5833 = vmatprep.subr.mxu0 %v5782_v3  ;;  %v6396_v3 = vsel %vm2051_vm8, %v9903_v1, %v9910_v30 }
 0x523   : > { %7251 = vmatprep.subr.mxu1 %v10157_v54  ;;  %7253 = vmatprep.mubr.msk.f32.mxu1 %vm7545_vm10, %v10157_v54 }
 0x524   : > { %7252 = vmatpush3.msra.mxu1 %v5983_v62  ;;  %5834 = vmatpush1.msra.mxu0 %v10239_v19  ;;  %v6362_v57 = vpop.permute.xlu0 %6361 }
 0x525   : > { %7254 = vmatmul.mubr.msk.f32.vlgmr.msra.gmra.mxu1 %vm2468_vm9, %v4725_v63  ;;  %7256 = vmatprep.subr.mxu1 %v10157_v54  ;;  %v9921_v39 = vpop.permute.xlu1 %6375  ;;  %v6389_v48 = vsel %vm2051_vm8, %v9937_v26, %v6362_v57 }
 0x526   : > { %5835 = vmatprep.subr.mxu0 %v10243_v45  ;;  %7257 = vmatpush3.msra.mxu1 %v6195_v35  ;;  %v6395_v59 = vsel %vm2051_vm8, %v9921_v39, %v6378_v58  ;;  %v6394_v32 = vsel %vm2051_vm8, %v9752_v20, %v9921_v39  ;;  %v4727_v20 = vld [vmem:[%s10079_s6 + $0x20] sm:$0xf] }
 0x527   : > { %5836 = vmatpush1.msra.mxu0 %v5778_v43  ;;  %5869 = vmatprep.mubr.f32.mxu0 %v10157_v54 }
 0x528   : > { %7258 = vmatprep.subr.mxu1 %v10157_v54  ;;  %6808 = vmatmul.mubr.msk.f32.vlgmr.msra.gmra.mxu0 %vm2468_vm9, %v4724_v21  ;;  %v10251_v21 = vld [vmem:[#allocation8_spill] sm:$0xff] }
 0x529   : > { %6032 = vmatprep.subr.mxu0 %v5991_v42  ;;  %7259 = vmatpush3.msra.mxu1 %v6192_v33  ;;  %v9942_v49 = vpop.permute.xlu1 %6365  ;;  %v5981_v44 = vsel %vm1625_vm6, %v10251_v21, %v10250_v51 }
 0x52a   : > { %6033 = vmatpush1.msra.mxu0 %v5990_v10  ;;  %7260 = vmatprep.subr.mxu1 %v10157_v54  ;;  %v6391_v2 = vsel %vm2051_vm8, %v9942_v49, %v9833_v50 }
 0x52b   : > { %6034 = vmatprep.subr.mxu0 %v10246_v38  ;;  %7261 = vmatpush3.msra.mxu1 %v6189_v25 }
 0x52c   : > { %6035 = vmatpush1.msra.mxu0 %v10247_v36  ;;  %7262 = vmatprep.subr.mxu1 %v10157_v54 }
 0x52d   : > { %6036 = vmatprep.subr.mxu0 %v5985_v40  ;;  %7263 = vmatpush3.msra.mxu1 %v6186_v23  ;;  %v6364_v27 = vpop.permute.xlu1 %6363 }
 0x52e   : > { %7264 = vmatprep.mubr.msk.f32.mxu1 %vm7545_vm10, %v10157_v54  ;;  %6037 = vmatpush1.msra.mxu0 %v10249_v18  ;;  %v6390_v1 = vsel %vm2051_vm8, %v6364_v27, %v9942_v49 }
 0x52f   : > { %7265 = vmatmul.mubr.msk.f32.vlgmr.msra.gmra.mxu1 %vm2468_vm9, %v4726_v13  ;;  %7267 = vmatprep.subr.mxu1 %v10157_v54 }
 0x530   : > { %6038 = vmatprep.subr.mxu0 %v10252_v46  ;;  %7268 = vmatpush3.msra.mxu1 %v6398_v28 }
 0x531   : > { %6039 = vmatpush1.msra.mxu0 %v5981_v44  ;;  %6072 = vmatprep.mubr.f32.mxu0 %v10157_v54  ;;  %v6358_v4 = vpop.permute.xlu1 %6357 }
 0x532   : > { %7269 = vmatprep.subr.mxu1 %v10157_v54  ;;  %6810 = vmatmul.mubr.msk.f32.vlgmr.msra.gmra.mxu0 %vm2468_vm9, %v4725_v63  ;;  %v6388_v31 = vsel %vm2051_vm8, %v6358_v4, %v9937_v26 }
 0x533   : > { %6235 = vmatprep.subr.mxu0 %v6194_v22  ;;  %7270 = vmatpush3.msra.mxu1 %v6395_v59 }
 0x534   : > { %6236 = vmatpush1.msra.mxu0 %v6193_v52  ;;  %6275 = vmatprep.mubr.f32.mxu0 %v10157_v54 }
 0x535   : > { %6237 = vmatprep.subr.mxu0 %v6191_v8  ;;  %v6356_v60 = vpop.permute.xlu1 %6355  ;;  %7271 = vmatprep.subr.mxu1 %v10157_v54 }
 0x536   : > { %6238 = vmatpush1.msra.mxu0 %v6190_v5  ;;  %7275 = vmatprep.mubr.msk.f32.mxu1 %vm7545_vm10, %v10157_v54  ;;  %v6387_v63 = vsel %vm2051_vm8, %v6356_v60, %v6358_v4 }
 0x537   : > { %6239 = vmatprep.subr.mxu0 %v6188_v0 }
 0x538   : > { %6240 = vmatpush1.msra.mxu0 %v6187_v14 }
 0x539   : > { %6241 = vmatprep.subr.mxu0 %v6185_v6  ;;  %v6370_v7 = vpop.permute.xlu1 %6369 }
 0x53a   : > { %6242 = vmatpush1.msra.mxu0 %v6184_v24  ;;  %v6392_v47 = vsel %vm2051_vm8, %v9833_v50, %v6370_v7 }
 0x53b   : > { %6812 = vmatmul.mubr.msk.f32.vlgmr.msra.gmra.mxu0 %vm2468_vm9, %v4726_v13  ;;  %6438 = vmatprep.subr.mxu0 %v6397_v15 }
 0x53c   : > { %6439 = vmatpush1.msra.mxu0 %v6396_v3  ;;  %6478 = vmatprep.mubr.f32.mxu0 %v10157_v54 }
 0x53d   : > { %6440 = vmatprep.subr.mxu0 %v6394_v32  ;;  %7272 = vmatpush3.msra.mxu1 %v6392_v47 }
 0x53e   : > { %6441 = vmatpush1.msra.mxu0 %v6393_v56  ;;  %7273 = vmatprep.subr.mxu1 %v10157_v54 }
 0x53f   : > { %6442 = vmatprep.subr.mxu0 %v6391_v2  ;;  %7274 = vmatpush3.msra.mxu1 %v6389_v48 }
 0x540   : > { %6443 = vmatpush1.msra.mxu0 %v6390_v1  ;;  %7276 = vmatmul.mubr.msk.f32.vlgmr.msra.gmra.mxu1 %vm2468_vm9, %v4727_v20 }
 0x541   : > { %6444 = vmatprep.subr.mxu0 %v6388_v31 }
 0x542   : > { %6445 = vmatpush1.msra.mxu0 %v6387_v63 }
 0x543   : > { %6814 = vmatmul.mubr.msk.f32.vlgmr.msra.gmra.mxu0 %vm2468_vm9, %v4727_v20 }
 0x546   : > { %v6561_v15 = vpop.permute.xlu1 %6560 }
 0x5ad   : > { %v4957_v54 = vpop.f32.mrf.mxu1 }
 0x5af   : > { %v7189_v50 = vpop.f32.mrf.mxu1 }
 0x5b4   : > { %v4886_v35 = vpop.f32.mrf.mxu0 }
 0x5b6   : > { %v4888_v34 = vpop.f32.mrf.mxu0 }
 0x5b7   : > { %v5157_v17 = vpop.f32.mrf.mxu1 }
 0x5b8   : > { %v5158_v25 = vadd.f32 %v5157_v17, %v4957_v54 }
 0x5b9   : > { %v7200_v62 = vpop.f32.mrf.mxu1 }
 0x5be   : > { %v5086_v43 = vpop.f32.mrf.mxu0 }
 0x5bf   : > { %v5087_v27 = vadd.f32 %v5086_v43, %v4886_v35 }
 0x5c0   : > { %v5088_v41 = vpop.f32.mrf.mxu0 }
 0x5c1   : > { %v5357_v30 = vpop.f32.mrf.mxu1  ;;  %v5089_v28 = vadd.f32 %v5088_v41, %v4888_v34 }
 0x5c2   : > { %v5363_v23 = vadd.f32 %v5357_v30, %v5158_v25 }
 0x5c3   : > { %v7211_v37 = vpop.f32.mrf.mxu1 }
 0x5c7   : > { %v5286_v12 = vpop.f32.mrf.mxu0 }
 0x5c8   : > { %v5361_v51 = vadd.f32 %v5286_v12, %v5087_v27 }
 0x5c9   : > { %v5288_v29 = vpop.f32.mrf.mxu0 }
 0x5ca   : > { %v5362_v44 = vadd.f32 %v5288_v29, %v5089_v28 }
 0x5cb   : > { %v5560_v19 = vpop.f32.mrf.mxu1 }
 0x5cc   : > { %v5566_v18 = vadd.f32 %v5560_v19, %v5363_v23 }
 0x5cd   : > { %v7222_v61 = vpop.f32.mrf.mxu1 }
 0x5d1   : > { %v5489_v42 = vpop.f32.mrf.mxu0 }
 0x5d2   : > { %v5564_v59 = vadd.f32 %v5489_v42, %v5361_v51 }
 0x5d3   : > { %v5491_v49 = vpop.f32.mrf.mxu0 }
 0x5d4   : > { %v5707_v39 = vpop.f32.mrf.mxu1  ;;  %v5565_v22 = vadd.f32 %v5491_v49, %v5362_v44 }
 0x5d5   : > { %v5713_v21 = vadd.f32 %v5707_v39, %v5566_v18 }
 0x5d6   : > { %v7233_v16 = vpop.f32.mrf.mxu1 }
 0x5db   : > { %v5636_v53 = vpop.f32.mrf.mxu0 }
 0x5dc   : > { %v5711_v52 = vadd.f32 %v5636_v53, %v5564_v59 }
 0x5dd   : > { %v5942_v45 = vpop.f32.mrf.mxu1  ;;  %v5638_v38 = vpop.f32.mrf.mxu0 }
 0x5de   : > { %v5948_v46 = vadd.f32 %v5942_v45, %v5713_v21  ;;  %v5712_v9 = vadd.f32 %v5638_v38, %v5565_v22 }
 0x5df   : > { %v7244_v33 = vpop.f32.mrf.mxu1 }
 0x5e5   : > { %v6145_v26 = vpop.f32.mrf.mxu1 }
 0x5e6   : > { %v6151_v11 = vadd.f32 %v6145_v26, %v5948_v46 }
 0x5e7   : > { %v7255_v10 = vpop.f32.mrf.mxu1 }
 0x5e8   : > { %v5871_v55 = vpop.f32.mrf.mxu0 }
 0x5e9   : > { %v5946_v5 = vadd.f32 %v5871_v55, %v5711_v52 }
 0x5ea   : > { %v5873_v13 = vpop.f32.mrf.mxu0 }
 0x5eb   : > { %v5947_v0 = vadd.f32 %v5873_v13, %v5712_v9 }
 0x5ef   : > { %v6348_v36 = vpop.f32.mrf.mxu1 }
 0x5f0   : > { %v6354_v60 = vadd.f32 %v6348_v36, %v6151_v11 }
 0x5f1   : > { %v7266_v40 = vpop.f32.mrf.mxu1 }
 0x5f2   : > { %v6074_v58 = vpop.f32.mrf.mxu0 }
 0x5f3   : > { %v6149_v14 = vadd.f32 %v6074_v58, %v5946_v5 }
 0x5f4   : > { %v6076_v4 = vpop.f32.mrf.mxu0 }
 0x5f5   : > { %v6150_v47 = vadd.f32 %v6076_v4, %v5947_v0 }
 0x5fb   : > { %v6277_v8 = vpop.f32.mrf.mxu0 }
 0x5fc   : > { %v6352_v57 = vadd.f32 %v6277_v8, %v6149_v14 }
 0x5fd   : > { %v6279_v24 = vpop.f32.mrf.mxu0 }
 0x5fe   : > { %v6353_v48 = vadd.f32 %v6279_v24, %v6150_v47 }
 0x600   : > { %v6551_v6 = vpop.f32.mrf.mxu1 }
 0x601   : > { %v6557_v7 = vadd.f32 %v6551_v6, %v6354_v60 }
 0x602   : > { %v7277_v3 = vpop.f32.mrf.mxu1 }
 0x603   : > { %v6480_v32 = vpop.f32.mrf.mxu0  ;;  %v6565_v56 = vadd.f32 %v6561_v15, %v6557_v7 }
 0x604   : > { %v6555_v2 = vadd.f32 %v6480_v32, %v6352_v57 }
 0x605   : > { %v6482_v1 = vpop.f32.mrf.mxu0  ;;  %v6568_v63 = vadd.f32 0.0003, %v6565_v56 }
 0x606   : > { %v6563_v20 = vadd.f32 %v6561_v15, %v6555_v2  ;;  %v6556_v31 = vadd.f32 %v6482_v1, %v6353_v48 }
 0x607   : > { %6574 = vst [vmem:[%s298_s19 + $0x8] sm:$0xf] %v6568_v63 }
 0x608   : > { %v6564_v54 = vadd.f32 %v6561_v15, %v6556_v31  ;;  %v6566_v50 = vadd.f32 0.0003, %v6563_v20 }
 0x60a   : > { %v6567_v17 = vadd.f32 0.0003, %v6564_v54 }
 0x60c   : > { %v6571_v62 = vcombine.low %v6566_v50, %v6567_v17 }
 0x60e   : > { %6573 = vst [vmem:[%s298_s19] sm:$0xff] %v6571_v62 }
 0x60f   : > { %7486 = shalt.err (!%p7483_p3)
}
 0x610   : > { %s7487_s17 = scalar_lea.hbm %s6588_s25, 192  ;;  %s7491_s19 = scalar_lea.hbm %s10081_s8, 384 }
 0x611   : > { %p7488_p4 = scmp.ne.s32.totalorder %s6588_s25, %s7487_s17  ;;  %p7492_p9 = scmp.lt.s32.totalorder %s6588_s25, %s10081_s8 }
 0x612   : > { %p7493_p10 = scmp.lt.s32.totalorder %s7491_s19, %s7487_s17 }
 0x613   : > { %p7489_p7 = pnand %p7488_p4, %p7630_p5 }
 0x614   : > { %p7494_p11 = por %p7493_p10, %p7492_p9 }
 0x615   : > { %p7490_p8 = pneg %p7489_p7 }
 0x617   : > { %p7495_p12 = pnand %p7494_p11, %p7490_p8 }
 0x619   : > { %7498 = shalt.err (!%p7495_p12)
}
 0x61a   : > { %7281 = dma.vmem_to_hbm [thread:$0]  (%p7630_p5), %s6591_s12, 192, %s6588_s25, %s6576_s26  }
 0x61b PF: > { %p7287_p13 = scmp.ge.s32.totalorder %s7533_s30, 2  ;;  %s6602_s24 = sand.u32 1, %s7521_s27  }
 0x61c   : > { %s6603_s10 = scalar_lea.sflag [#allocation5], %s6602_s24 }
 0x61d   : > { %p7284_p0 = pnand %p7287_p13, %p7634_p6 }
 0x61f   : > { %p7285_p1 = pneg %p7284_p0 }
 0x621   : > { %7516 = dma.done.wait (%p7285_p1), %s6603_s10, 192  }
 0x622   : > { %7518 = vsyncadd (%p7285_p1), %s6603_s10, 4294967104  ;;  %p18_p2 = scmp.ge.s32.totalorder %s7617_s11, 4   ;;  %s10255_s27 = smov %s7525_s28 }
 0x623   : > { %s10256_s28 = smov %s7529_s29  ;;  %s10257_s29 = smov %s7628_s14 }
 0x624   : > { %s10258_s30 = smov %s7617_s11  ;;  %20 = sbr.rel (!%p18_p2) target bundleno = 3 (0x3), region = 87 }
 0x629   :  { %6608 = vsyncpa [#allocation5], 1 }
 0x62a   :  { %6610 = vsyncpa [#allocation5 + $0x1], 1 }

</bundles_post_ra>
